<compile_context>
chip_gen: v6e
topology: v6e:2x2x1
jax: 0.10.0
libtpu: 0.0.40
codegen_flags: <defaults>
</compile_context>

<pallas_src>
import math
import functools

import jax
import jax.numpy as jnp
from jax.experimental import pallas as pl
from jax.experimental.pallas import tpu as pltpu


def _cross_mha_kernel(q_ref, k_ref, v_ref, dmat_ref,
                      w1a_ref, w1b_ref, b1_ref, w2_ref, b2_ref,
                      o_ref, *, num_heads, head_dim, mix_hidden):
    """One batch-block per grid step; all BB batch elements and all heads handled here.

    q_ref    [h, BB, m, hd]  VMEM   (head-major: heads indexed on the leading axis)
    k_ref    [h, BB, n, hd]  VMEM
    v_ref    [h, BB, n, hd]  VMEM
    dmat_ref [BB, m, n]      VMEM
    w1a/w1b/b1/w2 [h*mh] f32 SMEM   (flattened; w1a already has 1/sqrt(hd) folded in)
    b2       [h]      f32    SMEM
    o_ref    [BB, m, h*hd]   VMEM   (lane-dense output slab, heads on lane axis)
    """
    d = dmat_ref[...]                                # [BB, m, n]
    outs = []
    for hi in range(num_heads):                      # static unroll (h is small)
        q = q_ref[hi]                                # [BB, m, hd]
        k = k_ref[hi]                                # [BB, n, hd]
        v = v_ref[hi]                                # [BB, n, hd]

        # Attention scores on the MXU, batched over the BB axis, contracting the
        # shared hd axis directly (no k.T relayout). 1/sqrt(hd) is folded into w1a.
        s = jnp.einsum('bmk,bnk->bmn', q, k,
                       preferred_element_type=jnp.float32)        # [BB, m, n]

        # Score-mixing MLP as a static loop over mh hidden channels on lane-dense
        # [BB, m, n] tiles with per-channel scalar weights from SMEM:
        #   mix = b2 + sum_c w2[c] * relu(s*w1a[c] + d*w1b[c] + b1[c])
        base = hi * mix_hidden
        mix = jnp.full_like(s, b2_ref[hi])                        # [BB, m, n]
        for c in range(mix_hidden):                  # static unroll (mh = 16)
            h_c = s * w1a_ref[base + c] + d * w1b_ref[base + c] + b1_ref[base + c]
            mix = mix + w2_ref[base + c] * jnp.maximum(h_c, 0.0)

        # Numerically-stable softmax over n; normalize AFTER attn@V (hd < n typically)
        # with an approx reciprocal on the EUP.
        mx = jnp.max(mix, axis=-1, keepdims=True)
        e = jnp.exp(mix - mx)
        denom = jnp.sum(e, axis=-1, keepdims=True)                # [BB, m, 1]
        o = jnp.einsum('bmn,bnk->bmk', e, v,
                       preferred_element_type=jnp.float32)        # [BB, m, hd]
        o = o * pl.reciprocal(denom, approx=True)                 # [BB, m, hd]
        outs.append(o)

    # Single lane-dense store of the whole output tile (heads concatenated on lanes).
    o_ref[...] = jnp.concatenate(outs, axis=-1).astype(o_ref.dtype)


def matnet_cross_mha(q_input, kv_input, dmat, params, num_heads, block_b=None):
    """MatNetCrossMHA forward. q_input [b,m,d], kv_input [b,n,d], dmat [b,m,n]."""
    b, m, d = q_input.shape
    n = kv_input.shape[1]
    hd = d // num_heads

    # ---- projections (plain-JAX GEMM glue) ---------------------------------
    q = q_input @ params["Wq"].T                                   # [b, m, d]
    kv = kv_input @ params["Wkv"].T                                # [b, n, 2d]
    # head-major layouts so the kernel indexes heads on the leading Ref axis
    q = q.reshape(b, m, num_heads, hd).transpose(2, 0, 1, 3)       # [h, b, m, hd]
    kv = kv.reshape(b, n, 2, num_heads, hd).transpose(2, 3, 0, 1, 4)  # [2, h, b, n, hd]
    k, v = kv[0], kv[1]                                            # [h, b, n, hd]

    # ---- mixer params, flattened for SMEM; fold 1/sqrt(hd) into w1a --------
    inv_scale = 1.0 / math.sqrt(hd)
    mh = params["mix_b1"].shape[-1]
    w1a = (params["mix_W1"][:, 0, :] * inv_scale).reshape(-1)      # [h*mh]
    w1b = params["mix_W1"][:, 1, :].reshape(-1)                    # [h*mh]
    b1 = params["mix_b1"].reshape(-1)                              # [h*mh]
    w2 = params["mix_W2"][:, :, 0].reshape(-1)                     # [h*mh]
    b2 = params["mix_b2"][:, 0]                                    # [h]

    # ---- batch blocking: amortize per-step pipeline overhead ---------------
    if block_b is None:
        block_b = 1
        for cand in (8, 4, 2):
            if b % cand == 0:
                block_b = cand
                break
    assert b % block_b == 0, "block_b must divide batch"

    kernel = functools.partial(_cross_mha_kernel, num_heads=num_heads,
                               head_dim=hd, mix_hidden=mh)
    smem_spec = pl.BlockSpec(memory_space=pltpu.MemorySpace.SMEM)

    out = pl.pallas_call(
        kernel,
        out_shape=jax.ShapeDtypeStruct((b, m, d), jnp.float32),
        grid_spec=pltpu.PrefetchScalarGridSpec(
            num_scalar_prefetch=0,
            grid=(b // block_b,),
            in_specs=[
                pl.BlockSpec((num_heads, block_b, m, hd), lambda gi: (0, gi, 0, 0)),
                pl.BlockSpec((num_heads, block_b, n, hd), lambda gi: (0, gi, 0, 0)),
                pl.BlockSpec((num_heads, block_b, n, hd), lambda gi: (0, gi, 0, 0)),
                pl.BlockSpec((block_b, m, n), lambda gi: (gi, 0, 0)),
                smem_spec, smem_spec, smem_spec, smem_spec, smem_spec,
            ],
            out_specs=pl.BlockSpec((block_b, m, d), lambda gi: (gi, 0, 0)),
        ),
        compiler_params=pltpu.CompilerParams(
            dimension_semantics=("parallel",),
        ),
    )(q, k, v, dmat, w1a, w1b, b1, w2, b2)                         # [b, m, d]

    return out @ params["Wout"].T


def matnet_mha(row_emb, col_emb, dmat, params_row, params_col, num_heads):
    """MatNetMHA forward: returns (updated_row_emb, updated_col_emb)."""
    upd_row = matnet_cross_mha(row_emb, col_emb, dmat, params_row, num_heads)
    upd_col = matnet_cross_mha(col_emb, row_emb, jnp.swapaxes(dmat, -1, -2),
                               params_col, num_heads)
    return upd_row, upd_col


# ---- pure-JAX reference (mirrors the PyTorch forward exactly) --------------
def matnet_cross_mha_reference(q_input, kv_input, dmat, params, num_heads):
    b, m, d = q_input.shape
    n = kv_input.shape[1]
    hd = d // num_heads
    q = (q_input @ params["Wq"].T).reshape(b, m, num_heads, hd).transpose(0, 2, 1, 3)
    kv = (kv_input @ params["Wkv"].T).reshape(b, n, 2, num_heads, hd).transpose(2, 0, 3, 1, 4)
    k, v = kv[0], kv[1]
    scale = math.sqrt(hd)
    scores = jnp.einsum("bhmd,bhnd->bhmn", q, k) / scale
    mix_in = jnp.stack(
        [scores, jnp.broadcast_to(dmat[:, None, :, :], scores.shape)], axis=-1)  # [b,h,m,n,2]
    hidden = jnp.einsum("bhmnt,htk->bhmnk", mix_in, params["mix_W1"]) \
        + params["mix_b1"][None, :, None, None, :]
    hidden = jnp.maximum(hidden, 0.0)
    mix = jnp.einsum("bhmnk,hko->bhmno", hidden, params["mix_W2"])[..., 0] \
        + params["mix_b2"][None, :, None, :]
    p = jax.nn.softmax(mix, axis=-1)
    out = jnp.einsum("bhmn,bhnd->bhmd", p, v)
    out = out.transpose(0, 2, 1, 3).reshape(b, m, d)
    return out @ params["Wout"].T


def matnet_mha_reference(row_emb, col_emb, dmat, params_row, params_col, num_heads):
    upd_row = matnet_cross_mha_reference(row_emb, col_emb, dmat, params_row, num_heads)
    upd_col = matnet_cross_mha_reference(col_emb, row_emb, jnp.swapaxes(dmat, -1, -2),
                                         params_col, num_heads)
    return upd_row, upd_col


def _make_cross_mha_params(key, embed_dim, num_heads, mixer_hidden_dim):
    mix1_init = (1 / 2) ** 0.5
    mix2_init = (1 / 16) ** 0.5
    lin_bound = 1.0 / math.sqrt(embed_dim)         # nn.Linear default init range
    ks = jax.random.split(key, 7)
    return {
        "Wq":   jax.random.uniform(ks[0], (embed_dim, embed_dim), jnp.float32, -lin_bound, lin_bound),
        "Wkv":  jax.random.uniform(ks[1], (2 * embed_dim, embed_dim), jnp.float32, -lin_bound, lin_bound),
        "Wout": jax.random.uniform(ks[2], (embed_dim, embed_dim), jnp.float32, -lin_bound, lin_bound),
        "mix_W1": jax.random.uniform(ks[3], (num_heads, 2, mixer_hidden_dim), jnp.float32, -mix1_init, mix1_init),
        "mix_b1": jax.random.uniform(ks[4], (num_heads, mixer_hidden_dim), jnp.float32, -mix1_init, mix1_init),
        "mix_W2": jax.random.uniform(ks[5], (num_heads, mixer_hidden_dim, 1), jnp.float32, -mix2_init, mix2_init),
        "mix_b2": jax.random.uniform(ks[6], (num_heads, 1), jnp.float32, -mix2_init, mix2_init),
    }


if __name__ == "__main__":
    # small shapes consistent with the module
    b, m, n = 2, 8, 16
    embed_dim, num_heads, mixer_hidden_dim = 32, 4, 16

    key = jax.random.PRNGKey(0)
    k_row, k_col, k_r, k_c, k_d = jax.random.split(key, 5)

    params_row = _make_cross_mha_params(k_row, embed_dim, num_heads, mixer_hidden_dim)
    params_col = _make_cross_mha_params(k_col, embed_dim, num_heads, mixer_hidden_dim)

    row_emb = jax.random.normal(k_r, (b, m, embed_dim), jnp.float32)
    col_emb = jax.random.normal(k_c, (b, n, embed_dim), jnp.float32)
    dmat = jax.random.normal(k_d, (b, m, n), jnp.float32)

    out_row, out_col = matnet_mha(row_emb, col_emb, dmat, params_row, params_col, num_heads)
    out_row = jax.block_until_ready(out_row)
    out_col = jax.block_until_ready(out_col)

    ref_row, ref_col = matnet_mha_reference(row_emb, col_emb, dmat,
                                            params_row, params_col, num_heads)
    ref_row = jax.block_until_ready(ref_row)
    ref_col = jax.block_until_ready(ref_col)

    assert out_row.shape == (b, m, embed_dim)
    assert out_col.shape == (b, n, embed_dim)
    # tolerance allows for the approx (EUP) reciprocal in the softmax normalization
    assert jnp.allclose(out_row, ref_row, rtol=1e-3, atol=1e-3), "row branch mismatch vs reference"
    assert jnp.allclose(out_col, ref_col, rtol=1e-3, atol=1e-3), "col branch mismatch vs reference"
    print("KERNEL_OK")
</pallas_src>

<mosaic_0001>
module attributes {stable_mosaic.version = 11 : i64} {
  func.func @_cross_mha_kernel(%arg0: i32, %arg1: memref<4x2x8x8xf32, #tpu.memory_space<vmem>>, %arg2: memref<4x2x16x8xf32, #tpu.memory_space<vmem>>, %arg3: memref<4x2x16x8xf32, #tpu.memory_space<vmem>>, %arg4: memref<2x8x16xf32, #tpu.memory_space<vmem>>, %arg5: memref<64xf32, #tpu.memory_space<smem>>, %arg6: memref<64xf32, #tpu.memory_space<smem>>, %arg7: memref<64xf32, #tpu.memory_space<smem>>, %arg8: memref<64xf32, #tpu.memory_space<smem>>, %arg9: memref<4xf32, #tpu.memory_space<smem>>, %arg10: memref<2x8x32xf32, #tpu.memory_space<vmem>>) attributes {dimension_semantics = [#tpu.dimension_semantics<parallel>], iteration_bounds = array<i64: 1>, scalar_prefetch = 0 : i64, scratch_operands = 0 : i64, tpu.core_type = #tpu.core_type<tc>, window_params = [{transform_indices = @transform_0, window_bounds = array<i64: 4, 2, 8, 8>}, {transform_indices = @transform_1, window_bounds = array<i64: 4, 2, 16, 8>}, {transform_indices = @transform_2, window_bounds = array<i64: 4, 2, 16, 8>}, {transform_indices = @transform_3, window_bounds = array<i64: 2, 8, 16>}, {transform_indices = @transform_4, window_bounds = array<i64: 64>}, {transform_indices = @transform_5, window_bounds = array<i64: 64>}, {transform_indices = @transform_6, window_bounds = array<i64: 64>}, {transform_indices = @transform_7, window_bounds = array<i64: 64>}, {transform_indices = @transform_8, window_bounds = array<i64: 4>}, {transform_indices = @transform_9, window_bounds = array<i64: 2, 8, 32>}]} {
    %c0 = arith.constant 0 : index
    %c0_0 = arith.constant 0 : index
    %c0_1 = arith.constant 0 : index
    %0 = vector.load %arg4[%c0, %c0_0, %c0_1] : memref<2x8x16xf32, #tpu.memory_space<vmem>>, vector<2x8x16xf32>
    %c0_2 = arith.constant 0 : index
    %c0_3 = arith.constant 0 : index
    %c0_4 = arith.constant 0 : index
    %c0_5 = arith.constant 0 : index
    %1 = vector.load %arg1[%c0_2, %c0_3, %c0_4, %c0_5] : memref<4x2x8x8xf32, #tpu.memory_space<vmem>>, vector<1x2x8x8xf32>
    %2 = vector.shape_cast %1 : vector<1x2x8x8xf32> to vector<2x8x8xf32>
    %c0_6 = arith.constant 0 : index
    %c0_7 = arith.constant 0 : index
    %c0_8 = arith.constant 0 : index
    %c0_9 = arith.constant 0 : index
    %3 = vector.load %arg2[%c0_6, %c0_7, %c0_8, %c0_9] : memref<4x2x16x8xf32, #tpu.memory_space<vmem>>, vector<1x2x16x8xf32>
    %4 = vector.shape_cast %3 : vector<1x2x16x8xf32> to vector<2x16x8xf32>
    %c0_10 = arith.constant 0 : index
    %c0_11 = arith.constant 0 : index
    %c0_12 = arith.constant 0 : index
    %c0_13 = arith.constant 0 : index
    %5 = vector.load %arg3[%c0_10, %c0_11, %c0_12, %c0_13] : memref<4x2x16x8xf32, #tpu.memory_space<vmem>>, vector<1x2x16x8xf32>
    %6 = vector.shape_cast %5 : vector<1x2x16x8xf32> to vector<2x16x8xf32>
    "tpu.trace_start"() <{level = 10 : i32, message = "bmk,bnk->bmn"}> : () -> ()
    %cst = arith.constant dense<0.000000e+00> : vector<2x8x16xf32>
    %7 = tpu.matmul %2, %4, %cst {dimension_numbers = #tpu.dot_dimension_numbers<[2], [2], [1], [1], [0, 0, 0, 1, 1, 1], [0], [0]>} : vector<2x8x8xf32>, vector<2x16x8xf32>, vector<2x8x16xf32> -> vector<2x8x16xf32>
    "tpu.trace_stop"() : () -> ()
    %c0_14 = arith.constant 0 : index
    %8 = memref.load %arg9[%c0_14] : memref<4xf32, #tpu.memory_space<smem>>
    %9 = vector.broadcast %8 : f32 to vector<2x8x16xf32>
    %c0_15 = arith.constant 0 : index
    %10 = memref.load %arg5[%c0_15] : memref<64xf32, #tpu.memory_space<smem>>
    %11 = vector.broadcast %10 : f32 to vector<2x8x16xf32>
    %12 = arith.mulf %7, %11 : vector<2x8x16xf32>
    %c0_16 = arith.constant 0 : index
    %13 = memref.load %arg6[%c0_16] : memref<64xf32, #tpu.memory_space<smem>>
    %14 = vector.broadcast %13 : f32 to vector<2x8x16xf32>
    %15 = arith.mulf %0, %14 : vector<2x8x16xf32>
    %16 = arith.addf %12, %15 : vector<2x8x16xf32>
    %c0_17 = arith.constant 0 : index
    %17 = memref.load %arg7[%c0_17] : memref<64xf32, #tpu.memory_space<smem>>
    %18 = vector.broadcast %17 : f32 to vector<2x8x16xf32>
    %19 = arith.addf %16, %18 : vector<2x8x16xf32>
    %c0_18 = arith.constant 0 : index
    %20 = memref.load %arg8[%c0_18] : memref<64xf32, #tpu.memory_space<smem>>
    %cst_19 = arith.constant 0.000000e+00 : f32
    %21 = vector.broadcast %cst_19 : f32 to vector<2x8x16xf32>
    %22 = arith.maximumf %19, %21 : vector<2x8x16xf32>
    %23 = vector.broadcast %20 : f32 to vector<2x8x16xf32>
    %24 = arith.mulf %23, %22 : vector<2x8x16xf32>
    %25 = arith.addf %9, %24 : vector<2x8x16xf32>
    %c1 = arith.constant 1 : index
    %26 = memref.load %arg5[%c1] : memref<64xf32, #tpu.memory_space<smem>>
    %27 = vector.broadcast %26 : f32 to vector<2x8x16xf32>
    %28 = arith.mulf %7, %27 : vector<2x8x16xf32>
    %c1_20 = arith.constant 1 : index
    %29 = memref.load %arg6[%c1_20] : memref<64xf32, #tpu.memory_space<smem>>
    %30 = vector.broadcast %29 : f32 to vector<2x8x16xf32>
    %31 = arith.mulf %0, %30 : vector<2x8x16xf32>
    %32 = arith.addf %28, %31 : vector<2x8x16xf32>
    %c1_21 = arith.constant 1 : index
    %33 = memref.load %arg7[%c1_21] : memref<64xf32, #tpu.memory_space<smem>>
    %34 = vector.broadcast %33 : f32 to vector<2x8x16xf32>
    %35 = arith.addf %32, %34 : vector<2x8x16xf32>
    %c1_22 = arith.constant 1 : index
    %36 = memref.load %arg8[%c1_22] : memref<64xf32, #tpu.memory_space<smem>>
    %cst_23 = arith.constant 0.000000e+00 : f32
    %37 = vector.broadcast %cst_23 : f32 to vector<2x8x16xf32>
    %38 = arith.maximumf %35, %37 : vector<2x8x16xf32>
    %39 = vector.broadcast %36 : f32 to vector<2x8x16xf32>
    %40 = arith.mulf %39, %38 : vector<2x8x16xf32>
    %41 = arith.addf %25, %40 : vector<2x8x16xf32>
    %c2 = arith.constant 2 : index
    %42 = memref.load %arg5[%c2] : memref<64xf32, #tpu.memory_space<smem>>
    %43 = vector.broadcast %42 : f32 to vector<2x8x16xf32>
    %44 = arith.mulf %7, %43 : vector<2x8x16xf32>
    %c2_24 = arith.constant 2 : index
    %45 = memref.load %arg6[%c2_24] : memref<64xf32, #tpu.memory_space<smem>>
    %46 = vector.broadcast %45 : f32 to vector<2x8x16xf32>
    %47 = arith.mulf %0, %46 : vector<2x8x16xf32>
    %48 = arith.addf %44, %47 : vector<2x8x16xf32>
    %c2_25 = arith.constant 2 : index
    %49 = memref.load %arg7[%c2_25] : memref<64xf32, #tpu.memory_space<smem>>
    %50 = vector.broadcast %49 : f32 to vector<2x8x16xf32>
    %51 = arith.addf %48, %50 : vector<2x8x16xf32>
    %c2_26 = arith.constant 2 : index
    %52 = memref.load %arg8[%c2_26] : memref<64xf32, #tpu.memory_space<smem>>
    %cst_27 = arith.constant 0.000000e+00 : f32
    %53 = vector.broadcast %cst_27 : f32 to vector<2x8x16xf32>
    %54 = arith.maximumf %51, %53 : vector<2x8x16xf32>
    %55 = vector.broadcast %52 : f32 to vector<2x8x16xf32>
    %56 = arith.mulf %55, %54 : vector<2x8x16xf32>
    %57 = arith.addf %41, %56 : vector<2x8x16xf32>
    %c3 = arith.constant 3 : index
    %58 = memref.load %arg5[%c3] : memref<64xf32, #tpu.memory_space<smem>>
    %59 = vector.broadcast %58 : f32 to vector<2x8x16xf32>
    %60 = arith.mulf %7, %59 : vector<2x8x16xf32>
    %c3_28 = arith.constant 3 : index
    %61 = memref.load %arg6[%c3_28] : memref<64xf32, #tpu.memory_space<smem>>
    %62 = vector.broadcast %61 : f32 to vector<2x8x16xf32>
    %63 = arith.mulf %0, %62 : vector<2x8x16xf32>
    %64 = arith.addf %60, %63 : vector<2x8x16xf32>
    %c3_29 = arith.constant 3 : index
    %65 = memref.load %arg7[%c3_29] : memref<64xf32, #tpu.memory_space<smem>>
    %66 = vector.broadcast %65 : f32 to vector<2x8x16xf32>
    %67 = arith.addf %64, %66 : vector<2x8x16xf32>
    %c3_30 = arith.constant 3 : index
    %68 = memref.load %arg8[%c3_30] : memref<64xf32, #tpu.memory_space<smem>>
    %cst_31 = arith.constant 0.000000e+00 : f32
    %69 = vector.broadcast %cst_31 : f32 to vector<2x8x16xf32>
    %70 = arith.maximumf %67, %69 : vector<2x8x16xf32>
    %71 = vector.broadcast %68 : f32 to vector<2x8x16xf32>
    %72 = arith.mulf %71, %70 : vector<2x8x16xf32>
    %73 = arith.addf %57, %72 : vector<2x8x16xf32>
    %c4 = arith.constant 4 : index
    %74 = memref.load %arg5[%c4] : memref<64xf32, #tpu.memory_space<smem>>
    %75 = vector.broadcast %74 : f32 to vector<2x8x16xf32>
    %76 = arith.mulf %7, %75 : vector<2x8x16xf32>
    %c4_32 = arith.constant 4 : index
    %77 = memref.load %arg6[%c4_32] : memref<64xf32, #tpu.memory_space<smem>>
    %78 = vector.broadcast %77 : f32 to vector<2x8x16xf32>
    %79 = arith.mulf %0, %78 : vector<2x8x16xf32>
    %80 = arith.addf %76, %79 : vector<2x8x16xf32>
    %c4_33 = arith.constant 4 : index
    %81 = memref.load %arg7[%c4_33] : memref<64xf32, #tpu.memory_space<smem>>
    %82 = vector.broadcast %81 : f32 to vector<2x8x16xf32>
    %83 = arith.addf %80, %82 : vector<2x8x16xf32>
    %c4_34 = arith.constant 4 : index
    %84 = memref.load %arg8[%c4_34] : memref<64xf32, #tpu.memory_space<smem>>
    %cst_35 = arith.constant 0.000000e+00 : f32
    %85 = vector.broadcast %cst_35 : f32 to vector<2x8x16xf32>
    %86 = arith.maximumf %83, %85 : vector<2x8x16xf32>
    %87 = vector.broadcast %84 : f32 to vector<2x8x16xf32>
    %88 = arith.mulf %87, %86 : vector<2x8x16xf32>
    %89 = arith.addf %73, %88 : vector<2x8x16xf32>
    %c5 = arith.constant 5 : index
    %90 = memref.load %arg5[%c5] : memref<64xf32, #tpu.memory_space<smem>>
    %91 = vector.broadcast %90 : f32 to vector<2x8x16xf32>
    %92 = arith.mulf %7, %91 : vector<2x8x16xf32>
    %c5_36 = arith.constant 5 : index
    %93 = memref.load %arg6[%c5_36] : memref<64xf32, #tpu.memory_space<smem>>
    %94 = vector.broadcast %93 : f32 to vector<2x8x16xf32>
    %95 = arith.mulf %0, %94 : vector<2x8x16xf32>
    %96 = arith.addf %92, %95 : vector<2x8x16xf32>
    %c5_37 = arith.constant 5 : index
    %97 = memref.load %arg7[%c5_37] : memref<64xf32, #tpu.memory_space<smem>>
    %98 = vector.broadcast %97 : f32 to vector<2x8x16xf32>
    %99 = arith.addf %96, %98 : vector<2x8x16xf32>
    %c5_38 = arith.constant 5 : index
    %100 = memref.load %arg8[%c5_38] : memref<64xf32, #tpu.memory_space<smem>>
    %cst_39 = arith.constant 0.000000e+00 : f32
    %101 = vector.broadcast %cst_39 : f32 to vector<2x8x16xf32>
    %102 = arith.maximumf %99, %101 : vector<2x8x16xf32>
    %103 = vector.broadcast %100 : f32 to vector<2x8x16xf32>
    %104 = arith.mulf %103, %102 : vector<2x8x16xf32>
    %105 = arith.addf %89, %104 : vector<2x8x16xf32>
    %c6 = arith.constant 6 : index
    %106 = memref.load %arg5[%c6] : memref<64xf32, #tpu.memory_space<smem>>
    %107 = vector.broadcast %106 : f32 to vector<2x8x16xf32>
    %108 = arith.mulf %7, %107 : vector<2x8x16xf32>
    %c6_40 = arith.constant 6 : index
    %109 = memref.load %arg6[%c6_40] : memref<64xf32, #tpu.memory_space<smem>>
    %110 = vector.broadcast %109 : f32 to vector<2x8x16xf32>
    %111 = arith.mulf %0, %110 : vector<2x8x16xf32>
    %112 = arith.addf %108, %111 : vector<2x8x16xf32>
    %c6_41 = arith.constant 6 : index
    %113 = memref.load %arg7[%c6_41] : memref<64xf32, #tpu.memory_space<smem>>
    %114 = vector.broadcast %113 : f32 to vector<2x8x16xf32>
    %115 = arith.addf %112, %114 : vector<2x8x16xf32>
    %c6_42 = arith.constant 6 : index
    %116 = memref.load %arg8[%c6_42] : memref<64xf32, #tpu.memory_space<smem>>
    %cst_43 = arith.constant 0.000000e+00 : f32
    %117 = vector.broadcast %cst_43 : f32 to vector<2x8x16xf32>
    %118 = arith.maximumf %115, %117 : vector<2x8x16xf32>
    %119 = vector.broadcast %116 : f32 to vector<2x8x16xf32>
    %120 = arith.mulf %119, %118 : vector<2x8x16xf32>
    %121 = arith.addf %105, %120 : vector<2x8x16xf32>
    %c7 = arith.constant 7 : index
    %122 = memref.load %arg5[%c7] : memref<64xf32, #tpu.memory_space<smem>>
    %123 = vector.broadcast %122 : f32 to vector<2x8x16xf32>
    %124 = arith.mulf %7, %123 : vector<2x8x16xf32>
    %c7_44 = arith.constant 7 : index
    %125 = memref.load %arg6[%c7_44] : memref<64xf32, #tpu.memory_space<smem>>
    %126 = vector.broadcast %125 : f32 to vector<2x8x16xf32>
    %127 = arith.mulf %0, %126 : vector<2x8x16xf32>
    %128 = arith.addf %124, %127 : vector<2x8x16xf32>
    %c7_45 = arith.constant 7 : index
    %129 = memref.load %arg7[%c7_45] : memref<64xf32, #tpu.memory_space<smem>>
    %130 = vector.broadcast %129 : f32 to vector<2x8x16xf32>
    %131 = arith.addf %128, %130 : vector<2x8x16xf32>
    %c7_46 = arith.constant 7 : index
    %132 = memref.load %arg8[%c7_46] : memref<64xf32, #tpu.memory_space<smem>>
    %cst_47 = arith.constant 0.000000e+00 : f32
    %133 = vector.broadcast %cst_47 : f32 to vector<2x8x16xf32>
    %134 = arith.maximumf %131, %133 : vector<2x8x16xf32>
    %135 = vector.broadcast %132 : f32 to vector<2x8x16xf32>
    %136 = arith.mulf %135, %134 : vector<2x8x16xf32>
    %137 = arith.addf %121, %136 : vector<2x8x16xf32>
    %c8 = arith.constant 8 : index
    %138 = memref.load %arg5[%c8] : memref<64xf32, #tpu.memory_space<smem>>
    %139 = vector.broadcast %138 : f32 to vector<2x8x16xf32>
    %140 = arith.mulf %7, %139 : vector<2x8x16xf32>
    %c8_48 = arith.constant 8 : index
    %141 = memref.load %arg6[%c8_48] : memref<64xf32, #tpu.memory_space<smem>>
    %142 = vector.broadcast %141 : f32 to vector<2x8x16xf32>
    %143 = arith.mulf %0, %142 : vector<2x8x16xf32>
    %144 = arith.addf %140, %143 : vector<2x8x16xf32>
    %c8_49 = arith.constant 8 : index
    %145 = memref.load %arg7[%c8_49] : memref<64xf32, #tpu.memory_space<smem>>
    %146 = vector.broadcast %145 : f32 to vector<2x8x16xf32>
    %147 = arith.addf %144, %146 : vector<2x8x16xf32>
    %c8_50 = arith.constant 8 : index
    %148 = memref.load %arg8[%c8_50] : memref<64xf32, #tpu.memory_space<smem>>
    %cst_51 = arith.constant 0.000000e+00 : f32
    %149 = vector.broadcast %cst_51 : f32 to vector<2x8x16xf32>
    %150 = arith.maximumf %147, %149 : vector<2x8x16xf32>
    %151 = vector.broadcast %148 : f32 to vector<2x8x16xf32>
    %152 = arith.mulf %151, %150 : vector<2x8x16xf32>
    %153 = arith.addf %137, %152 : vector<2x8x16xf32>
    %c9 = arith.constant 9 : index
    %154 = memref.load %arg5[%c9] : memref<64xf32, #tpu.memory_space<smem>>
    %155 = vector.broadcast %154 : f32 to vector<2x8x16xf32>
    %156 = arith.mulf %7, %155 : vector<2x8x16xf32>
    %c9_52 = arith.constant 9 : index
    %157 = memref.load %arg6[%c9_52] : memref<64xf32, #tpu.memory_space<smem>>
    %158 = vector.broadcast %157 : f32 to vector<2x8x16xf32>
    %159 = arith.mulf %0, %158 : vector<2x8x16xf32>
    %160 = arith.addf %156, %159 : vector<2x8x16xf32>
    %c9_53 = arith.constant 9 : index
    %161 = memref.load %arg7[%c9_53] : memref<64xf32, #tpu.memory_space<smem>>
    %162 = vector.broadcast %161 : f32 to vector<2x8x16xf32>
    %163 = arith.addf %160, %162 : vector<2x8x16xf32>
    %c9_54 = arith.constant 9 : index
    %164 = memref.load %arg8[%c9_54] : memref<64xf32, #tpu.memory_space<smem>>
    %cst_55 = arith.constant 0.000000e+00 : f32
    %165 = vector.broadcast %cst_55 : f32 to vector<2x8x16xf32>
    %166 = arith.maximumf %163, %165 : vector<2x8x16xf32>
    %167 = vector.broadcast %164 : f32 to vector<2x8x16xf32>
    %168 = arith.mulf %167, %166 : vector<2x8x16xf32>
    %169 = arith.addf %153, %168 : vector<2x8x16xf32>
    %c10 = arith.constant 10 : index
    %170 = memref.load %arg5[%c10] : memref<64xf32, #tpu.memory_space<smem>>
    %171 = vector.broadcast %170 : f32 to vector<2x8x16xf32>
    %172 = arith.mulf %7, %171 : vector<2x8x16xf32>
    %c10_56 = arith.constant 10 : index
    %173 = memref.load %arg6[%c10_56] : memref<64xf32, #tpu.memory_space<smem>>
    %174 = vector.broadcast %173 : f32 to vector<2x8x16xf32>
    %175 = arith.mulf %0, %174 : vector<2x8x16xf32>
    %176 = arith.addf %172, %175 : vector<2x8x16xf32>
    %c10_57 = arith.constant 10 : index
    %177 = memref.load %arg7[%c10_57] : memref<64xf32, #tpu.memory_space<smem>>
    %178 = vector.broadcast %177 : f32 to vector<2x8x16xf32>
    %179 = arith.addf %176, %178 : vector<2x8x16xf32>
    %c10_58 = arith.constant 10 : index
    %180 = memref.load %arg8[%c10_58] : memref<64xf32, #tpu.memory_space<smem>>
    %cst_59 = arith.constant 0.000000e+00 : f32
    %181 = vector.broadcast %cst_59 : f32 to vector<2x8x16xf32>
    %182 = arith.maximumf %179, %181 : vector<2x8x16xf32>
    %183 = vector.broadcast %180 : f32 to vector<2x8x16xf32>
    %184 = arith.mulf %183, %182 : vector<2x8x16xf32>
    %185 = arith.addf %169, %184 : vector<2x8x16xf32>
    %c11 = arith.constant 11 : index
    %186 = memref.load %arg5[%c11] : memref<64xf32, #tpu.memory_space<smem>>
    %187 = vector.broadcast %186 : f32 to vector<2x8x16xf32>
    %188 = arith.mulf %7, %187 : vector<2x8x16xf32>
    %c11_60 = arith.constant 11 : index
    %189 = memref.load %arg6[%c11_60] : memref<64xf32, #tpu.memory_space<smem>>
    %190 = vector.broadcast %189 : f32 to vector<2x8x16xf32>
    %191 = arith.mulf %0, %190 : vector<2x8x16xf32>
    %192 = arith.addf %188, %191 : vector<2x8x16xf32>
    %c11_61 = arith.constant 11 : index
    %193 = memref.load %arg7[%c11_61] : memref<64xf32, #tpu.memory_space<smem>>
    %194 = vector.broadcast %193 : f32 to vector<2x8x16xf32>
    %195 = arith.addf %192, %194 : vector<2x8x16xf32>
    %c11_62 = arith.constant 11 : index
    %196 = memref.load %arg8[%c11_62] : memref<64xf32, #tpu.memory_space<smem>>
    %cst_63 = arith.constant 0.000000e+00 : f32
    %197 = vector.broadcast %cst_63 : f32 to vector<2x8x16xf32>
    %198 = arith.maximumf %195, %197 : vector<2x8x16xf32>
    %199 = vector.broadcast %196 : f32 to vector<2x8x16xf32>
    %200 = arith.mulf %199, %198 : vector<2x8x16xf32>
    %201 = arith.addf %185, %200 : vector<2x8x16xf32>
    %c12 = arith.constant 12 : index
    %202 = memref.load %arg5[%c12] : memref<64xf32, #tpu.memory_space<smem>>
    %203 = vector.broadcast %202 : f32 to vector<2x8x16xf32>
    %204 = arith.mulf %7, %203 : vector<2x8x16xf32>
    %c12_64 = arith.constant 12 : index
    %205 = memref.load %arg6[%c12_64] : memref<64xf32, #tpu.memory_space<smem>>
    %206 = vector.broadcast %205 : f32 to vector<2x8x16xf32>
    %207 = arith.mulf %0, %206 : vector<2x8x16xf32>
    %208 = arith.addf %204, %207 : vector<2x8x16xf32>
    %c12_65 = arith.constant 12 : index
    %209 = memref.load %arg7[%c12_65] : memref<64xf32, #tpu.memory_space<smem>>
    %210 = vector.broadcast %209 : f32 to vector<2x8x16xf32>
    %211 = arith.addf %208, %210 : vector<2x8x16xf32>
    %c12_66 = arith.constant 12 : index
    %212 = memref.load %arg8[%c12_66] : memref<64xf32, #tpu.memory_space<smem>>
    %cst_67 = arith.constant 0.000000e+00 : f32
    %213 = vector.broadcast %cst_67 : f32 to vector<2x8x16xf32>
    %214 = arith.maximumf %211, %213 : vector<2x8x16xf32>
    %215 = vector.broadcast %212 : f32 to vector<2x8x16xf32>
    %216 = arith.mulf %215, %214 : vector<2x8x16xf32>
    %217 = arith.addf %201, %216 : vector<2x8x16xf32>
    %c13 = arith.constant 13 : index
    %218 = memref.load %arg5[%c13] : memref<64xf32, #tpu.memory_space<smem>>
    %219 = vector.broadcast %218 : f32 to vector<2x8x16xf32>
    %220 = arith.mulf %7, %219 : vector<2x8x16xf32>
    %c13_68 = arith.constant 13 : index
    %221 = memref.load %arg6[%c13_68] : memref<64xf32, #tpu.memory_space<smem>>
    %222 = vector.broadcast %221 : f32 to vector<2x8x16xf32>
    %223 = arith.mulf %0, %222 : vector<2x8x16xf32>
    %224 = arith.addf %220, %223 : vector<2x8x16xf32>
    %c13_69 = arith.constant 13 : index
    %225 = memref.load %arg7[%c13_69] : memref<64xf32, #tpu.memory_space<smem>>
    %226 = vector.broadcast %225 : f32 to vector<2x8x16xf32>
    %227 = arith.addf %224, %226 : vector<2x8x16xf32>
    %c13_70 = arith.constant 13 : index
    %228 = memref.load %arg8[%c13_70] : memref<64xf32, #tpu.memory_space<smem>>
    %cst_71 = arith.constant 0.000000e+00 : f32
    %229 = vector.broadcast %cst_71 : f32 to vector<2x8x16xf32>
    %230 = arith.maximumf %227, %229 : vector<2x8x16xf32>
    %231 = vector.broadcast %228 : f32 to vector<2x8x16xf32>
    %232 = arith.mulf %231, %230 : vector<2x8x16xf32>
    %233 = arith.addf %217, %232 : vector<2x8x16xf32>
    %c14 = arith.constant 14 : index
    %234 = memref.load %arg5[%c14] : memref<64xf32, #tpu.memory_space<smem>>
    %235 = vector.broadcast %234 : f32 to vector<2x8x16xf32>
    %236 = arith.mulf %7, %235 : vector<2x8x16xf32>
    %c14_72 = arith.constant 14 : index
    %237 = memref.load %arg6[%c14_72] : memref<64xf32, #tpu.memory_space<smem>>
    %238 = vector.broadcast %237 : f32 to vector<2x8x16xf32>
    %239 = arith.mulf %0, %238 : vector<2x8x16xf32>
    %240 = arith.addf %236, %239 : vector<2x8x16xf32>
    %c14_73 = arith.constant 14 : index
    %241 = memref.load %arg7[%c14_73] : memref<64xf32, #tpu.memory_space<smem>>
    %242 = vector.broadcast %241 : f32 to vector<2x8x16xf32>
    %243 = arith.addf %240, %242 : vector<2x8x16xf32>
    %c14_74 = arith.constant 14 : index
    %244 = memref.load %arg8[%c14_74] : memref<64xf32, #tpu.memory_space<smem>>
    %cst_75 = arith.constant 0.000000e+00 : f32
    %245 = vector.broadcast %cst_75 : f32 to vector<2x8x16xf32>
    %246 = arith.maximumf %243, %245 : vector<2x8x16xf32>
    %247 = vector.broadcast %244 : f32 to vector<2x8x16xf32>
    %248 = arith.mulf %247, %246 : vector<2x8x16xf32>
    %249 = arith.addf %233, %248 : vector<2x8x16xf32>
    %c15 = arith.constant 15 : index
    %250 = memref.load %arg5[%c15] : memref<64xf32, #tpu.memory_space<smem>>
    %251 = vector.broadcast %250 : f32 to vector<2x8x16xf32>
    %252 = arith.mulf %7, %251 : vector<2x8x16xf32>
    %c15_76 = arith.constant 15 : index
    %253 = memref.load %arg6[%c15_76] : memref<64xf32, #tpu.memory_space<smem>>
    %254 = vector.broadcast %253 : f32 to vector<2x8x16xf32>
    %255 = arith.mulf %0, %254 : vector<2x8x16xf32>
    %256 = arith.addf %252, %255 : vector<2x8x16xf32>
    %c15_77 = arith.constant 15 : index
    %257 = memref.load %arg7[%c15_77] : memref<64xf32, #tpu.memory_space<smem>>
    %258 = vector.broadcast %257 : f32 to vector<2x8x16xf32>
    %259 = arith.addf %256, %258 : vector<2x8x16xf32>
    %c15_78 = arith.constant 15 : index
    %260 = memref.load %arg8[%c15_78] : memref<64xf32, #tpu.memory_space<smem>>
    %cst_79 = arith.constant 0.000000e+00 : f32
    %261 = vector.broadcast %cst_79 : f32 to vector<2x8x16xf32>
    %262 = arith.maximumf %259, %261 : vector<2x8x16xf32>
    %263 = vector.broadcast %260 : f32 to vector<2x8x16xf32>
    %264 = arith.mulf %263, %262 : vector<2x8x16xf32>
    %265 = arith.addf %249, %264 : vector<2x8x16xf32>
    %cst_80 = arith.constant dense<0xFF800000> : vector<2x8xf32>
    %266 = vector.multi_reduction <maximumf>, %265, %cst_80 [2] : vector<2x8x16xf32> to vector<2x8xf32>
    %267 = vector.shape_cast %266 : vector<2x8xf32> to vector<2x8x1xf32>
    %268 = vector.broadcast %267 : vector<2x8x1xf32> to vector<2x8x16xf32>
    %269 = arith.subf %265, %268 : vector<2x8x16xf32>
    %270 = math.exp %269 : vector<2x8x16xf32>
    %cst_81 = arith.constant dense<0.000000e+00> : vector<2x8xf32>
    %271 = vector.multi_reduction <add>, %270, %cst_81 [2] : vector<2x8x16xf32> to vector<2x8xf32>
    %272 = vector.shape_cast %271 : vector<2x8xf32> to vector<2x8x1xf32>
    "tpu.trace_start"() <{level = 10 : i32, message = "bmn,bnk->bmk"}> : () -> ()
    %cst_82 = arith.constant dense<0.000000e+00> : vector<2x8x8xf32>
    %273 = tpu.matmul %270, %6, %cst_82 {dimension_numbers = #tpu.dot_dimension_numbers<[2], [1], [1], [2], [0, 0, 0, 1, 1, 2], [0], [0]>} : vector<2x8x16xf32>, vector<2x16x8xf32>, vector<2x8x8xf32> -> vector<2x8x8xf32>
    "tpu.trace_stop"() : () -> ()
    %274 = tpu.reciprocal %272 {approx = true} : vector<2x8x1xf32> -> vector<2x8x1xf32>
    %275 = vector.broadcast %274 : vector<2x8x1xf32> to vector<2x8x8xf32>
    %276 = arith.mulf %273, %275 : vector<2x8x8xf32>
    %c1_83 = arith.constant 1 : index
    %c0_84 = arith.constant 0 : index
    %c0_85 = arith.constant 0 : index
    %c0_86 = arith.constant 0 : index
    %277 = vector.load %arg1[%c1_83, %c0_84, %c0_85, %c0_86] : memref<4x2x8x8xf32, #tpu.memory_space<vmem>>, vector<1x2x8x8xf32>
    %278 = vector.shape_cast %277 : vector<1x2x8x8xf32> to vector<2x8x8xf32>
    %c1_87 = arith.constant 1 : index
    %c0_88 = arith.constant 0 : index
    %c0_89 = arith.constant 0 : index
    %c0_90 = arith.constant 0 : index
    %279 = vector.load %arg2[%c1_87, %c0_88, %c0_89, %c0_90] : memref<4x2x16x8xf32, #tpu.memory_space<vmem>>, vector<1x2x16x8xf32>
    %280 = vector.shape_cast %279 : vector<1x2x16x8xf32> to vector<2x16x8xf32>
    %c1_91 = arith.constant 1 : index
    %c0_92 = arith.constant 0 : index
    %c0_93 = arith.constant 0 : index
    %c0_94 = arith.constant 0 : index
    %281 = vector.load %arg3[%c1_91, %c0_92, %c0_93, %c0_94] : memref<4x2x16x8xf32, #tpu.memory_space<vmem>>, vector<1x2x16x8xf32>
    %282 = vector.shape_cast %281 : vector<1x2x16x8xf32> to vector<2x16x8xf32>
    "tpu.trace_start"() <{level = 10 : i32, message = "bmk,bnk->bmn"}> : () -> ()
    %cst_95 = arith.constant dense<0.000000e+00> : vector<2x8x16xf32>
    %283 = tpu.matmul %278, %280, %cst_95 {dimension_numbers = #tpu.dot_dimension_numbers<[2], [2], [1], [1], [0, 0, 0, 1, 1, 1], [0], [0]>} : vector<2x8x8xf32>, vector<2x16x8xf32>, vector<2x8x16xf32> -> vector<2x8x16xf32>
    "tpu.trace_stop"() : () -> ()
    %c1_96 = arith.constant 1 : index
    %284 = memref.load %arg9[%c1_96] : memref<4xf32, #tpu.memory_space<smem>>
    %285 = vector.broadcast %284 : f32 to vector<2x8x16xf32>
    %c16 = arith.constant 16 : index
    %286 = memref.load %arg5[%c16] : memref<64xf32, #tpu.memory_space<smem>>
    %287 = vector.broadcast %286 : f32 to vector<2x8x16xf32>
    %288 = arith.mulf %283, %287 : vector<2x8x16xf32>
    %c16_97 = arith.constant 16 : index
    %289 = memref.load %arg6[%c16_97] : memref<64xf32, #tpu.memory_space<smem>>
    %290 = vector.broadcast %289 : f32 to vector<2x8x16xf32>
    %291 = arith.mulf %0, %290 : vector<2x8x16xf32>
    %292 = arith.addf %288, %291 : vector<2x8x16xf32>
    %c16_98 = arith.constant 16 : index
    %293 = memref.load %arg7[%c16_98] : memref<64xf32, #tpu.memory_space<smem>>
    %294 = vector.broadcast %293 : f32 to vector<2x8x16xf32>
    %295 = arith.addf %292, %294 : vector<2x8x16xf32>
    %c16_99 = arith.constant 16 : index
    %296 = memref.load %arg8[%c16_99] : memref<64xf32, #tpu.memory_space<smem>>
    %cst_100 = arith.constant 0.000000e+00 : f32
    %297 = vector.broadcast %cst_100 : f32 to vector<2x8x16xf32>
    %298 = arith.maximumf %295, %297 : vector<2x8x16xf32>
    %299 = vector.broadcast %296 : f32 to vector<2x8x16xf32>
    %300 = arith.mulf %299, %298 : vector<2x8x16xf32>
    %301 = arith.addf %285, %300 : vector<2x8x16xf32>
    %c17 = arith.constant 17 : index
    %302 = memref.load %arg5[%c17] : memref<64xf32, #tpu.memory_space<smem>>
    %303 = vector.broadcast %302 : f32 to vector<2x8x16xf32>
    %304 = arith.mulf %283, %303 : vector<2x8x16xf32>
    %c17_101 = arith.constant 17 : index
    %305 = memref.load %arg6[%c17_101] : memref<64xf32, #tpu.memory_space<smem>>
    %306 = vector.broadcast %305 : f32 to vector<2x8x16xf32>
    %307 = arith.mulf %0, %306 : vector<2x8x16xf32>
    %308 = arith.addf %304, %307 : vector<2x8x16xf32>
    %c17_102 = arith.constant 17 : index
    %309 = memref.load %arg7[%c17_102] : memref<64xf32, #tpu.memory_space<smem>>
    %310 = vector.broadcast %309 : f32 to vector<2x8x16xf32>
    %311 = arith.addf %308, %310 : vector<2x8x16xf32>
    %c17_103 = arith.constant 17 : index
    %312 = memref.load %arg8[%c17_103] : memref<64xf32, #tpu.memory_space<smem>>
    %cst_104 = arith.constant 0.000000e+00 : f32
    %313 = vector.broadcast %cst_104 : f32 to vector<2x8x16xf32>
    %314 = arith.maximumf %311, %313 : vector<2x8x16xf32>
    %315 = vector.broadcast %312 : f32 to vector<2x8x16xf32>
    %316 = arith.mulf %315, %314 : vector<2x8x16xf32>
    %317 = arith.addf %301, %316 : vector<2x8x16xf32>
    %c18 = arith.constant 18 : index
    %318 = memref.load %arg5[%c18] : memref<64xf32, #tpu.memory_space<smem>>
    %319 = vector.broadcast %318 : f32 to vector<2x8x16xf32>
    %320 = arith.mulf %283, %319 : vector<2x8x16xf32>
    %c18_105 = arith.constant 18 : index
    %321 = memref.load %arg6[%c18_105] : memref<64xf32, #tpu.memory_space<smem>>
    %322 = vector.broadcast %321 : f32 to vector<2x8x16xf32>
    %323 = arith.mulf %0, %322 : vector<2x8x16xf32>
    %324 = arith.addf %320, %323 : vector<2x8x16xf32>
    %c18_106 = arith.constant 18 : index
    %325 = memref.load %arg7[%c18_106] : memref<64xf32, #tpu.memory_space<smem>>
    %326 = vector.broadcast %325 : f32 to vector<2x8x16xf32>
    %327 = arith.addf %324, %326 : vector<2x8x16xf32>
    %c18_107 = arith.constant 18 : index
    %328 = memref.load %arg8[%c18_107] : memref<64xf32, #tpu.memory_space<smem>>
    %cst_108 = arith.constant 0.000000e+00 : f32
    %329 = vector.broadcast %cst_108 : f32 to vector<2x8x16xf32>
    %330 = arith.maximumf %327, %329 : vector<2x8x16xf32>
    %331 = vector.broadcast %328 : f32 to vector<2x8x16xf32>
    %332 = arith.mulf %331, %330 : vector<2x8x16xf32>
    %333 = arith.addf %317, %332 : vector<2x8x16xf32>
    %c19 = arith.constant 19 : index
    %334 = memref.load %arg5[%c19] : memref<64xf32, #tpu.memory_space<smem>>
    %335 = vector.broadcast %334 : f32 to vector<2x8x16xf32>
    %336 = arith.mulf %283, %335 : vector<2x8x16xf32>
    %c19_109 = arith.constant 19 : index
    %337 = memref.load %arg6[%c19_109] : memref<64xf32, #tpu.memory_space<smem>>
    %338 = vector.broadcast %337 : f32 to vector<2x8x16xf32>
    %339 = arith.mulf %0, %338 : vector<2x8x16xf32>
    %340 = arith.addf %336, %339 : vector<2x8x16xf32>
    %c19_110 = arith.constant 19 : index
    %341 = memref.load %arg7[%c19_110] : memref<64xf32, #tpu.memory_space<smem>>
    %342 = vector.broadcast %341 : f32 to vector<2x8x16xf32>
    %343 = arith.addf %340, %342 : vector<2x8x16xf32>
    %c19_111 = arith.constant 19 : index
    %344 = memref.load %arg8[%c19_111] : memref<64xf32, #tpu.memory_space<smem>>
    %cst_112 = arith.constant 0.000000e+00 : f32
    %345 = vector.broadcast %cst_112 : f32 to vector<2x8x16xf32>
    %346 = arith.maximumf %343, %345 : vector<2x8x16xf32>
    %347 = vector.broadcast %344 : f32 to vector<2x8x16xf32>
    %348 = arith.mulf %347, %346 : vector<2x8x16xf32>
    %349 = arith.addf %333, %348 : vector<2x8x16xf32>
    %c20 = arith.constant 20 : index
    %350 = memref.load %arg5[%c20] : memref<64xf32, #tpu.memory_space<smem>>
    %351 = vector.broadcast %350 : f32 to vector<2x8x16xf32>
    %352 = arith.mulf %283, %351 : vector<2x8x16xf32>
    %c20_113 = arith.constant 20 : index
    %353 = memref.load %arg6[%c20_113] : memref<64xf32, #tpu.memory_space<smem>>
    %354 = vector.broadcast %353 : f32 to vector<2x8x16xf32>
    %355 = arith.mulf %0, %354 : vector<2x8x16xf32>
    %356 = arith.addf %352, %355 : vector<2x8x16xf32>
    %c20_114 = arith.constant 20 : index
    %357 = memref.load %arg7[%c20_114] : memref<64xf32, #tpu.memory_space<smem>>
    %358 = vector.broadcast %357 : f32 to vector<2x8x16xf32>
    %359 = arith.addf %356, %358 : vector<2x8x16xf32>
    %c20_115 = arith.constant 20 : index
    %360 = memref.load %arg8[%c20_115] : memref<64xf32, #tpu.memory_space<smem>>
    %cst_116 = arith.constant 0.000000e+00 : f32
    %361 = vector.broadcast %cst_116 : f32 to vector<2x8x16xf32>
    %362 = arith.maximumf %359, %361 : vector<2x8x16xf32>
    %363 = vector.broadcast %360 : f32 to vector<2x8x16xf32>
    %364 = arith.mulf %363, %362 : vector<2x8x16xf32>
    %365 = arith.addf %349, %364 : vector<2x8x16xf32>
    %c21 = arith.constant 21 : index
    %366 = memref.load %arg5[%c21] : memref<64xf32, #tpu.memory_space<smem>>
    %367 = vector.broadcast %366 : f32 to vector<2x8x16xf32>
    %368 = arith.mulf %283, %367 : vector<2x8x16xf32>
    %c21_117 = arith.constant 21 : index
    %369 = memref.load %arg6[%c21_117] : memref<64xf32, #tpu.memory_space<smem>>
    %370 = vector.broadcast %369 : f32 to vector<2x8x16xf32>
    %371 = arith.mulf %0, %370 : vector<2x8x16xf32>
    %372 = arith.addf %368, %371 : vector<2x8x16xf32>
    %c21_118 = arith.constant 21 : index
    %373 = memref.load %arg7[%c21_118] : memref<64xf32, #tpu.memory_space<smem>>
    %374 = vector.broadcast %373 : f32 to vector<2x8x16xf32>
    %375 = arith.addf %372, %374 : vector<2x8x16xf32>
    %c21_119 = arith.constant 21 : index
    %376 = memref.load %arg8[%c21_119] : memref<64xf32, #tpu.memory_space<smem>>
    %cst_120 = arith.constant 0.000000e+00 : f32
    %377 = vector.broadcast %cst_120 : f32 to vector<2x8x16xf32>
    %378 = arith.maximumf %375, %377 : vector<2x8x16xf32>
    %379 = vector.broadcast %376 : f32 to vector<2x8x16xf32>
    %380 = arith.mulf %379, %378 : vector<2x8x16xf32>
    %381 = arith.addf %365, %380 : vector<2x8x16xf32>
    %c22 = arith.constant 22 : index
    %382 = memref.load %arg5[%c22] : memref<64xf32, #tpu.memory_space<smem>>
    %383 = vector.broadcast %382 : f32 to vector<2x8x16xf32>
    %384 = arith.mulf %283, %383 : vector<2x8x16xf32>
    %c22_121 = arith.constant 22 : index
    %385 = memref.load %arg6[%c22_121] : memref<64xf32, #tpu.memory_space<smem>>
    %386 = vector.broadcast %385 : f32 to vector<2x8x16xf32>
    %387 = arith.mulf %0, %386 : vector<2x8x16xf32>
    %388 = arith.addf %384, %387 : vector<2x8x16xf32>
    %c22_122 = arith.constant 22 : index
    %389 = memref.load %arg7[%c22_122] : memref<64xf32, #tpu.memory_space<smem>>
    %390 = vector.broadcast %389 : f32 to vector<2x8x16xf32>
    %391 = arith.addf %388, %390 : vector<2x8x16xf32>
    %c22_123 = arith.constant 22 : index
    %392 = memref.load %arg8[%c22_123] : memref<64xf32, #tpu.memory_space<smem>>
    %cst_124 = arith.constant 0.000000e+00 : f32
    %393 = vector.broadcast %cst_124 : f32 to vector<2x8x16xf32>
    %394 = arith.maximumf %391, %393 : vector<2x8x16xf32>
    %395 = vector.broadcast %392 : f32 to vector<2x8x16xf32>
    %396 = arith.mulf %395, %394 : vector<2x8x16xf32>
    %397 = arith.addf %381, %396 : vector<2x8x16xf32>
    %c23 = arith.constant 23 : index
    %398 = memref.load %arg5[%c23] : memref<64xf32, #tpu.memory_space<smem>>
    %399 = vector.broadcast %398 : f32 to vector<2x8x16xf32>
    %400 = arith.mulf %283, %399 : vector<2x8x16xf32>
    %c23_125 = arith.constant 23 : index
    %401 = memref.load %arg6[%c23_125] : memref<64xf32, #tpu.memory_space<smem>>
    %402 = vector.broadcast %401 : f32 to vector<2x8x16xf32>
    %403 = arith.mulf %0, %402 : vector<2x8x16xf32>
    %404 = arith.addf %400, %403 : vector<2x8x16xf32>
    %c23_126 = arith.constant 23 : index
    %405 = memref.load %arg7[%c23_126] : memref<64xf32, #tpu.memory_space<smem>>
    %406 = vector.broadcast %405 : f32 to vector<2x8x16xf32>
    %407 = arith.addf %404, %406 : vector<2x8x16xf32>
    %c23_127 = arith.constant 23 : index
    %408 = memref.load %arg8[%c23_127] : memref<64xf32, #tpu.memory_space<smem>>
    %cst_128 = arith.constant 0.000000e+00 : f32
    %409 = vector.broadcast %cst_128 : f32 to vector<2x8x16xf32>
    %410 = arith.maximumf %407, %409 : vector<2x8x16xf32>
    %411 = vector.broadcast %408 : f32 to vector<2x8x16xf32>
    %412 = arith.mulf %411, %410 : vector<2x8x16xf32>
    %413 = arith.addf %397, %412 : vector<2x8x16xf32>
    %c24 = arith.constant 24 : index
    %414 = memref.load %arg5[%c24] : memref<64xf32, #tpu.memory_space<smem>>
    %415 = vector.broadcast %414 : f32 to vector<2x8x16xf32>
    %416 = arith.mulf %283, %415 : vector<2x8x16xf32>
    %c24_129 = arith.constant 24 : index
    %417 = memref.load %arg6[%c24_129] : memref<64xf32, #tpu.memory_space<smem>>
    %418 = vector.broadcast %417 : f32 to vector<2x8x16xf32>
    %419 = arith.mulf %0, %418 : vector<2x8x16xf32>
    %420 = arith.addf %416, %419 : vector<2x8x16xf32>
    %c24_130 = arith.constant 24 : index
    %421 = memref.load %arg7[%c24_130] : memref<64xf32, #tpu.memory_space<smem>>
    %422 = vector.broadcast %421 : f32 to vector<2x8x16xf32>
    %423 = arith.addf %420, %422 : vector<2x8x16xf32>
    %c24_131 = arith.constant 24 : index
    %424 = memref.load %arg8[%c24_131] : memref<64xf32, #tpu.memory_space<smem>>
    %cst_132 = arith.constant 0.000000e+00 : f32
    %425 = vector.broadcast %cst_132 : f32 to vector<2x8x16xf32>
    %426 = arith.maximumf %423, %425 : vector<2x8x16xf32>
    %427 = vector.broadcast %424 : f32 to vector<2x8x16xf32>
    %428 = arith.mulf %427, %426 : vector<2x8x16xf32>
    %429 = arith.addf %413, %428 : vector<2x8x16xf32>
    %c25 = arith.constant 25 : index
    %430 = memref.load %arg5[%c25] : memref<64xf32, #tpu.memory_space<smem>>
    %431 = vector.broadcast %430 : f32 to vector<2x8x16xf32>
    %432 = arith.mulf %283, %431 : vector<2x8x16xf32>
    %c25_133 = arith.constant 25 : index
    %433 = memref.load %arg6[%c25_133] : memref<64xf32, #tpu.memory_space<smem>>
    %434 = vector.broadcast %433 : f32 to vector<2x8x16xf32>
    %435 = arith.mulf %0, %434 : vector<2x8x16xf32>
    %436 = arith.addf %432, %435 : vector<2x8x16xf32>
    %c25_134 = arith.constant 25 : index
    %437 = memref.load %arg7[%c25_134] : memref<64xf32, #tpu.memory_space<smem>>
    %438 = vector.broadcast %437 : f32 to vector<2x8x16xf32>
    %439 = arith.addf %436, %438 : vector<2x8x16xf32>
    %c25_135 = arith.constant 25 : index
    %440 = memref.load %arg8[%c25_135] : memref<64xf32, #tpu.memory_space<smem>>
    %cst_136 = arith.constant 0.000000e+00 : f32
    %441 = vector.broadcast %cst_136 : f32 to vector<2x8x16xf32>
    %442 = arith.maximumf %439, %441 : vector<2x8x16xf32>
    %443 = vector.broadcast %440 : f32 to vector<2x8x16xf32>
    %444 = arith.mulf %443, %442 : vector<2x8x16xf32>
    %445 = arith.addf %429, %444 : vector<2x8x16xf32>
    %c26 = arith.constant 26 : index
    %446 = memref.load %arg5[%c26] : memref<64xf32, #tpu.memory_space<smem>>
    %447 = vector.broadcast %446 : f32 to vector<2x8x16xf32>
    %448 = arith.mulf %283, %447 : vector<2x8x16xf32>
    %c26_137 = arith.constant 26 : index
    %449 = memref.load %arg6[%c26_137] : memref<64xf32, #tpu.memory_space<smem>>
    %450 = vector.broadcast %449 : f32 to vector<2x8x16xf32>
    %451 = arith.mulf %0, %450 : vector<2x8x16xf32>
    %452 = arith.addf %448, %451 : vector<2x8x16xf32>
    %c26_138 = arith.constant 26 : index
    %453 = memref.load %arg7[%c26_138] : memref<64xf32, #tpu.memory_space<smem>>
    %454 = vector.broadcast %453 : f32 to vector<2x8x16xf32>
    %455 = arith.addf %452, %454 : vector<2x8x16xf32>
    %c26_139 = arith.constant 26 : index
    %456 = memref.load %arg8[%c26_139] : memref<64xf32, #tpu.memory_space<smem>>
    %cst_140 = arith.constant 0.000000e+00 : f32
    %457 = vector.broadcast %cst_140 : f32 to vector<2x8x16xf32>
    %458 = arith.maximumf %455, %457 : vector<2x8x16xf32>
    %459 = vector.broadcast %456 : f32 to vector<2x8x16xf32>
    %460 = arith.mulf %459, %458 : vector<2x8x16xf32>
    %461 = arith.addf %445, %460 : vector<2x8x16xf32>
    %c27 = arith.constant 27 : index
    %462 = memref.load %arg5[%c27] : memref<64xf32, #tpu.memory_space<smem>>
    %463 = vector.broadcast %462 : f32 to vector<2x8x16xf32>
    %464 = arith.mulf %283, %463 : vector<2x8x16xf32>
    %c27_141 = arith.constant 27 : index
    %465 = memref.load %arg6[%c27_141] : memref<64xf32, #tpu.memory_space<smem>>
    %466 = vector.broadcast %465 : f32 to vector<2x8x16xf32>
    %467 = arith.mulf %0, %466 : vector<2x8x16xf32>
    %468 = arith.addf %464, %467 : vector<2x8x16xf32>
    %c27_142 = arith.constant 27 : index
    %469 = memref.load %arg7[%c27_142] : memref<64xf32, #tpu.memory_space<smem>>
    %470 = vector.broadcast %469 : f32 to vector<2x8x16xf32>
    %471 = arith.addf %468, %470 : vector<2x8x16xf32>
    %c27_143 = arith.constant 27 : index
    %472 = memref.load %arg8[%c27_143] : memref<64xf32, #tpu.memory_space<smem>>
    %cst_144 = arith.constant 0.000000e+00 : f32
    %473 = vector.broadcast %cst_144 : f32 to vector<2x8x16xf32>
    %474 = arith.maximumf %471, %473 : vector<2x8x16xf32>
    %475 = vector.broadcast %472 : f32 to vector<2x8x16xf32>
    %476 = arith.mulf %475, %474 : vector<2x8x16xf32>
    %477 = arith.addf %461, %476 : vector<2x8x16xf32>
    %c28 = arith.constant 28 : index
    %478 = memref.load %arg5[%c28] : memref<64xf32, #tpu.memory_space<smem>>
    %479 = vector.broadcast %478 : f32 to vector<2x8x16xf32>
    %480 = arith.mulf %283, %479 : vector<2x8x16xf32>
    %c28_145 = arith.constant 28 : index
    %481 = memref.load %arg6[%c28_145] : memref<64xf32, #tpu.memory_space<smem>>
    %482 = vector.broadcast %481 : f32 to vector<2x8x16xf32>
    %483 = arith.mulf %0, %482 : vector<2x8x16xf32>
    %484 = arith.addf %480, %483 : vector<2x8x16xf32>
    %c28_146 = arith.constant 28 : index
    %485 = memref.load %arg7[%c28_146] : memref<64xf32, #tpu.memory_space<smem>>
    %486 = vector.broadcast %485 : f32 to vector<2x8x16xf32>
    %487 = arith.addf %484, %486 : vector<2x8x16xf32>
    %c28_147 = arith.constant 28 : index
    %488 = memref.load %arg8[%c28_147] : memref<64xf32, #tpu.memory_space<smem>>
    %cst_148 = arith.constant 0.000000e+00 : f32
    %489 = vector.broadcast %cst_148 : f32 to vector<2x8x16xf32>
    %490 = arith.maximumf %487, %489 : vector<2x8x16xf32>
    %491 = vector.broadcast %488 : f32 to vector<2x8x16xf32>
    %492 = arith.mulf %491, %490 : vector<2x8x16xf32>
    %493 = arith.addf %477, %492 : vector<2x8x16xf32>
    %c29 = arith.constant 29 : index
    %494 = memref.load %arg5[%c29] : memref<64xf32, #tpu.memory_space<smem>>
    %495 = vector.broadcast %494 : f32 to vector<2x8x16xf32>
    %496 = arith.mulf %283, %495 : vector<2x8x16xf32>
    %c29_149 = arith.constant 29 : index
    %497 = memref.load %arg6[%c29_149] : memref<64xf32, #tpu.memory_space<smem>>
    %498 = vector.broadcast %497 : f32 to vector<2x8x16xf32>
    %499 = arith.mulf %0, %498 : vector<2x8x16xf32>
    %500 = arith.addf %496, %499 : vector<2x8x16xf32>
    %c29_150 = arith.constant 29 : index
    %501 = memref.load %arg7[%c29_150] : memref<64xf32, #tpu.memory_space<smem>>
    %502 = vector.broadcast %501 : f32 to vector<2x8x16xf32>
    %503 = arith.addf %500, %502 : vector<2x8x16xf32>
    %c29_151 = arith.constant 29 : index
    %504 = memref.load %arg8[%c29_151] : memref<64xf32, #tpu.memory_space<smem>>
    %cst_152 = arith.constant 0.000000e+00 : f32
    %505 = vector.broadcast %cst_152 : f32 to vector<2x8x16xf32>
    %506 = arith.maximumf %503, %505 : vector<2x8x16xf32>
    %507 = vector.broadcast %504 : f32 to vector<2x8x16xf32>
    %508 = arith.mulf %507, %506 : vector<2x8x16xf32>
    %509 = arith.addf %493, %508 : vector<2x8x16xf32>
    %c30 = arith.constant 30 : index
    %510 = memref.load %arg5[%c30] : memref<64xf32, #tpu.memory_space<smem>>
    %511 = vector.broadcast %510 : f32 to vector<2x8x16xf32>
    %512 = arith.mulf %283, %511 : vector<2x8x16xf32>
    %c30_153 = arith.constant 30 : index
    %513 = memref.load %arg6[%c30_153] : memref<64xf32, #tpu.memory_space<smem>>
    %514 = vector.broadcast %513 : f32 to vector<2x8x16xf32>
    %515 = arith.mulf %0, %514 : vector<2x8x16xf32>
    %516 = arith.addf %512, %515 : vector<2x8x16xf32>
    %c30_154 = arith.constant 30 : index
    %517 = memref.load %arg7[%c30_154] : memref<64xf32, #tpu.memory_space<smem>>
    %518 = vector.broadcast %517 : f32 to vector<2x8x16xf32>
    %519 = arith.addf %516, %518 : vector<2x8x16xf32>
    %c30_155 = arith.constant 30 : index
    %520 = memref.load %arg8[%c30_155] : memref<64xf32, #tpu.memory_space<smem>>
    %cst_156 = arith.constant 0.000000e+00 : f32
    %521 = vector.broadcast %cst_156 : f32 to vector<2x8x16xf32>
    %522 = arith.maximumf %519, %521 : vector<2x8x16xf32>
    %523 = vector.broadcast %520 : f32 to vector<2x8x16xf32>
    %524 = arith.mulf %523, %522 : vector<2x8x16xf32>
    %525 = arith.addf %509, %524 : vector<2x8x16xf32>
    %c31 = arith.constant 31 : index
    %526 = memref.load %arg5[%c31] : memref<64xf32, #tpu.memory_space<smem>>
    %527 = vector.broadcast %526 : f32 to vector<2x8x16xf32>
    %528 = arith.mulf %283, %527 : vector<2x8x16xf32>
    %c31_157 = arith.constant 31 : index
    %529 = memref.load %arg6[%c31_157] : memref<64xf32, #tpu.memory_space<smem>>
    %530 = vector.broadcast %529 : f32 to vector<2x8x16xf32>
    %531 = arith.mulf %0, %530 : vector<2x8x16xf32>
    %532 = arith.addf %528, %531 : vector<2x8x16xf32>
    %c31_158 = arith.constant 31 : index
    %533 = memref.load %arg7[%c31_158] : memref<64xf32, #tpu.memory_space<smem>>
    %534 = vector.broadcast %533 : f32 to vector<2x8x16xf32>
    %535 = arith.addf %532, %534 : vector<2x8x16xf32>
    %c31_159 = arith.constant 31 : index
    %536 = memref.load %arg8[%c31_159] : memref<64xf32, #tpu.memory_space<smem>>
    %cst_160 = arith.constant 0.000000e+00 : f32
    %537 = vector.broadcast %cst_160 : f32 to vector<2x8x16xf32>
    %538 = arith.maximumf %535, %537 : vector<2x8x16xf32>
    %539 = vector.broadcast %536 : f32 to vector<2x8x16xf32>
    %540 = arith.mulf %539, %538 : vector<2x8x16xf32>
    %541 = arith.addf %525, %540 : vector<2x8x16xf32>
    %cst_161 = arith.constant dense<0xFF800000> : vector<2x8xf32>
    %542 = vector.multi_reduction <maximumf>, %541, %cst_161 [2] : vector<2x8x16xf32> to vector<2x8xf32>
    %543 = vector.shape_cast %542 : vector<2x8xf32> to vector<2x8x1xf32>
    %544 = vector.broadcast %543 : vector<2x8x1xf32> to vector<2x8x16xf32>
    %545 = arith.subf %541, %544 : vector<2x8x16xf32>
    %546 = math.exp %545 : vector<2x8x16xf32>
    %cst_162 = arith.constant dense<0.000000e+00> : vector<2x8xf32>
    %547 = vector.multi_reduction <add>, %546, %cst_162 [2] : vector<2x8x16xf32> to vector<2x8xf32>
    %548 = vector.shape_cast %547 : vector<2x8xf32> to vector<2x8x1xf32>
    "tpu.trace_start"() <{level = 10 : i32, message = "bmn,bnk->bmk"}> : () -> ()
    %cst_163 = arith.constant dense<0.000000e+00> : vector<2x8x8xf32>
    %549 = tpu.matmul %546, %282, %cst_163 {dimension_numbers = #tpu.dot_dimension_numbers<[2], [1], [1], [2], [0, 0, 0, 1, 1, 2], [0], [0]>} : vector<2x8x16xf32>, vector<2x16x8xf32>, vector<2x8x8xf32> -> vector<2x8x8xf32>
    "tpu.trace_stop"() : () -> ()
    %550 = tpu.reciprocal %548 {approx = true} : vector<2x8x1xf32> -> vector<2x8x1xf32>
    %551 = vector.broadcast %550 : vector<2x8x1xf32> to vector<2x8x8xf32>
    %552 = arith.mulf %549, %551 : vector<2x8x8xf32>
    %c2_164 = arith.constant 2 : index
    %c0_165 = arith.constant 0 : index
    %c0_166 = arith.constant 0 : index
    %c0_167 = arith.constant 0 : index
    %553 = vector.load %arg1[%c2_164, %c0_165, %c0_166, %c0_167] : memref<4x2x8x8xf32, #tpu.memory_space<vmem>>, vector<1x2x8x8xf32>
    %554 = vector.shape_cast %553 : vector<1x2x8x8xf32> to vector<2x8x8xf32>
    %c2_168 = arith.constant 2 : index
    %c0_169 = arith.constant 0 : index
    %c0_170 = arith.constant 0 : index
    %c0_171 = arith.constant 0 : index
    %555 = vector.load %arg2[%c2_168, %c0_169, %c0_170, %c0_171] : memref<4x2x16x8xf32, #tpu.memory_space<vmem>>, vector<1x2x16x8xf32>
    %556 = vector.shape_cast %555 : vector<1x2x16x8xf32> to vector<2x16x8xf32>
    %c2_172 = arith.constant 2 : index
    %c0_173 = arith.constant 0 : index
    %c0_174 = arith.constant 0 : index
    %c0_175 = arith.constant 0 : index
    %557 = vector.load %arg3[%c2_172, %c0_173, %c0_174, %c0_175] : memref<4x2x16x8xf32, #tpu.memory_space<vmem>>, vector<1x2x16x8xf32>
    %558 = vector.shape_cast %557 : vector<1x2x16x8xf32> to vector<2x16x8xf32>
    "tpu.trace_start"() <{level = 10 : i32, message = "bmk,bnk->bmn"}> : () -> ()
    %cst_176 = arith.constant dense<0.000000e+00> : vector<2x8x16xf32>
    %559 = tpu.matmul %554, %556, %cst_176 {dimension_numbers = #tpu.dot_dimension_numbers<[2], [2], [1], [1], [0, 0, 0, 1, 1, 1], [0], [0]>} : vector<2x8x8xf32>, vector<2x16x8xf32>, vector<2x8x16xf32> -> vector<2x8x16xf32>
    "tpu.trace_stop"() : () -> ()
    %c2_177 = arith.constant 2 : index
    %560 = memref.load %arg9[%c2_177] : memref<4xf32, #tpu.memory_space<smem>>
    %561 = vector.broadcast %560 : f32 to vector<2x8x16xf32>
    %c32 = arith.constant 32 : index
    %562 = memref.load %arg5[%c32] : memref<64xf32, #tpu.memory_space<smem>>
    %563 = vector.broadcast %562 : f32 to vector<2x8x16xf32>
    %564 = arith.mulf %559, %563 : vector<2x8x16xf32>
    %c32_178 = arith.constant 32 : index
    %565 = memref.load %arg6[%c32_178] : memref<64xf32, #tpu.memory_space<smem>>
    %566 = vector.broadcast %565 : f32 to vector<2x8x16xf32>
    %567 = arith.mulf %0, %566 : vector<2x8x16xf32>
    %568 = arith.addf %564, %567 : vector<2x8x16xf32>
    %c32_179 = arith.constant 32 : index
    %569 = memref.load %arg7[%c32_179] : memref<64xf32, #tpu.memory_space<smem>>
    %570 = vector.broadcast %569 : f32 to vector<2x8x16xf32>
    %571 = arith.addf %568, %570 : vector<2x8x16xf32>
    %c32_180 = arith.constant 32 : index
    %572 = memref.load %arg8[%c32_180] : memref<64xf32, #tpu.memory_space<smem>>
    %cst_181 = arith.constant 0.000000e+00 : f32
    %573 = vector.broadcast %cst_181 : f32 to vector<2x8x16xf32>
    %574 = arith.maximumf %571, %573 : vector<2x8x16xf32>
    %575 = vector.broadcast %572 : f32 to vector<2x8x16xf32>
    %576 = arith.mulf %575, %574 : vector<2x8x16xf32>
    %577 = arith.addf %561, %576 : vector<2x8x16xf32>
    %c33 = arith.constant 33 : index
    %578 = memref.load %arg5[%c33] : memref<64xf32, #tpu.memory_space<smem>>
    %579 = vector.broadcast %578 : f32 to vector<2x8x16xf32>
    %580 = arith.mulf %559, %579 : vector<2x8x16xf32>
    %c33_182 = arith.constant 33 : index
    %581 = memref.load %arg6[%c33_182] : memref<64xf32, #tpu.memory_space<smem>>
    %582 = vector.broadcast %581 : f32 to vector<2x8x16xf32>
    %583 = arith.mulf %0, %582 : vector<2x8x16xf32>
    %584 = arith.addf %580, %583 : vector<2x8x16xf32>
    %c33_183 = arith.constant 33 : index
    %585 = memref.load %arg7[%c33_183] : memref<64xf32, #tpu.memory_space<smem>>
    %586 = vector.broadcast %585 : f32 to vector<2x8x16xf32>
    %587 = arith.addf %584, %586 : vector<2x8x16xf32>
    %c33_184 = arith.constant 33 : index
    %588 = memref.load %arg8[%c33_184] : memref<64xf32, #tpu.memory_space<smem>>
    %cst_185 = arith.constant 0.000000e+00 : f32
    %589 = vector.broadcast %cst_185 : f32 to vector<2x8x16xf32>
    %590 = arith.maximumf %587, %589 : vector<2x8x16xf32>
    %591 = vector.broadcast %588 : f32 to vector<2x8x16xf32>
    %592 = arith.mulf %591, %590 : vector<2x8x16xf32>
    %593 = arith.addf %577, %592 : vector<2x8x16xf32>
    %c34 = arith.constant 34 : index
    %594 = memref.load %arg5[%c34] : memref<64xf32, #tpu.memory_space<smem>>
    %595 = vector.broadcast %594 : f32 to vector<2x8x16xf32>
    %596 = arith.mulf %559, %595 : vector<2x8x16xf32>
    %c34_186 = arith.constant 34 : index
    %597 = memref.load %arg6[%c34_186] : memref<64xf32, #tpu.memory_space<smem>>
    %598 = vector.broadcast %597 : f32 to vector<2x8x16xf32>
    %599 = arith.mulf %0, %598 : vector<2x8x16xf32>
    %600 = arith.addf %596, %599 : vector<2x8x16xf32>
    %c34_187 = arith.constant 34 : index
    %601 = memref.load %arg7[%c34_187] : memref<64xf32, #tpu.memory_space<smem>>
    %602 = vector.broadcast %601 : f32 to vector<2x8x16xf32>
    %603 = arith.addf %600, %602 : vector<2x8x16xf32>
    %c34_188 = arith.constant 34 : index
    %604 = memref.load %arg8[%c34_188] : memref<64xf32, #tpu.memory_space<smem>>
    %cst_189 = arith.constant 0.000000e+00 : f32
    %605 = vector.broadcast %cst_189 : f32 to vector<2x8x16xf32>
    %606 = arith.maximumf %603, %605 : vector<2x8x16xf32>
    %607 = vector.broadcast %604 : f32 to vector<2x8x16xf32>
    %608 = arith.mulf %607, %606 : vector<2x8x16xf32>
    %609 = arith.addf %593, %608 : vector<2x8x16xf32>
    %c35 = arith.constant 35 : index
    %610 = memref.load %arg5[%c35] : memref<64xf32, #tpu.memory_space<smem>>
    %611 = vector.broadcast %610 : f32 to vector<2x8x16xf32>
    %612 = arith.mulf %559, %611 : vector<2x8x16xf32>
    %c35_190 = arith.constant 35 : index
    %613 = memref.load %arg6[%c35_190] : memref<64xf32, #tpu.memory_space<smem>>
    %614 = vector.broadcast %613 : f32 to vector<2x8x16xf32>
    %615 = arith.mulf %0, %614 : vector<2x8x16xf32>
    %616 = arith.addf %612, %615 : vector<2x8x16xf32>
    %c35_191 = arith.constant 35 : index
    %617 = memref.load %arg7[%c35_191] : memref<64xf32, #tpu.memory_space<smem>>
    %618 = vector.broadcast %617 : f32 to vector<2x8x16xf32>
    %619 = arith.addf %616, %618 : vector<2x8x16xf32>
    %c35_192 = arith.constant 35 : index
    %620 = memref.load %arg8[%c35_192] : memref<64xf32, #tpu.memory_space<smem>>
    %cst_193 = arith.constant 0.000000e+00 : f32
    %621 = vector.broadcast %cst_193 : f32 to vector<2x8x16xf32>
    %622 = arith.maximumf %619, %621 : vector<2x8x16xf32>
    %623 = vector.broadcast %620 : f32 to vector<2x8x16xf32>
    %624 = arith.mulf %623, %622 : vector<2x8x16xf32>
    %625 = arith.addf %609, %624 : vector<2x8x16xf32>
    %c36 = arith.constant 36 : index
    %626 = memref.load %arg5[%c36] : memref<64xf32, #tpu.memory_space<smem>>
    %627 = vector.broadcast %626 : f32 to vector<2x8x16xf32>
    %628 = arith.mulf %559, %627 : vector<2x8x16xf32>
    %c36_194 = arith.constant 36 : index
    %629 = memref.load %arg6[%c36_194] : memref<64xf32, #tpu.memory_space<smem>>
    %630 = vector.broadcast %629 : f32 to vector<2x8x16xf32>
    %631 = arith.mulf %0, %630 : vector<2x8x16xf32>
    %632 = arith.addf %628, %631 : vector<2x8x16xf32>
    %c36_195 = arith.constant 36 : index
    %633 = memref.load %arg7[%c36_195] : memref<64xf32, #tpu.memory_space<smem>>
    %634 = vector.broadcast %633 : f32 to vector<2x8x16xf32>
    %635 = arith.addf %632, %634 : vector<2x8x16xf32>
    %c36_196 = arith.constant 36 : index
    %636 = memref.load %arg8[%c36_196] : memref<64xf32, #tpu.memory_space<smem>>
    %cst_197 = arith.constant 0.000000e+00 : f32
    %637 = vector.broadcast %cst_197 : f32 to vector<2x8x16xf32>
    %638 = arith.maximumf %635, %637 : vector<2x8x16xf32>
    %639 = vector.broadcast %636 : f32 to vector<2x8x16xf32>
    %640 = arith.mulf %639, %638 : vector<2x8x16xf32>
    %641 = arith.addf %625, %640 : vector<2x8x16xf32>
    %c37 = arith.constant 37 : index
    %642 = memref.load %arg5[%c37] : memref<64xf32, #tpu.memory_space<smem>>
    %643 = vector.broadcast %642 : f32 to vector<2x8x16xf32>
    %644 = arith.mulf %559, %643 : vector<2x8x16xf32>
    %c37_198 = arith.constant 37 : index
    %645 = memref.load %arg6[%c37_198] : memref<64xf32, #tpu.memory_space<smem>>
    %646 = vector.broadcast %645 : f32 to vector<2x8x16xf32>
    %647 = arith.mulf %0, %646 : vector<2x8x16xf32>
    %648 = arith.addf %644, %647 : vector<2x8x16xf32>
    %c37_199 = arith.constant 37 : index
    %649 = memref.load %arg7[%c37_199] : memref<64xf32, #tpu.memory_space<smem>>
    %650 = vector.broadcast %649 : f32 to vector<2x8x16xf32>
    %651 = arith.addf %648, %650 : vector<2x8x16xf32>
    %c37_200 = arith.constant 37 : index
    %652 = memref.load %arg8[%c37_200] : memref<64xf32, #tpu.memory_space<smem>>
    %cst_201 = arith.constant 0.000000e+00 : f32
    %653 = vector.broadcast %cst_201 : f32 to vector<2x8x16xf32>
    %654 = arith.maximumf %651, %653 : vector<2x8x16xf32>
    %655 = vector.broadcast %652 : f32 to vector<2x8x16xf32>
    %656 = arith.mulf %655, %654 : vector<2x8x16xf32>
    %657 = arith.addf %641, %656 : vector<2x8x16xf32>
    %c38 = arith.constant 38 : index
    %658 = memref.load %arg5[%c38] : memref<64xf32, #tpu.memory_space<smem>>
    %659 = vector.broadcast %658 : f32 to vector<2x8x16xf32>
    %660 = arith.mulf %559, %659 : vector<2x8x16xf32>
    %c38_202 = arith.constant 38 : index
    %661 = memref.load %arg6[%c38_202] : memref<64xf32, #tpu.memory_space<smem>>
    %662 = vector.broadcast %661 : f32 to vector<2x8x16xf32>
    %663 = arith.mulf %0, %662 : vector<2x8x16xf32>
    %664 = arith.addf %660, %663 : vector<2x8x16xf32>
    %c38_203 = arith.constant 38 : index
    %665 = memref.load %arg7[%c38_203] : memref<64xf32, #tpu.memory_space<smem>>
    %666 = vector.broadcast %665 : f32 to vector<2x8x16xf32>
    %667 = arith.addf %664, %666 : vector<2x8x16xf32>
    %c38_204 = arith.constant 38 : index
    %668 = memref.load %arg8[%c38_204] : memref<64xf32, #tpu.memory_space<smem>>
    %cst_205 = arith.constant 0.000000e+00 : f32
    %669 = vector.broadcast %cst_205 : f32 to vector<2x8x16xf32>
    %670 = arith.maximumf %667, %669 : vector<2x8x16xf32>
    %671 = vector.broadcast %668 : f32 to vector<2x8x16xf32>
    %672 = arith.mulf %671, %670 : vector<2x8x16xf32>
    %673 = arith.addf %657, %672 : vector<2x8x16xf32>
    %c39 = arith.constant 39 : index
    %674 = memref.load %arg5[%c39] : memref<64xf32, #tpu.memory_space<smem>>
    %675 = vector.broadcast %674 : f32 to vector<2x8x16xf32>
    %676 = arith.mulf %559, %675 : vector<2x8x16xf32>
    %c39_206 = arith.constant 39 : index
    %677 = memref.load %arg6[%c39_206] : memref<64xf32, #tpu.memory_space<smem>>
    %678 = vector.broadcast %677 : f32 to vector<2x8x16xf32>
    %679 = arith.mulf %0, %678 : vector<2x8x16xf32>
    %680 = arith.addf %676, %679 : vector<2x8x16xf32>
    %c39_207 = arith.constant 39 : index
    %681 = memref.load %arg7[%c39_207] : memref<64xf32, #tpu.memory_space<smem>>
    %682 = vector.broadcast %681 : f32 to vector<2x8x16xf32>
    %683 = arith.addf %680, %682 : vector<2x8x16xf32>
    %c39_208 = arith.constant 39 : index
    %684 = memref.load %arg8[%c39_208] : memref<64xf32, #tpu.memory_space<smem>>
    %cst_209 = arith.constant 0.000000e+00 : f32
    %685 = vector.broadcast %cst_209 : f32 to vector<2x8x16xf32>
    %686 = arith.maximumf %683, %685 : vector<2x8x16xf32>
    %687 = vector.broadcast %684 : f32 to vector<2x8x16xf32>
    %688 = arith.mulf %687, %686 : vector<2x8x16xf32>
    %689 = arith.addf %673, %688 : vector<2x8x16xf32>
    %c40 = arith.constant 40 : index
    %690 = memref.load %arg5[%c40] : memref<64xf32, #tpu.memory_space<smem>>
    %691 = vector.broadcast %690 : f32 to vector<2x8x16xf32>
    %692 = arith.mulf %559, %691 : vector<2x8x16xf32>
    %c40_210 = arith.constant 40 : index
    %693 = memref.load %arg6[%c40_210] : memref<64xf32, #tpu.memory_space<smem>>
    %694 = vector.broadcast %693 : f32 to vector<2x8x16xf32>
    %695 = arith.mulf %0, %694 : vector<2x8x16xf32>
    %696 = arith.addf %692, %695 : vector<2x8x16xf32>
    %c40_211 = arith.constant 40 : index
    %697 = memref.load %arg7[%c40_211] : memref<64xf32, #tpu.memory_space<smem>>
    %698 = vector.broadcast %697 : f32 to vector<2x8x16xf32>
    %699 = arith.addf %696, %698 : vector<2x8x16xf32>
    %c40_212 = arith.constant 40 : index
    %700 = memref.load %arg8[%c40_212] : memref<64xf32, #tpu.memory_space<smem>>
    %cst_213 = arith.constant 0.000000e+00 : f32
    %701 = vector.broadcast %cst_213 : f32 to vector<2x8x16xf32>
    %702 = arith.maximumf %699, %701 : vector<2x8x16xf32>
    %703 = vector.broadcast %700 : f32 to vector<2x8x16xf32>
    %704 = arith.mulf %703, %702 : vector<2x8x16xf32>
    %705 = arith.addf %689, %704 : vector<2x8x16xf32>
    %c41 = arith.constant 41 : index
    %706 = memref.load %arg5[%c41] : memref<64xf32, #tpu.memory_space<smem>>
    %707 = vector.broadcast %706 : f32 to vector<2x8x16xf32>
    %708 = arith.mulf %559, %707 : vector<2x8x16xf32>
    %c41_214 = arith.constant 41 : index
    %709 = memref.load %arg6[%c41_214] : memref<64xf32, #tpu.memory_space<smem>>
    %710 = vector.broadcast %709 : f32 to vector<2x8x16xf32>
    %711 = arith.mulf %0, %710 : vector<2x8x16xf32>
    %712 = arith.addf %708, %711 : vector<2x8x16xf32>
    %c41_215 = arith.constant 41 : index
    %713 = memref.load %arg7[%c41_215] : memref<64xf32, #tpu.memory_space<smem>>
    %714 = vector.broadcast %713 : f32 to vector<2x8x16xf32>
    %715 = arith.addf %712, %714 : vector<2x8x16xf32>
    %c41_216 = arith.constant 41 : index
    %716 = memref.load %arg8[%c41_216] : memref<64xf32, #tpu.memory_space<smem>>
    %cst_217 = arith.constant 0.000000e+00 : f32
    %717 = vector.broadcast %cst_217 : f32 to vector<2x8x16xf32>
    %718 = arith.maximumf %715, %717 : vector<2x8x16xf32>
    %719 = vector.broadcast %716 : f32 to vector<2x8x16xf32>
    %720 = arith.mulf %719, %718 : vector<2x8x16xf32>
    %721 = arith.addf %705, %720 : vector<2x8x16xf32>
    %c42 = arith.constant 42 : index
    %722 = memref.load %arg5[%c42] : memref<64xf32, #tpu.memory_space<smem>>
    %723 = vector.broadcast %722 : f32 to vector<2x8x16xf32>
    %724 = arith.mulf %559, %723 : vector<2x8x16xf32>
    %c42_218 = arith.constant 42 : index
    %725 = memref.load %arg6[%c42_218] : memref<64xf32, #tpu.memory_space<smem>>
    %726 = vector.broadcast %725 : f32 to vector<2x8x16xf32>
    %727 = arith.mulf %0, %726 : vector<2x8x16xf32>
    %728 = arith.addf %724, %727 : vector<2x8x16xf32>
    %c42_219 = arith.constant 42 : index
    %729 = memref.load %arg7[%c42_219] : memref<64xf32, #tpu.memory_space<smem>>
    %730 = vector.broadcast %729 : f32 to vector<2x8x16xf32>
    %731 = arith.addf %728, %730 : vector<2x8x16xf32>
    %c42_220 = arith.constant 42 : index
    %732 = memref.load %arg8[%c42_220] : memref<64xf32, #tpu.memory_space<smem>>
    %cst_221 = arith.constant 0.000000e+00 : f32
    %733 = vector.broadcast %cst_221 : f32 to vector<2x8x16xf32>
    %734 = arith.maximumf %731, %733 : vector<2x8x16xf32>
    %735 = vector.broadcast %732 : f32 to vector<2x8x16xf32>
    %736 = arith.mulf %735, %734 : vector<2x8x16xf32>
    %737 = arith.addf %721, %736 : vector<2x8x16xf32>
    %c43 = arith.constant 43 : index
    %738 = memref.load %arg5[%c43] : memref<64xf32, #tpu.memory_space<smem>>
    %739 = vector.broadcast %738 : f32 to vector<2x8x16xf32>
    %740 = arith.mulf %559, %739 : vector<2x8x16xf32>
    %c43_222 = arith.constant 43 : index
    %741 = memref.load %arg6[%c43_222] : memref<64xf32, #tpu.memory_space<smem>>
    %742 = vector.broadcast %741 : f32 to vector<2x8x16xf32>
    %743 = arith.mulf %0, %742 : vector<2x8x16xf32>
    %744 = arith.addf %740, %743 : vector<2x8x16xf32>
    %c43_223 = arith.constant 43 : index
    %745 = memref.load %arg7[%c43_223] : memref<64xf32, #tpu.memory_space<smem>>
    %746 = vector.broadcast %745 : f32 to vector<2x8x16xf32>
    %747 = arith.addf %744, %746 : vector<2x8x16xf32>
    %c43_224 = arith.constant 43 : index
    %748 = memref.load %arg8[%c43_224] : memref<64xf32, #tpu.memory_space<smem>>
    %cst_225 = arith.constant 0.000000e+00 : f32
    %749 = vector.broadcast %cst_225 : f32 to vector<2x8x16xf32>
    %750 = arith.maximumf %747, %749 : vector<2x8x16xf32>
    %751 = vector.broadcast %748 : f32 to vector<2x8x16xf32>
    %752 = arith.mulf %751, %750 : vector<2x8x16xf32>
    %753 = arith.addf %737, %752 : vector<2x8x16xf32>
    %c44 = arith.constant 44 : index
    %754 = memref.load %arg5[%c44] : memref<64xf32, #tpu.memory_space<smem>>
    %755 = vector.broadcast %754 : f32 to vector<2x8x16xf32>
    %756 = arith.mulf %559, %755 : vector<2x8x16xf32>
    %c44_226 = arith.constant 44 : index
    %757 = memref.load %arg6[%c44_226] : memref<64xf32, #tpu.memory_space<smem>>
    %758 = vector.broadcast %757 : f32 to vector<2x8x16xf32>
    %759 = arith.mulf %0, %758 : vector<2x8x16xf32>
    %760 = arith.addf %756, %759 : vector<2x8x16xf32>
    %c44_227 = arith.constant 44 : index
    %761 = memref.load %arg7[%c44_227] : memref<64xf32, #tpu.memory_space<smem>>
    %762 = vector.broadcast %761 : f32 to vector<2x8x16xf32>
    %763 = arith.addf %760, %762 : vector<2x8x16xf32>
    %c44_228 = arith.constant 44 : index
    %764 = memref.load %arg8[%c44_228] : memref<64xf32, #tpu.memory_space<smem>>
    %cst_229 = arith.constant 0.000000e+00 : f32
    %765 = vector.broadcast %cst_229 : f32 to vector<2x8x16xf32>
    %766 = arith.maximumf %763, %765 : vector<2x8x16xf32>
    %767 = vector.broadcast %764 : f32 to vector<2x8x16xf32>
    %768 = arith.mulf %767, %766 : vector<2x8x16xf32>
    %769 = arith.addf %753, %768 : vector<2x8x16xf32>
    %c45 = arith.constant 45 : index
    %770 = memref.load %arg5[%c45] : memref<64xf32, #tpu.memory_space<smem>>
    %771 = vector.broadcast %770 : f32 to vector<2x8x16xf32>
    %772 = arith.mulf %559, %771 : vector<2x8x16xf32>
    %c45_230 = arith.constant 45 : index
    %773 = memref.load %arg6[%c45_230] : memref<64xf32, #tpu.memory_space<smem>>
    %774 = vector.broadcast %773 : f32 to vector<2x8x16xf32>
    %775 = arith.mulf %0, %774 : vector<2x8x16xf32>
    %776 = arith.addf %772, %775 : vector<2x8x16xf32>
    %c45_231 = arith.constant 45 : index
    %777 = memref.load %arg7[%c45_231] : memref<64xf32, #tpu.memory_space<smem>>
    %778 = vector.broadcast %777 : f32 to vector<2x8x16xf32>
    %779 = arith.addf %776, %778 : vector<2x8x16xf32>
    %c45_232 = arith.constant 45 : index
    %780 = memref.load %arg8[%c45_232] : memref<64xf32, #tpu.memory_space<smem>>
    %cst_233 = arith.constant 0.000000e+00 : f32
    %781 = vector.broadcast %cst_233 : f32 to vector<2x8x16xf32>
    %782 = arith.maximumf %779, %781 : vector<2x8x16xf32>
    %783 = vector.broadcast %780 : f32 to vector<2x8x16xf32>
    %784 = arith.mulf %783, %782 : vector<2x8x16xf32>
    %785 = arith.addf %769, %784 : vector<2x8x16xf32>
    %c46 = arith.constant 46 : index
    %786 = memref.load %arg5[%c46] : memref<64xf32, #tpu.memory_space<smem>>
    %787 = vector.broadcast %786 : f32 to vector<2x8x16xf32>
    %788 = arith.mulf %559, %787 : vector<2x8x16xf32>
    %c46_234 = arith.constant 46 : index
    %789 = memref.load %arg6[%c46_234] : memref<64xf32, #tpu.memory_space<smem>>
    %790 = vector.broadcast %789 : f32 to vector<2x8x16xf32>
    %791 = arith.mulf %0, %790 : vector<2x8x16xf32>
    %792 = arith.addf %788, %791 : vector<2x8x16xf32>
    %c46_235 = arith.constant 46 : index
    %793 = memref.load %arg7[%c46_235] : memref<64xf32, #tpu.memory_space<smem>>
    %794 = vector.broadcast %793 : f32 to vector<2x8x16xf32>
    %795 = arith.addf %792, %794 : vector<2x8x16xf32>
    %c46_236 = arith.constant 46 : index
    %796 = memref.load %arg8[%c46_236] : memref<64xf32, #tpu.memory_space<smem>>
    %cst_237 = arith.constant 0.000000e+00 : f32
    %797 = vector.broadcast %cst_237 : f32 to vector<2x8x16xf32>
    %798 = arith.maximumf %795, %797 : vector<2x8x16xf32>
    %799 = vector.broadcast %796 : f32 to vector<2x8x16xf32>
    %800 = arith.mulf %799, %798 : vector<2x8x16xf32>
    %801 = arith.addf %785, %800 : vector<2x8x16xf32>
    %c47 = arith.constant 47 : index
    %802 = memref.load %arg5[%c47] : memref<64xf32, #tpu.memory_space<smem>>
    %803 = vector.broadcast %802 : f32 to vector<2x8x16xf32>
    %804 = arith.mulf %559, %803 : vector<2x8x16xf32>
    %c47_238 = arith.constant 47 : index
    %805 = memref.load %arg6[%c47_238] : memref<64xf32, #tpu.memory_space<smem>>
    %806 = vector.broadcast %805 : f32 to vector<2x8x16xf32>
    %807 = arith.mulf %0, %806 : vector<2x8x16xf32>
    %808 = arith.addf %804, %807 : vector<2x8x16xf32>
    %c47_239 = arith.constant 47 : index
    %809 = memref.load %arg7[%c47_239] : memref<64xf32, #tpu.memory_space<smem>>
    %810 = vector.broadcast %809 : f32 to vector<2x8x16xf32>
    %811 = arith.addf %808, %810 : vector<2x8x16xf32>
    %c47_240 = arith.constant 47 : index
    %812 = memref.load %arg8[%c47_240] : memref<64xf32, #tpu.memory_space<smem>>
    %cst_241 = arith.constant 0.000000e+00 : f32
    %813 = vector.broadcast %cst_241 : f32 to vector<2x8x16xf32>
    %814 = arith.maximumf %811, %813 : vector<2x8x16xf32>
    %815 = vector.broadcast %812 : f32 to vector<2x8x16xf32>
    %816 = arith.mulf %815, %814 : vector<2x8x16xf32>
    %817 = arith.addf %801, %816 : vector<2x8x16xf32>
    %cst_242 = arith.constant dense<0xFF800000> : vector<2x8xf32>
    %818 = vector.multi_reduction <maximumf>, %817, %cst_242 [2] : vector<2x8x16xf32> to vector<2x8xf32>
    %819 = vector.shape_cast %818 : vector<2x8xf32> to vector<2x8x1xf32>
    %820 = vector.broadcast %819 : vector<2x8x1xf32> to vector<2x8x16xf32>
    %821 = arith.subf %817, %820 : vector<2x8x16xf32>
    %822 = math.exp %821 : vector<2x8x16xf32>
    %cst_243 = arith.constant dense<0.000000e+00> : vector<2x8xf32>
    %823 = vector.multi_reduction <add>, %822, %cst_243 [2] : vector<2x8x16xf32> to vector<2x8xf32>
    %824 = vector.shape_cast %823 : vector<2x8xf32> to vector<2x8x1xf32>
    "tpu.trace_start"() <{level = 10 : i32, message = "bmn,bnk->bmk"}> : () -> ()
    %cst_244 = arith.constant dense<0.000000e+00> : vector<2x8x8xf32>
    %825 = tpu.matmul %822, %558, %cst_244 {dimension_numbers = #tpu.dot_dimension_numbers<[2], [1], [1], [2], [0, 0, 0, 1, 1, 2], [0], [0]>} : vector<2x8x16xf32>, vector<2x16x8xf32>, vector<2x8x8xf32> -> vector<2x8x8xf32>
    "tpu.trace_stop"() : () -> ()
    %826 = tpu.reciprocal %824 {approx = true} : vector<2x8x1xf32> -> vector<2x8x1xf32>
    %827 = vector.broadcast %826 : vector<2x8x1xf32> to vector<2x8x8xf32>
    %828 = arith.mulf %825, %827 : vector<2x8x8xf32>
    %c3_245 = arith.constant 3 : index
    %c0_246 = arith.constant 0 : index
    %c0_247 = arith.constant 0 : index
    %c0_248 = arith.constant 0 : index
    %829 = vector.load %arg1[%c3_245, %c0_246, %c0_247, %c0_248] : memref<4x2x8x8xf32, #tpu.memory_space<vmem>>, vector<1x2x8x8xf32>
    %830 = vector.shape_cast %829 : vector<1x2x8x8xf32> to vector<2x8x8xf32>
    %c3_249 = arith.constant 3 : index
    %c0_250 = arith.constant 0 : index
    %c0_251 = arith.constant 0 : index
    %c0_252 = arith.constant 0 : index
    %831 = vector.load %arg2[%c3_249, %c0_250, %c0_251, %c0_252] : memref<4x2x16x8xf32, #tpu.memory_space<vmem>>, vector<1x2x16x8xf32>
    %832 = vector.shape_cast %831 : vector<1x2x16x8xf32> to vector<2x16x8xf32>
    %c3_253 = arith.constant 3 : index
    %c0_254 = arith.constant 0 : index
    %c0_255 = arith.constant 0 : index
    %c0_256 = arith.constant 0 : index
    %833 = vector.load %arg3[%c3_253, %c0_254, %c0_255, %c0_256] : memref<4x2x16x8xf32, #tpu.memory_space<vmem>>, vector<1x2x16x8xf32>
    %834 = vector.shape_cast %833 : vector<1x2x16x8xf32> to vector<2x16x8xf32>
    "tpu.trace_start"() <{level = 10 : i32, message = "bmk,bnk->bmn"}> : () -> ()
    %cst_257 = arith.constant dense<0.000000e+00> : vector<2x8x16xf32>
    %835 = tpu.matmul %830, %832, %cst_257 {dimension_numbers = #tpu.dot_dimension_numbers<[2], [2], [1], [1], [0, 0, 0, 1, 1, 1], [0], [0]>} : vector<2x8x8xf32>, vector<2x16x8xf32>, vector<2x8x16xf32> -> vector<2x8x16xf32>
    "tpu.trace_stop"() : () -> ()
    %c3_258 = arith.constant 3 : index
    %836 = memref.load %arg9[%c3_258] : memref<4xf32, #tpu.memory_space<smem>>
    %837 = vector.broadcast %836 : f32 to vector<2x8x16xf32>
    %c48 = arith.constant 48 : index
    %838 = memref.load %arg5[%c48] : memref<64xf32, #tpu.memory_space<smem>>
    %839 = vector.broadcast %838 : f32 to vector<2x8x16xf32>
    %840 = arith.mulf %835, %839 : vector<2x8x16xf32>
    %c48_259 = arith.constant 48 : index
    %841 = memref.load %arg6[%c48_259] : memref<64xf32, #tpu.memory_space<smem>>
    %842 = vector.broadcast %841 : f32 to vector<2x8x16xf32>
    %843 = arith.mulf %0, %842 : vector<2x8x16xf32>
    %844 = arith.addf %840, %843 : vector<2x8x16xf32>
    %c48_260 = arith.constant 48 : index
    %845 = memref.load %arg7[%c48_260] : memref<64xf32, #tpu.memory_space<smem>>
    %846 = vector.broadcast %845 : f32 to vector<2x8x16xf32>
    %847 = arith.addf %844, %846 : vector<2x8x16xf32>
    %c48_261 = arith.constant 48 : index
    %848 = memref.load %arg8[%c48_261] : memref<64xf32, #tpu.memory_space<smem>>
    %cst_262 = arith.constant 0.000000e+00 : f32
    %849 = vector.broadcast %cst_262 : f32 to vector<2x8x16xf32>
    %850 = arith.maximumf %847, %849 : vector<2x8x16xf32>
    %851 = vector.broadcast %848 : f32 to vector<2x8x16xf32>
    %852 = arith.mulf %851, %850 : vector<2x8x16xf32>
    %853 = arith.addf %837, %852 : vector<2x8x16xf32>
    %c49 = arith.constant 49 : index
    %854 = memref.load %arg5[%c49] : memref<64xf32, #tpu.memory_space<smem>>
    %855 = vector.broadcast %854 : f32 to vector<2x8x16xf32>
    %856 = arith.mulf %835, %855 : vector<2x8x16xf32>
    %c49_263 = arith.constant 49 : index
    %857 = memref.load %arg6[%c49_263] : memref<64xf32, #tpu.memory_space<smem>>
    %858 = vector.broadcast %857 : f32 to vector<2x8x16xf32>
    %859 = arith.mulf %0, %858 : vector<2x8x16xf32>
    %860 = arith.addf %856, %859 : vector<2x8x16xf32>
    %c49_264 = arith.constant 49 : index
    %861 = memref.load %arg7[%c49_264] : memref<64xf32, #tpu.memory_space<smem>>
    %862 = vector.broadcast %861 : f32 to vector<2x8x16xf32>
    %863 = arith.addf %860, %862 : vector<2x8x16xf32>
    %c49_265 = arith.constant 49 : index
    %864 = memref.load %arg8[%c49_265] : memref<64xf32, #tpu.memory_space<smem>>
    %cst_266 = arith.constant 0.000000e+00 : f32
    %865 = vector.broadcast %cst_266 : f32 to vector<2x8x16xf32>
    %866 = arith.maximumf %863, %865 : vector<2x8x16xf32>
    %867 = vector.broadcast %864 : f32 to vector<2x8x16xf32>
    %868 = arith.mulf %867, %866 : vector<2x8x16xf32>
    %869 = arith.addf %853, %868 : vector<2x8x16xf32>
    %c50 = arith.constant 50 : index
    %870 = memref.load %arg5[%c50] : memref<64xf32, #tpu.memory_space<smem>>
    %871 = vector.broadcast %870 : f32 to vector<2x8x16xf32>
    %872 = arith.mulf %835, %871 : vector<2x8x16xf32>
    %c50_267 = arith.constant 50 : index
    %873 = memref.load %arg6[%c50_267] : memref<64xf32, #tpu.memory_space<smem>>
    %874 = vector.broadcast %873 : f32 to vector<2x8x16xf32>
    %875 = arith.mulf %0, %874 : vector<2x8x16xf32>
    %876 = arith.addf %872, %875 : vector<2x8x16xf32>
    %c50_268 = arith.constant 50 : index
    %877 = memref.load %arg7[%c50_268] : memref<64xf32, #tpu.memory_space<smem>>
    %878 = vector.broadcast %877 : f32 to vector<2x8x16xf32>
    %879 = arith.addf %876, %878 : vector<2x8x16xf32>
    %c50_269 = arith.constant 50 : index
    %880 = memref.load %arg8[%c50_269] : memref<64xf32, #tpu.memory_space<smem>>
    %cst_270 = arith.constant 0.000000e+00 : f32
    %881 = vector.broadcast %cst_270 : f32 to vector<2x8x16xf32>
    %882 = arith.maximumf %879, %881 : vector<2x8x16xf32>
    %883 = vector.broadcast %880 : f32 to vector<2x8x16xf32>
    %884 = arith.mulf %883, %882 : vector<2x8x16xf32>
    %885 = arith.addf %869, %884 : vector<2x8x16xf32>
    %c51 = arith.constant 51 : index
    %886 = memref.load %arg5[%c51] : memref<64xf32, #tpu.memory_space<smem>>
    %887 = vector.broadcast %886 : f32 to vector<2x8x16xf32>
    %888 = arith.mulf %835, %887 : vector<2x8x16xf32>
    %c51_271 = arith.constant 51 : index
    %889 = memref.load %arg6[%c51_271] : memref<64xf32, #tpu.memory_space<smem>>
    %890 = vector.broadcast %889 : f32 to vector<2x8x16xf32>
    %891 = arith.mulf %0, %890 : vector<2x8x16xf32>
    %892 = arith.addf %888, %891 : vector<2x8x16xf32>
    %c51_272 = arith.constant 51 : index
    %893 = memref.load %arg7[%c51_272] : memref<64xf32, #tpu.memory_space<smem>>
    %894 = vector.broadcast %893 : f32 to vector<2x8x16xf32>
    %895 = arith.addf %892, %894 : vector<2x8x16xf32>
    %c51_273 = arith.constant 51 : index
    %896 = memref.load %arg8[%c51_273] : memref<64xf32, #tpu.memory_space<smem>>
    %cst_274 = arith.constant 0.000000e+00 : f32
    %897 = vector.broadcast %cst_274 : f32 to vector<2x8x16xf32>
    %898 = arith.maximumf %895, %897 : vector<2x8x16xf32>
    %899 = vector.broadcast %896 : f32 to vector<2x8x16xf32>
    %900 = arith.mulf %899, %898 : vector<2x8x16xf32>
    %901 = arith.addf %885, %900 : vector<2x8x16xf32>
    %c52 = arith.constant 52 : index
    %902 = memref.load %arg5[%c52] : memref<64xf32, #tpu.memory_space<smem>>
    %903 = vector.broadcast %902 : f32 to vector<2x8x16xf32>
    %904 = arith.mulf %835, %903 : vector<2x8x16xf32>
    %c52_275 = arith.constant 52 : index
    %905 = memref.load %arg6[%c52_275] : memref<64xf32, #tpu.memory_space<smem>>
    %906 = vector.broadcast %905 : f32 to vector<2x8x16xf32>
    %907 = arith.mulf %0, %906 : vector<2x8x16xf32>
    %908 = arith.addf %904, %907 : vector<2x8x16xf32>
    %c52_276 = arith.constant 52 : index
    %909 = memref.load %arg7[%c52_276] : memref<64xf32, #tpu.memory_space<smem>>
    %910 = vector.broadcast %909 : f32 to vector<2x8x16xf32>
    %911 = arith.addf %908, %910 : vector<2x8x16xf32>
    %c52_277 = arith.constant 52 : index
    %912 = memref.load %arg8[%c52_277] : memref<64xf32, #tpu.memory_space<smem>>
    %cst_278 = arith.constant 0.000000e+00 : f32
    %913 = vector.broadcast %cst_278 : f32 to vector<2x8x16xf32>
    %914 = arith.maximumf %911, %913 : vector<2x8x16xf32>
    %915 = vector.broadcast %912 : f32 to vector<2x8x16xf32>
    %916 = arith.mulf %915, %914 : vector<2x8x16xf32>
    %917 = arith.addf %901, %916 : vector<2x8x16xf32>
    %c53 = arith.constant 53 : index
    %918 = memref.load %arg5[%c53] : memref<64xf32, #tpu.memory_space<smem>>
    %919 = vector.broadcast %918 : f32 to vector<2x8x16xf32>
    %920 = arith.mulf %835, %919 : vector<2x8x16xf32>
    %c53_279 = arith.constant 53 : index
    %921 = memref.load %arg6[%c53_279] : memref<64xf32, #tpu.memory_space<smem>>
    %922 = vector.broadcast %921 : f32 to vector<2x8x16xf32>
    %923 = arith.mulf %0, %922 : vector<2x8x16xf32>
    %924 = arith.addf %920, %923 : vector<2x8x16xf32>
    %c53_280 = arith.constant 53 : index
    %925 = memref.load %arg7[%c53_280] : memref<64xf32, #tpu.memory_space<smem>>
    %926 = vector.broadcast %925 : f32 to vector<2x8x16xf32>
    %927 = arith.addf %924, %926 : vector<2x8x16xf32>
    %c53_281 = arith.constant 53 : index
    %928 = memref.load %arg8[%c53_281] : memref<64xf32, #tpu.memory_space<smem>>
    %cst_282 = arith.constant 0.000000e+00 : f32
    %929 = vector.broadcast %cst_282 : f32 to vector<2x8x16xf32>
    %930 = arith.maximumf %927, %929 : vector<2x8x16xf32>
    %931 = vector.broadcast %928 : f32 to vector<2x8x16xf32>
    %932 = arith.mulf %931, %930 : vector<2x8x16xf32>
    %933 = arith.addf %917, %932 : vector<2x8x16xf32>
    %c54 = arith.constant 54 : index
    %934 = memref.load %arg5[%c54] : memref<64xf32, #tpu.memory_space<smem>>
    %935 = vector.broadcast %934 : f32 to vector<2x8x16xf32>
    %936 = arith.mulf %835, %935 : vector<2x8x16xf32>
    %c54_283 = arith.constant 54 : index
    %937 = memref.load %arg6[%c54_283] : memref<64xf32, #tpu.memory_space<smem>>
    %938 = vector.broadcast %937 : f32 to vector<2x8x16xf32>
    %939 = arith.mulf %0, %938 : vector<2x8x16xf32>
    %940 = arith.addf %936, %939 : vector<2x8x16xf32>
    %c54_284 = arith.constant 54 : index
    %941 = memref.load %arg7[%c54_284] : memref<64xf32, #tpu.memory_space<smem>>
    %942 = vector.broadcast %941 : f32 to vector<2x8x16xf32>
    %943 = arith.addf %940, %942 : vector<2x8x16xf32>
    %c54_285 = arith.constant 54 : index
    %944 = memref.load %arg8[%c54_285] : memref<64xf32, #tpu.memory_space<smem>>
    %cst_286 = arith.constant 0.000000e+00 : f32
    %945 = vector.broadcast %cst_286 : f32 to vector<2x8x16xf32>
    %946 = arith.maximumf %943, %945 : vector<2x8x16xf32>
    %947 = vector.broadcast %944 : f32 to vector<2x8x16xf32>
    %948 = arith.mulf %947, %946 : vector<2x8x16xf32>
    %949 = arith.addf %933, %948 : vector<2x8x16xf32>
    %c55 = arith.constant 55 : index
    %950 = memref.load %arg5[%c55] : memref<64xf32, #tpu.memory_space<smem>>
    %951 = vector.broadcast %950 : f32 to vector<2x8x16xf32>
    %952 = arith.mulf %835, %951 : vector<2x8x16xf32>
    %c55_287 = arith.constant 55 : index
    %953 = memref.load %arg6[%c55_287] : memref<64xf32, #tpu.memory_space<smem>>
    %954 = vector.broadcast %953 : f32 to vector<2x8x16xf32>
    %955 = arith.mulf %0, %954 : vector<2x8x16xf32>
    %956 = arith.addf %952, %955 : vector<2x8x16xf32>
    %c55_288 = arith.constant 55 : index
    %957 = memref.load %arg7[%c55_288] : memref<64xf32, #tpu.memory_space<smem>>
    %958 = vector.broadcast %957 : f32 to vector<2x8x16xf32>
    %959 = arith.addf %956, %958 : vector<2x8x16xf32>
    %c55_289 = arith.constant 55 : index
    %960 = memref.load %arg8[%c55_289] : memref<64xf32, #tpu.memory_space<smem>>
    %cst_290 = arith.constant 0.000000e+00 : f32
    %961 = vector.broadcast %cst_290 : f32 to vector<2x8x16xf32>
    %962 = arith.maximumf %959, %961 : vector<2x8x16xf32>
    %963 = vector.broadcast %960 : f32 to vector<2x8x16xf32>
    %964 = arith.mulf %963, %962 : vector<2x8x16xf32>
    %965 = arith.addf %949, %964 : vector<2x8x16xf32>
    %c56 = arith.constant 56 : index
    %966 = memref.load %arg5[%c56] : memref<64xf32, #tpu.memory_space<smem>>
    %967 = vector.broadcast %966 : f32 to vector<2x8x16xf32>
    %968 = arith.mulf %835, %967 : vector<2x8x16xf32>
    %c56_291 = arith.constant 56 : index
    %969 = memref.load %arg6[%c56_291] : memref<64xf32, #tpu.memory_space<smem>>
    %970 = vector.broadcast %969 : f32 to vector<2x8x16xf32>
    %971 = arith.mulf %0, %970 : vector<2x8x16xf32>
    %972 = arith.addf %968, %971 : vector<2x8x16xf32>
    %c56_292 = arith.constant 56 : index
    %973 = memref.load %arg7[%c56_292] : memref<64xf32, #tpu.memory_space<smem>>
    %974 = vector.broadcast %973 : f32 to vector<2x8x16xf32>
    %975 = arith.addf %972, %974 : vector<2x8x16xf32>
    %c56_293 = arith.constant 56 : index
    %976 = memref.load %arg8[%c56_293] : memref<64xf32, #tpu.memory_space<smem>>
    %cst_294 = arith.constant 0.000000e+00 : f32
    %977 = vector.broadcast %cst_294 : f32 to vector<2x8x16xf32>
    %978 = arith.maximumf %975, %977 : vector<2x8x16xf32>
    %979 = vector.broadcast %976 : f32 to vector<2x8x16xf32>
    %980 = arith.mulf %979, %978 : vector<2x8x16xf32>
    %981 = arith.addf %965, %980 : vector<2x8x16xf32>
    %c57 = arith.constant 57 : index
    %982 = memref.load %arg5[%c57] : memref<64xf32, #tpu.memory_space<smem>>
    %983 = vector.broadcast %982 : f32 to vector<2x8x16xf32>
    %984 = arith.mulf %835, %983 : vector<2x8x16xf32>
    %c57_295 = arith.constant 57 : index
    %985 = memref.load %arg6[%c57_295] : memref<64xf32, #tpu.memory_space<smem>>
    %986 = vector.broadcast %985 : f32 to vector<2x8x16xf32>
    %987 = arith.mulf %0, %986 : vector<2x8x16xf32>
    %988 = arith.addf %984, %987 : vector<2x8x16xf32>
    %c57_296 = arith.constant 57 : index
    %989 = memref.load %arg7[%c57_296] : memref<64xf32, #tpu.memory_space<smem>>
    %990 = vector.broadcast %989 : f32 to vector<2x8x16xf32>
    %991 = arith.addf %988, %990 : vector<2x8x16xf32>
    %c57_297 = arith.constant 57 : index
    %992 = memref.load %arg8[%c57_297] : memref<64xf32, #tpu.memory_space<smem>>
    %cst_298 = arith.constant 0.000000e+00 : f32
    %993 = vector.broadcast %cst_298 : f32 to vector<2x8x16xf32>
    %994 = arith.maximumf %991, %993 : vector<2x8x16xf32>
    %995 = vector.broadcast %992 : f32 to vector<2x8x16xf32>
    %996 = arith.mulf %995, %994 : vector<2x8x16xf32>
    %997 = arith.addf %981, %996 : vector<2x8x16xf32>
    %c58 = arith.constant 58 : index
    %998 = memref.load %arg5[%c58] : memref<64xf32, #tpu.memory_space<smem>>
    %999 = vector.broadcast %998 : f32 to vector<2x8x16xf32>
    %1000 = arith.mulf %835, %999 : vector<2x8x16xf32>
    %c58_299 = arith.constant 58 : index
    %1001 = memref.load %arg6[%c58_299] : memref<64xf32, #tpu.memory_space<smem>>
    %1002 = vector.broadcast %1001 : f32 to vector<2x8x16xf32>
    %1003 = arith.mulf %0, %1002 : vector<2x8x16xf32>
    %1004 = arith.addf %1000, %1003 : vector<2x8x16xf32>
    %c58_300 = arith.constant 58 : index
    %1005 = memref.load %arg7[%c58_300] : memref<64xf32, #tpu.memory_space<smem>>
    %1006 = vector.broadcast %1005 : f32 to vector<2x8x16xf32>
    %1007 = arith.addf %1004, %1006 : vector<2x8x16xf32>
    %c58_301 = arith.constant 58 : index
    %1008 = memref.load %arg8[%c58_301] : memref<64xf32, #tpu.memory_space<smem>>
    %cst_302 = arith.constant 0.000000e+00 : f32
    %1009 = vector.broadcast %cst_302 : f32 to vector<2x8x16xf32>
    %1010 = arith.maximumf %1007, %1009 : vector<2x8x16xf32>
    %1011 = vector.broadcast %1008 : f32 to vector<2x8x16xf32>
    %1012 = arith.mulf %1011, %1010 : vector<2x8x16xf32>
    %1013 = arith.addf %997, %1012 : vector<2x8x16xf32>
    %c59 = arith.constant 59 : index
    %1014 = memref.load %arg5[%c59] : memref<64xf32, #tpu.memory_space<smem>>
    %1015 = vector.broadcast %1014 : f32 to vector<2x8x16xf32>
    %1016 = arith.mulf %835, %1015 : vector<2x8x16xf32>
    %c59_303 = arith.constant 59 : index
    %1017 = memref.load %arg6[%c59_303] : memref<64xf32, #tpu.memory_space<smem>>
    %1018 = vector.broadcast %1017 : f32 to vector<2x8x16xf32>
    %1019 = arith.mulf %0, %1018 : vector<2x8x16xf32>
    %1020 = arith.addf %1016, %1019 : vector<2x8x16xf32>
    %c59_304 = arith.constant 59 : index
    %1021 = memref.load %arg7[%c59_304] : memref<64xf32, #tpu.memory_space<smem>>
    %1022 = vector.broadcast %1021 : f32 to vector<2x8x16xf32>
    %1023 = arith.addf %1020, %1022 : vector<2x8x16xf32>
    %c59_305 = arith.constant 59 : index
    %1024 = memref.load %arg8[%c59_305] : memref<64xf32, #tpu.memory_space<smem>>
    %cst_306 = arith.constant 0.000000e+00 : f32
    %1025 = vector.broadcast %cst_306 : f32 to vector<2x8x16xf32>
    %1026 = arith.maximumf %1023, %1025 : vector<2x8x16xf32>
    %1027 = vector.broadcast %1024 : f32 to vector<2x8x16xf32>
    %1028 = arith.mulf %1027, %1026 : vector<2x8x16xf32>
    %1029 = arith.addf %1013, %1028 : vector<2x8x16xf32>
    %c60 = arith.constant 60 : index
    %1030 = memref.load %arg5[%c60] : memref<64xf32, #tpu.memory_space<smem>>
    %1031 = vector.broadcast %1030 : f32 to vector<2x8x16xf32>
    %1032 = arith.mulf %835, %1031 : vector<2x8x16xf32>
    %c60_307 = arith.constant 60 : index
    %1033 = memref.load %arg6[%c60_307] : memref<64xf32, #tpu.memory_space<smem>>
    %1034 = vector.broadcast %1033 : f32 to vector<2x8x16xf32>
    %1035 = arith.mulf %0, %1034 : vector<2x8x16xf32>
    %1036 = arith.addf %1032, %1035 : vector<2x8x16xf32>
    %c60_308 = arith.constant 60 : index
    %1037 = memref.load %arg7[%c60_308] : memref<64xf32, #tpu.memory_space<smem>>
    %1038 = vector.broadcast %1037 : f32 to vector<2x8x16xf32>
    %1039 = arith.addf %1036, %1038 : vector<2x8x16xf32>
    %c60_309 = arith.constant 60 : index
    %1040 = memref.load %arg8[%c60_309] : memref<64xf32, #tpu.memory_space<smem>>
    %cst_310 = arith.constant 0.000000e+00 : f32
    %1041 = vector.broadcast %cst_310 : f32 to vector<2x8x16xf32>
    %1042 = arith.maximumf %1039, %1041 : vector<2x8x16xf32>
    %1043 = vector.broadcast %1040 : f32 to vector<2x8x16xf32>
    %1044 = arith.mulf %1043, %1042 : vector<2x8x16xf32>
    %1045 = arith.addf %1029, %1044 : vector<2x8x16xf32>
    %c61 = arith.constant 61 : index
    %1046 = memref.load %arg5[%c61] : memref<64xf32, #tpu.memory_space<smem>>
    %1047 = vector.broadcast %1046 : f32 to vector<2x8x16xf32>
    %1048 = arith.mulf %835, %1047 : vector<2x8x16xf32>
    %c61_311 = arith.constant 61 : index
    %1049 = memref.load %arg6[%c61_311] : memref<64xf32, #tpu.memory_space<smem>>
    %1050 = vector.broadcast %1049 : f32 to vector<2x8x16xf32>
    %1051 = arith.mulf %0, %1050 : vector<2x8x16xf32>
    %1052 = arith.addf %1048, %1051 : vector<2x8x16xf32>
    %c61_312 = arith.constant 61 : index
    %1053 = memref.load %arg7[%c61_312] : memref<64xf32, #tpu.memory_space<smem>>
    %1054 = vector.broadcast %1053 : f32 to vector<2x8x16xf32>
    %1055 = arith.addf %1052, %1054 : vector<2x8x16xf32>
    %c61_313 = arith.constant 61 : index
    %1056 = memref.load %arg8[%c61_313] : memref<64xf32, #tpu.memory_space<smem>>
    %cst_314 = arith.constant 0.000000e+00 : f32
    %1057 = vector.broadcast %cst_314 : f32 to vector<2x8x16xf32>
    %1058 = arith.maximumf %1055, %1057 : vector<2x8x16xf32>
    %1059 = vector.broadcast %1056 : f32 to vector<2x8x16xf32>
    %1060 = arith.mulf %1059, %1058 : vector<2x8x16xf32>
    %1061 = arith.addf %1045, %1060 : vector<2x8x16xf32>
    %c62 = arith.constant 62 : index
    %1062 = memref.load %arg5[%c62] : memref<64xf32, #tpu.memory_space<smem>>
    %1063 = vector.broadcast %1062 : f32 to vector<2x8x16xf32>
    %1064 = arith.mulf %835, %1063 : vector<2x8x16xf32>
    %c62_315 = arith.constant 62 : index
    %1065 = memref.load %arg6[%c62_315] : memref<64xf32, #tpu.memory_space<smem>>
    %1066 = vector.broadcast %1065 : f32 to vector<2x8x16xf32>
    %1067 = arith.mulf %0, %1066 : vector<2x8x16xf32>
    %1068 = arith.addf %1064, %1067 : vector<2x8x16xf32>
    %c62_316 = arith.constant 62 : index
    %1069 = memref.load %arg7[%c62_316] : memref<64xf32, #tpu.memory_space<smem>>
    %1070 = vector.broadcast %1069 : f32 to vector<2x8x16xf32>
    %1071 = arith.addf %1068, %1070 : vector<2x8x16xf32>
    %c62_317 = arith.constant 62 : index
    %1072 = memref.load %arg8[%c62_317] : memref<64xf32, #tpu.memory_space<smem>>
    %cst_318 = arith.constant 0.000000e+00 : f32
    %1073 = vector.broadcast %cst_318 : f32 to vector<2x8x16xf32>
    %1074 = arith.maximumf %1071, %1073 : vector<2x8x16xf32>
    %1075 = vector.broadcast %1072 : f32 to vector<2x8x16xf32>
    %1076 = arith.mulf %1075, %1074 : vector<2x8x16xf32>
    %1077 = arith.addf %1061, %1076 : vector<2x8x16xf32>
    %c63 = arith.constant 63 : index
    %1078 = memref.load %arg5[%c63] : memref<64xf32, #tpu.memory_space<smem>>
    %1079 = vector.broadcast %1078 : f32 to vector<2x8x16xf32>
    %1080 = arith.mulf %835, %1079 : vector<2x8x16xf32>
    %c63_319 = arith.constant 63 : index
    %1081 = memref.load %arg6[%c63_319] : memref<64xf32, #tpu.memory_space<smem>>
    %1082 = vector.broadcast %1081 : f32 to vector<2x8x16xf32>
    %1083 = arith.mulf %0, %1082 : vector<2x8x16xf32>
    %1084 = arith.addf %1080, %1083 : vector<2x8x16xf32>
    %c63_320 = arith.constant 63 : index
    %1085 = memref.load %arg7[%c63_320] : memref<64xf32, #tpu.memory_space<smem>>
    %1086 = vector.broadcast %1085 : f32 to vector<2x8x16xf32>
    %1087 = arith.addf %1084, %1086 : vector<2x8x16xf32>
    %c63_321 = arith.constant 63 : index
    %1088 = memref.load %arg8[%c63_321] : memref<64xf32, #tpu.memory_space<smem>>
    %cst_322 = arith.constant 0.000000e+00 : f32
    %1089 = vector.broadcast %cst_322 : f32 to vector<2x8x16xf32>
    %1090 = arith.maximumf %1087, %1089 : vector<2x8x16xf32>
    %1091 = vector.broadcast %1088 : f32 to vector<2x8x16xf32>
    %1092 = arith.mulf %1091, %1090 : vector<2x8x16xf32>
    %1093 = arith.addf %1077, %1092 : vector<2x8x16xf32>
    %cst_323 = arith.constant dense<0xFF800000> : vector<2x8xf32>
    %1094 = vector.multi_reduction <maximumf>, %1093, %cst_323 [2] : vector<2x8x16xf32> to vector<2x8xf32>
    %1095 = vector.shape_cast %1094 : vector<2x8xf32> to vector<2x8x1xf32>
    %1096 = vector.broadcast %1095 : vector<2x8x1xf32> to vector<2x8x16xf32>
    %1097 = arith.subf %1093, %1096 : vector<2x8x16xf32>
    %1098 = math.exp %1097 : vector<2x8x16xf32>
    %cst_324 = arith.constant dense<0.000000e+00> : vector<2x8xf32>
    %1099 = vector.multi_reduction <add>, %1098, %cst_324 [2] : vector<2x8x16xf32> to vector<2x8xf32>
    %1100 = vector.shape_cast %1099 : vector<2x8xf32> to vector<2x8x1xf32>
    "tpu.trace_start"() <{level = 10 : i32, message = "bmn,bnk->bmk"}> : () -> ()
    %cst_325 = arith.constant dense<0.000000e+00> : vector<2x8x8xf32>
    %1101 = tpu.matmul %1098, %834, %cst_325 {dimension_numbers = #tpu.dot_dimension_numbers<[2], [1], [1], [2], [0, 0, 0, 1, 1, 2], [0], [0]>} : vector<2x8x16xf32>, vector<2x16x8xf32>, vector<2x8x8xf32> -> vector<2x8x8xf32>
    "tpu.trace_stop"() : () -> ()
    %1102 = tpu.reciprocal %1100 {approx = true} : vector<2x8x1xf32> -> vector<2x8x1xf32>
    %1103 = vector.broadcast %1102 : vector<2x8x1xf32> to vector<2x8x8xf32>
    %1104 = arith.mulf %1101, %1103 : vector<2x8x8xf32>
    %1105 = tpu.concatenate %276, %552, %828, %1104 in 2 : vector<2x8x8xf32>, vector<2x8x8xf32>, vector<2x8x8xf32>, vector<2x8x8xf32> -> vector<2x8x32xf32>
    %c0_326 = arith.constant 0 : index
    %c0_327 = arith.constant 0 : index
    %c0_328 = arith.constant 0 : index
    %1106 = vector.load %arg10[%c0_326, %c0_327, %c0_328] : memref<2x8x32xf32, #tpu.memory_space<vmem>>, vector<2x8x32xf32>
    tpu.vector_store %arg10[%c0_326, %c0_327, %c0_328], %1105 {strides = array<i32>} : memref<2x8x32xf32, #tpu.memory_space<vmem>>, vector<2x8x32xf32>,
    return
  }
  func.func @transform_0(%arg0: i32) -> (i32, i32, i32, i32) {
    %c0_i32 = arith.constant 0 : i32
    %c0_i32_0 = arith.constant 0 : i32
    %c0_i32_1 = arith.constant 0 : i32
    %c0_i32_2 = arith.constant 0 : i32
    return %c0_i32, %arg0, %c0_i32_0, %c0_i32_1 : i32, i32, i32, i32
  }
  func.func @transform_1(%arg0: i32) -> (i32, i32, i32, i32) {
    %c0_i32 = arith.constant 0 : i32
    %c0_i32_0 = arith.constant 0 : i32
    %c0_i32_1 = arith.constant 0 : i32
    %c0_i32_2 = arith.constant 0 : i32
    return %c0_i32, %arg0, %c0_i32_0, %c0_i32_1 : i32, i32, i32, i32
  }
  func.func @transform_2(%arg0: i32) -> (i32, i32, i32, i32) {
    %c0_i32 = arith.constant 0 : i32
    %c0_i32_0 = arith.constant 0 : i32
    %c0_i32_1 = arith.constant 0 : i32
    %c0_i32_2 = arith.constant 0 : i32
    return %c0_i32, %arg0, %c0_i32_0, %c0_i32_1 : i32, i32, i32, i32
  }
  func.func @transform_3(%arg0: i32) -> (i32, i32, i32) {
    %c0_i32 = arith.constant 0 : i32
    %c0_i32_0 = arith.constant 0 : i32
    %c0_i32_1 = arith.constant 0 : i32
    return %arg0, %c0_i32, %c0_i32_0 : i32, i32, i32
  }
  func.func @transform_4(%arg0: i32) -> i32 {
    %c0_i32 = arith.constant 0 : i32
    %c0_i32_0 = arith.constant 0 : i32
    return %c0_i32 : i32
  }
  func.func @transform_5(%arg0: i32) -> i32 {
    %c0_i32 = arith.constant 0 : i32
    %c0_i32_0 = arith.constant 0 : i32
    return %c0_i32 : i32
  }
  func.func @transform_6(%arg0: i32) -> i32 {
    %c0_i32 = arith.constant 0 : i32
    %c0_i32_0 = arith.constant 0 : i32
    return %c0_i32 : i32
  }
  func.func @transform_7(%arg0: i32) -> i32 {
    %c0_i32 = arith.constant 0 : i32
    %c0_i32_0 = arith.constant 0 : i32
    return %c0_i32 : i32
  }
  func.func @transform_8(%arg0: i32) -> i32 {
    %c0_i32 = arith.constant 0 : i32
    %c0_i32_0 = arith.constant 0 : i32
    return %c0_i32 : i32
  }
  func.func @transform_9(%arg0: i32) -> (i32, i32, i32) {
    %c0_i32 = arith.constant 0 : i32
    %c0_i32_0 = arith.constant 0 : i32
    %c0_i32_1 = arith.constant 0 : i32
    return %arg0, %c0_i32, %c0_i32_0 : i32, i32, i32
  }
}

</mosaic_0001>

<bundles_post_ra>
// kernel: tpu_custom_call.1
= control target key start
LH: loop header
LB: loop body
LE: loop exit
PB: predicated region body
PF: predicated region fallthrough
CT: control target
= control target key end

     0   :  { %s6162_s0 = inlined_call_operand.vmem [shape: f32[4,2,8,8], index: 0, kind: input, shape index: {}]   ;;  %s6163_s1 = inlined_call_operand.vmem [shape: f32[4,2,16,8], index: 1, kind: input, shape index: {}]   ;;  %s6164_s2 = inlined_call_operand.vmem [shape: f32[4,2,16,8], index: 2, kind: input, shape index: {}]   ;;  %s6165_s3 = inlined_call_operand.vmem [shape: f32[2,8,16], index: 3, kind: input, shape index: {}]   ;;  %s6166_s4 = inlined_call_operand.vmem [shape: f32[64], index: 4, kind: input, shape index: {}]   ;;  %s6167_s5 = inlined_call_operand.vmem [shape: f32[64], index: 5, kind: input, shape index: {}]   ;;  %s6168_s6 = inlined_call_operand.vmem [shape: f32[64], index: 6, kind: input, shape index: {}]   ;;  %s6169_s7 = inlined_call_operand.vmem [shape: f32[64], index: 7, kind: input, shape index: {}]   ;;  %s6170_s8 = inlined_call_operand.vmem [shape: f32[4], index: 8, kind: input, shape index: {}]   ;;  %s6171_s9 = inlined_call_operand.hbm [shape: f32[2,8,32], index: 9, kind: output, shape index: {}]  }
   0x1   :  { %6510 = sst [smem:[#allocation57_spill]] %s6162_s0 }
   0x2   :  { %6511 = sst [smem:[#allocation58_spill]] %s6163_s1 }
   0x3   :  { %6512 = sst [smem:[#allocation59_spill]] %s6164_s2 }
   0x4   :  { %6513 = sst [smem:[#allocation60_spill]] %s6165_s3 }
   0x5   :  { %6514 = sst [smem:[#allocation61_spill]] %s6171_s9 }
   0x6   :  { %14 = vsyncpa [#allocation4], 0 }
   0x7   :  { %15 = vsyncpa [#allocation6], 0 }
   0x8   :  { %16 = vsyncpa [#allocation9], 0  ;;  %s42_s11 = sshll.u32 %s6167_s5, 4  ;;  %s43_s11 = int_to_ptr.vmem [resolvable:$true] %s42_s11 }
   0x9   :  { %17 = vsyncpa [#allocation3], 0  ;;  %s62_s14 = sshll.u32 %s6169_s7, 4  ;;  %s3443_s15 = scalar_lea.vmem %s43_s11, 16  ;;  %s63_s14 = int_to_ptr.vmem [resolvable:$true] %s62_s14 }
   0xa   :  { %p3444_p0 = scmp.ne.s32.totalorder %s43_s11, %s3443_s15  ;;  %p3448_p1 = scmp.lt.s32.totalorder %s43_s11, %s43_s11 }
   0xb   :  { %p3449_p2 = scmp.lt.s32.totalorder %s3443_s15, %s3443_s15 }
   0xd   :  { %p3450_p3 = por %p3449_p2, %p3448_p1 }
   0xf   :  { %p3451_p4 = pnand %p3450_p3, %p3444_p0 }
  0x11   :  { %3454 = shalt.err (!%p3451_p4)
}
  0x12   :  { %s3531_s16 = smov [#allocation5]   ;;  %s3455_s17 = scalar_lea.vmem %s63_s14, 16 }
  0x13   :  { %45 = dma.vmem_to_smem %s43_s11, 16, %s3531_s16, [#allocation6]  }
  0x14   :  { %p3456_p5 = scmp.ne.s32.totalorder %s63_s14, %s3455_s17  ;;  %p3460_p6 = scmp.lt.s32.totalorder %s63_s14, %s63_s14 }
  0x15   :  { %p3461_p7 = scmp.lt.s32.totalorder %s3455_s17, %s3455_s17 }
  0x17   :  { %p3462_p8 = por %p3461_p7, %p3460_p6 }
  0x19   :  { %p3463_p9 = pnand %p3462_p8, %p3456_p5 }
  0x1b   :  { %3466 = shalt.err (!%p3463_p9)
}
  0x1c   :  { %s3532_s5 = smov [#allocation8]   ;;  %s32_s19 = sshll.u32 %s6166_s4, 4  ;;  %s33_s19 = int_to_ptr.vmem [resolvable:$true] %s32_s19 }
  0x1d   :  { %65 = dma.vmem_to_smem %s63_s14, 16, %s3532_s5, [#allocation9]  }
  0x1e   :  { %s52_s22 = sshll.u32 %s6168_s6, 4  ;;  %s3467_s23 = scalar_lea.vmem %s33_s19, 16  ;;  %s53_s22 = int_to_ptr.vmem [resolvable:$true] %s52_s22 }
  0x1f   :  { %p3468_p10 = scmp.ne.s32.totalorder %s33_s19, %s3467_s23  ;;  %p3472_p11 = scmp.lt.s32.totalorder %s33_s19, %s33_s19 }
  0x20   :  { %p3473_p12 = scmp.lt.s32.totalorder %s3467_s23, %s3467_s23 }
  0x22   :  { %p3474_p13 = por %p3473_p12, %p3472_p11 }
  0x24   :  { %p3475_p0 = pnand %p3474_p13, %p3468_p10 }
  0x26   :  { %3478 = shalt.err (!%p3475_p0)
}
  0x27   :  { %s3533_s24 = smov [#allocation2]   ;;  %s3479_s25 = scalar_lea.vmem %s53_s22, 16 }
  0x28   :  { %35 = dma.vmem_to_smem %s33_s19, 16, %s3533_s24, [#allocation4]  }
  0x29   :  { %p3480_p1 = scmp.ne.s32.totalorder %s53_s22, %s3479_s25  ;;  %p3484_p2 = scmp.lt.s32.totalorder %s53_s22, %s53_s22 }
  0x2a   :  { %p3485_p3 = scmp.lt.s32.totalorder %s3479_s25, %s3479_s25 }
  0x2c   :  { %p3486_p4 = por %p3485_p3, %p3484_p2 }
  0x2e   :  { %p3487_p5 = pnand %p3486_p4, %p3480_p1 }
  0x30   :  { %3490 = shalt.err (!%p3487_p5)
}
  0x31   :  { %s3534_s4 = smov [#allocation7]   ;;  %s72_s27 = sshll.u32 %s6170_s8, 4  ;;  %s73_s27 = int_to_ptr.vmem [resolvable:$true] %s72_s27 }
  0x32   :  { %55 = dma.vmem_to_smem %s53_s22, 16, %s3534_s4, [#allocation6]  }
  0x33   :  { %s3491_s28 = scalar_lea.vmem %s73_s27, 16  ;;  %p3496_p7 = scmp.lt.s32.totalorder %s73_s27, %s73_s27 }
  0x34   :  { %p3492_p6 = scmp.ne.s32.totalorder %s73_s27, %s3491_s28  ;;  %p3497_p8 = scmp.lt.s32.totalorder %s3491_s28, %s3491_s28 }
  0x36   :  { %p3498_p9 = por %p3497_p8, %p3496_p7 }
  0x38   :  { %p3499_p10 = pnand %p3498_p9, %p3492_p6 }
  0x3a   :  { %3502 = shalt.err (!%p3499_p10)
}
  0x3b   :  { %s3535_s29 = smov [#allocation10]  }
  0x3c   :  { %75 = dma.vmem_to_smem %s73_s27, 16, %s3535_s29, [#allocation9]  }
  0x3d   :  { %3523 = dma.done.wait [#allocation4], 16  }
  0x3e   :  { %3524 = vsyncadd [#allocation4], 4294967280 }
  0x3f   :  { %3525 = dma.done.wait [#allocation6], 32  }
  0x40   :  { %3526 = vsyncadd [#allocation6], 4294967264 }
  0x41   :  { %3527 = dma.done.wait [#allocation9], 32  }
  0x42   :  { %3528 = vsyncadd [#allocation9], 4294967264 }
  0x43   :  { %91 = sfence }
  0x44   :  { %v97_v0 = vld [vmem:[%s6163_s1 + $0x8] sm:$0xff]  ;;  %vm104_vm0 = vcmask 64512   ;;  %v99_v1 = vld [vmem:[%s6163_s1 + $0x18] sm:$0xff]  ;;  %v6221_v2 = vmov 0.0   ;;  %v96_v3 = vld [vmem:[%s6163_s1] sm:$0xff]  ;;  %vm3537_vm1 = vmmov 0  }
  0x45   :  { %3283 = vmatprep.subr.mxu0 %v6221_v2  ;;  %3290 = vmatprep.subr.mxu1 %v6221_v2  ;;  %v98_v4 = vld [vmem:[%s6163_s1 + $0x10] sm:$0xff]  ;;  %v94_v5 = vld [vmem:[%s6162_s0] sm:$0xff]  ;;  %v95_v6 = vld [vmem:[%s6162_s0 + $0x8] sm:$0xff]  ;;  %s3646_s18 = sld [smem:[#allocation2]]  ;;  %vm617_vm2 = vcmask 130048   ;;  %vm2893_vm3 = vcmask 195584  }
  0x46   :  { %3284 = vmatpush3.xpose.msk.msra.mxu0 %vm104_vm0, %v97_v0  ;;  %3291 = vmatpush3.xpose.msk.msra.mxu1 %vm104_vm0, %v99_v1  ;;  %s3648_s19 = sld [smem:[#allocation5]]  ;;  %v3735_v7 = vld [vmem:[%s6165_s3] sm:$0xff]  ;;  %v3785_v29 = vld [vmem:[%s6165_s3 + $0x8] sm:$0xff]  ;;  %vm2896_vm4 = vcmask 261120  }
  0x47   :  { %3285 = vmatprep.subr.mxu0 %v6221_v2  ;;  %3292 = vmatprep.subr.mxu1 %v6221_v2  ;;  %s3650_s20 = sld [smem:[#allocation2 + $0x1]] }
  0x48   :  { %3287 = vmatprep.mubr.msk.f32.mxu0 %vm3537_vm1, %v6221_v2  ;;  %3294 = vmatprep.mubr.msk.f32.mxu1 %vm3537_vm1, %v6221_v2  ;;  %s3652_s21 = sld [smem:[#allocation5 + $0x1]] }
  0x49   :  { %s3654_s22 = sld [smem:[#allocation7]] }
  0x4a   :  { %3286 = vmatpush3.xpose.msk.msra.mxu0 %vm104_vm0, %v96_v3  ;;  %3293 = vmatpush3.xpose.msk.msra.mxu1 %vm104_vm0, %v98_v4  ;;  %s3656_s23 = sld [smem:[#allocation7 + $0x1]] }
  0x4b   :  { %3297 = vmatprep.subr.mxu0 %v6221_v2  ;;  %3304 = vmatprep.subr.mxu1 %v6221_v2  ;;  %6515 = sst [smem:[#allocation16_spill]] %s3646_s18  ;;  %v6236_v10 = vstv %s3646_s18 }
  0x4c   :  { %s3658_s24 = sld [smem:[#allocation2 + $0x2]]  ;;  %v270_v8 = vstv %s3648_s19 }
  0x4d   :  { %3288 = vmatmul.mubr.msk.f32.vlgmr.msra.gmra.mxu0 %vm104_vm0, %v94_v5  ;;  %3295 = vmatmul.mubr.msk.f32.vlgmr.msra.gmra.mxu1 %vm104_vm0, %v95_v6  ;;  %6516 = sst [smem:[#allocation17_spill]] %s3650_s20  ;;  %v3747_v11 = vmul.f32 %v270_v8, %v3735_v7  ;;  %v6239_v14 = vstv %s3650_s20  ;;  %v3808_v40 = vmul.f32 %v270_v8, %v3785_v29 }
  0x4e   :  { %3301 = vmatprep.mubr.msk.f32.mxu0 %vm3537_vm1, %v6221_v2  ;;  %3308 = vmatprep.mubr.msk.f32.mxu1 %vm3537_vm1, %v6221_v2  ;;  %s3660_s25 = sld [smem:[#allocation5 + $0x2]]  ;;  %v292_v9 = vstv %s3652_s21 }
  0x4f   :  { %6517 = sst [smem:[#allocation18_spill]] %s3654_s22  ;;  %v276_v13 = vstv %s3654_s22  ;;  %v3755_v15 = vmul.f32 %v292_v9, %v3735_v7  ;;  %v3811_v41 = vmul.f32 %v292_v9, %v3785_v29 }
  0x50   :  { %6518 = sst [smem:[#allocation19_spill]] %s3656_s23  ;;  %v298_v18 = vstv %s3656_s23 }
  0x51   :  { %s3662_s4 = sld [smem:[#allocation10]] }
  0x52   :  { %6519 = sst [smem:[#allocation20_spill]] %s3658_s24  ;;  %v6237_v19 = vstv %s3658_s24 }
  0x53   :  { %s3664_s6 = sld [smem:[#allocation8]] }
  0x54   :  { %s3666_s26 = sld [smem:[#allocation8 + $0x1]]  ;;  %v314_v12 = vstv %s3660_s25 }
  0x55   :  { %s3668_s27 = sld [smem:[#allocation7 + $0x2]]  ;;  %v3769_v23 = vmul.f32 %v314_v12, %v3735_v7  ;;  %v3819_v45 = vmul.f32 %v314_v12, %v3785_v29 }
  0x56   :  { %s3670_s28 = sld [smem:[#allocation8 + $0x2]] }
  0x57   :  { %6520 = sst [smem:[#allocation21_spill]] %s3662_s4  ;;  %v264_v17 = vstv %s3662_s4 }
  0x58   :  { %s3672_s29 = sld [smem:[#allocation2 + $0x3]] }
  0x59   :  { %6521 = sst [smem:[#allocation22_spill]] %s3664_s6  ;;  %v282_v21 = vstv %s3664_s6 }
  0x5a   :  { %6522 = sst [smem:[#allocation23_spill]] %s3666_s26  ;;  %v304_v22 = vstv %s3666_s26 }
  0x5b   :  { %6523 = sst [smem:[#allocation24_spill]] %s3668_s27  ;;  %v320_v24 = vstv %s3668_s27 }
  0x5c   :  { %6524 = sst [smem:[#allocation25_spill]] %s3670_s28  ;;  %v326_v25 = vstv %s3670_s28 }
  0x5d   :  { %s3674_s30 = sld [smem:[#allocation5 + $0x3]] }
  0x5e   :  { %6525 = sst [smem:[#allocation26_spill]] %s3672_s29  ;;  %v6238_v26 = vstv %s3672_s29 }
  0x5f   :  { %s3676_s10 = sld [smem:[#allocation7 + $0x3]] }
  0x60   :  { %s3678_s8 = sld [smem:[#allocation8 + $0x3]] }
  0x61   :  { %s3680_s11 = sld [smem:[#allocation2 + $0x4]] }
  0x62   :  { %s3682_s12 = sld [smem:[#allocation5 + $0x4]] }
  0x63   :  { %s3684_s13 = sld [smem:[#allocation7 + $0x4]]  ;;  %v336_v16 = vstv %s3674_s30 }
  0x64   :  { %s3686_s14 = sld [smem:[#allocation8 + $0x4]]  ;;  %v3777_v27 = vmul.f32 %v336_v16, %v3735_v7  ;;  %v3827_v47 = vmul.f32 %v336_v16, %v3785_v29 }
  0x65   :  { %6526 = sst [smem:[#allocation27_spill]] %s3676_s10  ;;  %v342_v30 = vstv %s3676_s10 }
  0x66   :  { %6527 = sst [smem:[#allocation28_spill]] %s3678_s8  ;;  %v6255_v31 = vstv %s3678_s8 }
  0x67   :  { %6528 = sst [smem:[#allocation29_spill]] %s3680_s11  ;;  %v6240_v32 = vstv %s3680_s11 }
  0x68   :  { %s3688_s15 = sld [smem:[#allocation2 + $0x5]]  ;;  %v358_v20 = vstv %s3682_s12 }
  0x69   :  { %6529 = sst [smem:[#allocation30_spill]] %s3684_s13  ;;  %v3791_v33 = vmul.f32 %v358_v20, %v3735_v7  ;;  %v3830_v48 = vmul.f32 %v358_v20, %v3785_v29 }
  0x6a   :  { %6530 = sst [smem:[#allocation31_spill]] %s3686_s14 }
  0x6b   :  { %s3690_s16 = sld [smem:[#allocation5 + $0x5]] }
  0x6c   :  { %s3692_s17 = sld [smem:[#allocation7 + $0x5]] }
  0x6d   :  { %s3694_s5 = sld [smem:[#allocation8 + $0x5]] }
  0x6e   :  { %6531 = sst [smem:[#allocation32_spill]] %s3688_s15 }
  0x6f   :  { %s3696_s7 = sld [smem:[#allocation2 + $0x6]] }
  0x70   :  { %s3698_s9 = sld [smem:[#allocation5 + $0x6]] }
  0x71   :  { %s3700_s0 = sld [smem:[#allocation7 + $0x6]]  ;;  %v380_v28 = vstv %s3690_s16 }
  0x72   :  { %6532 = sst [smem:[#allocation33_spill]] %s3692_s17  ;;  %v3802_v38 = vmul.f32 %v380_v28, %v3735_v7  ;;  %v3833_v49 = vmul.f32 %v380_v28, %v3785_v29 }
  0x73   :  { %6533 = sst [smem:[#allocation34_spill]] %s3694_s5 }
  0x74   :  { %s3702_s1 = sld [smem:[#allocation8 + $0x6]] }
  0x75   :  { %6534 = sst [smem:[#allocation35_spill]] %s3696_s7 }
  0x76   :  { %s3704_s2 = sld [smem:[#allocation2 + $0x7]]  ;;  %v402_v37 = vstv %s3698_s9 }
  0x77   :  { %6535 = sst [smem:[#allocation36_spill]] %s3700_s0  ;;  %v3822_v46 = vmul.f32 %v402_v37, %v3735_v7  ;;  %v3849_v57 = vmul.f32 %v402_v37, %v3785_v29 }
  0x78   :  { %s3706_s14 = sld [smem:[#allocation5 + $0x7]] }
  0x79   :  { %s3708_s15 = sld [smem:[#allocation7 + $0x7]] }
  0x7a   :  { %6536 = sst [smem:[#allocation37_spill]] %s3702_s1 }
  0x7b   :  { %s3710_s13 = sld [smem:[#allocation8 + $0x7]] }
  0x7c   :  { %6537 = sst [smem:[#allocation38_spill]] %s3704_s2 }
  0x7d   :  { %s3712_s17 = sld [smem:[#allocation2 + $0x8]] }
  0x7e   :  { %6538 = sst [smem:[#allocation39_spill]] %s3706_s14 }
  0x7f   :  { %6539 = sst [smem:[#allocation40_spill]] %s3708_s15 }
  0x80   :  { %s3714_s7 = sld [smem:[#allocation5 + $0x8]] }
  0x81   :  { %6540 = sst [smem:[#allocation41_spill]] %s3710_s13 }
  0x82   :  { %s3716_s5 = sld [smem:[#allocation7 + $0x8]] }
  0x83   :  { %6541 = sst [smem:[#allocation42_spill]] %s3712_s17 }
  0x84   :  { %s3718_s0 = sld [smem:[#allocation8 + $0x8]] }
  0x85   :  { %s3720_s1 = sld [smem:[#allocation2 + $0x9]] }
  0x86   :  { %6542 = sst [smem:[#allocation43_spill]] %s3714_s7 }
  0x87   :  { %s3722_s2 = sld [smem:[#allocation5 + $0x9]] }
  0x88   :  { %6543 = sst [smem:[#allocation44_spill]] %s3716_s5 }
  0x89   :  { %s3724_s14 = sld [smem:[#allocation7 + $0x9]] }
  0x8a   :  { %6544 = sst [smem:[#allocation45_spill]] %s3718_s0 }
  0x8b   :  { %6545 = sst [smem:[#allocation46_spill]] %s3720_s1 }
  0x8c   :  { %s3726_s15 = sld [smem:[#allocation8 + $0x9]] }
  0x8d   :  { %s3728_s17 = sld [smem:[#allocation2 + $0xa]]  ;;  %v468_v56 = vstv %s3722_s2 }
  0x8e   :  { %s3730_s13 = sld [smem:[#allocation5 + $0xa]]  ;;  %v3871_v4 = vmul.f32 %v468_v56, %v3735_v7  ;;  %v3881_v16 = vmul.f32 %v468_v56, %v3785_v29 }
  0x8f   :  { %6546 = sst [smem:[#allocation47_spill]] %s3724_s14 }
  0x90   :  { %s3738_s1 = sld [smem:[#allocation7 + $0xa]] }
  0x91   :  { %s3741_s14 = sld [smem:[#allocation8 + $0xa]] }
  0x92   :  { %6547 = sst [smem:[#allocation48_spill]] %s3726_s15 }
  0x93   :  { %s3743_s15 = sld [smem:[#allocation2 + $0xb]] }
  0x94   :  { %s3750_s5 = sld [smem:[#allocation5 + $0xb]]  ;;  %v490_v60 = vstv %s3730_s13 }
  0x95   :  { %s3758_s19 = sld [smem:[#allocation7 + $0xb]]  ;;  %v3878_v12 = vmul.f32 %v490_v60, %v3735_v7 }
  0x96   :  { %s3764_s21 = sld [smem:[#allocation8 + $0xb]] }
  0x97   :  { %6548 = sst [smem:[#allocation49_spill]] %s3741_s14 }
  0x98   :  { %s6551_s25 = sld [smem:[#allocation30_spill]] }
  0x99   :  { %s6553_s22 = sld [smem:[#allocation32_spill]] }
  0x9a   :  { %s3772_s30 = sld [smem:[#allocation2 + $0xc]]  ;;  %v512_v6 = vstv %s3750_s5 }
  0x9b   :  { %6549 = sst [smem:[#allocation50_spill]] %s3758_s19  ;;  %v3891_v2 = vmul.f32 %v512_v6, %v3735_v7  ;;  %v3899_v28 = vmul.f32 %v512_v6, %v3785_v29 }
  0x9c   :  { %6550 = sst [smem:[#allocation51_spill]] %s3764_s21 }
  0x9d   :  { %s6555_s4 = sld [smem:[#allocation33_spill]] }
  0x9e   :  { %s3780_s12 = sld [smem:[#allocation5 + $0xc]]  ;;  %v364_v34 = vstv %s6551_s25 }
  0x9f   :  { %s6557_s27 = sld [smem:[#allocation35_spill]]  ;;  %v6241_v36 = vstv %s6553_s22 }
  0xa0   :  { %6554 = sst [smem:[#allocation52_spill]] %s3772_s30 }
  0xa1   :  { %s6558_s24 = sld [smem:[#allocation39_spill]] }
  0xa2   :  { %s3793_s28 = sld [smem:[#allocation7 + $0xc]] }
  0xa3   :  { %s3799_s16 = sld [smem:[#allocation8 + $0xc]]  ;;  %v386_v39 = vstv %s6555_s4 }
  0xa4   :  { %s6561_s6 = sld [smem:[#allocation36_spill]]  ;;  %v534_v37 = vstv %s3780_s12 }
  0xa5   :  { %s6563_s3 = sld [smem:[#allocation38_spill]]  ;;  %v6242_v43 = vstv %s6557_s27  ;;  %v3902_v42 = vmul.f32 %v534_v37, %v3735_v7  ;;  %v3909_v58 = vmul.f32 %v534_v37, %v3785_v29 }
  0xa6   :  { %s3805_s8 = sld [smem:[#allocation2 + $0xd]] }
  0xa7   :  { %s6565_s10 = sld [smem:[#allocation43_spill]]  ;;  %v424_v44 = vstv %s6558_s24 }
  0xa8   :  { %6559 = sst [smem:[#allocation39_spill]] %s3793_s28  ;;  %v3842_v54 = vmul.f32 %v424_v44, %v3735_v7  ;;  %v3857_v61 = vmul.f32 %v424_v44, %v3785_v29  ;;  %v3887_v44 = vmul.f32 %v490_v60, %v3785_v29 }
  0xa9   :  { %6560 = sst [smem:[#allocation53_spill]] %s3799_s16 }
  0xaa   :  { %s6566_s9 = sld [smem:[#allocation40_spill]]  ;;  %v6254_v50 = vstv %s6561_s6 }
  0xab   :  { %s3816_s7 = sld [smem:[#allocation5 + $0xd]]  ;;  %v6243_v52 = vstv %s6563_s3 }
  0xac   :  { %6564 = sst [smem:[#allocation54_spill]] %s3805_s8 }
  0xad   :  { %s6568_s25 = sld [smem:[#allocation42_spill]]  ;;  %v446_v53 = vstv %s6565_s10 }
  0xae   :  { %s3824_s22 = sld [smem:[#allocation7 + $0xd]]  ;;  %v3860_v62 = vmul.f32 %v446_v53, %v3735_v7  ;;  %v3867_v1 = vmul.f32 %v446_v53, %v3785_v29 }
  0xaf   :  { %s6570_s24 = sld [smem:[#allocation44_spill]] }
  0xb0   :  { %s3839_s23 = sld [smem:[#allocation5 + $0xe]]  ;;  %v6251_v55 = vstv %s6566_s9 }
  0xb1   :  { %s6572_s27 = sld [smem:[#allocation46_spill]]  ;;  %v556_v0 = vstv %s3816_s7 }
  0xb2   :  { %s6573_s11 = sld [smem:[#allocation47_spill]]  ;;  %v3913_v20 = vmul.f32 %v556_v0, %v3735_v7  ;;  %v3919_v60 = vmul.f32 %v556_v0, %v3785_v29 }
  0xb3   :  { %s3846_s29 = sld [smem:[#allocation8 + $0xd]]  ;;  %v442_v59 = vstv %s6568_s25 }
  0xb4   :  { %6569 = sst [smem:[#allocation43_spill]] %s3824_s22 }
  0xb5   :  { %s3854_s10 = sld [smem:[#allocation2 + $0xe]] }
  0xb6   :  { %6571 = sst [smem:[#allocation42_spill]] %s3839_s23  ;;  %v6234_v56 = vstv %s3839_s23 }
  0xb7   :  { %s3864_s2 = sld [smem:[#allocation5 + $0xf]]  ;;  %v579_v8 = vmul.f32 %v6234_v56, %v3735_v7 }
  0xb8   :  { %s6578_s13 = sld [smem:[#allocation17_spill]] }
  0xb9   :  { %6574 = sst [smem:[#allocation46_spill]] %s3846_s29 }
  0xba   :  { %s3906_s5 = sld [smem:[#allocation7 + $0xe]] }
  0xbb   :  { %6576 = sst [smem:[#allocation47_spill]] %s3854_s10 }
  0xbc   :  { %s6581_s12 = sld [smem:[#allocation26_spill]] }
  0xbd   :  { %6577 = sst [smem:[#allocation55_spill]] %s3864_s2  ;;  %v6247_v6 = vstv %s3864_s2 }
  0xbe   :  { %s6582_s21 = sld [smem:[#allocation29_spill]] }
  0xbf   :  { %s3916_s14 = sld [smem:[#allocation8 + $0xe]] }
  0xc0   :  { %6579 = sst [smem:[#allocation17_spill]] %s3906_s5 }
  0xc1   :  { %s3930_s0 = sld [smem:[#allocation2 + $0xf]] }
  0xc2   :  { %s6595_s4 = sld [smem:[#allocation28_spill]] }
  0xc3   :  { %s3989_s9 = sld [smem:[#allocation7 + $0xf]] }
  0xc4   :  { %s3997_s2 = sld [smem:[#allocation8 + $0xf]] }
  0xc5   :  { %6583 = sst [smem:[#allocation26_spill]] %s3916_s14 }
  0xc6   :  { %s6603_s14 = sld [smem:[#allocation31_spill]] }
  0xc7   :  { %s6612_s6 = sld [smem:[#allocation45_spill]] }
  0xc8   :  { %s6644_s3 = sld [smem:[#allocation36_spill]] }
  0xc9   :  { %s6645_s18 = sld [smem:[#allocation40_spill]] }
  0xca   :  { %s6647_s20 = sld [smem:[#allocation26_spill]] }
  0xcb   :  { %s6649_s23 = sld [smem:[#allocation44_spill]] }
  0xcc   :  { %s6653_s29 = sld [smem:[#allocation55_spill]] }
  0xcd   :  { %s6663_s25 = sld [smem:[#allocation41_spill]] }
  0xce   :  { %s6666_s16 = sld [smem:[#allocation47_spill]] }
  0xcf   :  { %s4296_s26 = sld [smem:[#allocation8 + $0x12]] }
  0xd0   :  { %s4304_s7 = sld [smem:[#allocation8 + $0x13]] }
  0xd5   :  { %6699 = sst [smem:[#allocation28_spill]] %s4296_s26 }
 0x10d   :  { %v3921_v35 = vpop.f32.mrf.mxu0  ;;  %v3923_v5 = vpop.f32.mrf.mxu1 }
 0x10e   :  { %v267_v51 = vmul.f32 %v6236_v10, %v3921_v35  ;;  %v289_v0 = vmul.f32 %v6239_v14, %v3921_v35  ;;  %v311_v53 = vmul.f32 %v6237_v19, %v3921_v35  ;;  %v333_v37 = vmul.f32 %v6238_v26, %v3921_v35 }
 0x10f   :  { %v3289_v63 = vpop.f32.mrf.mxu0  ;;  %v3296_v56 = vpop.f32.mrf.mxu1  ;;  %v355_v9 = vmul.f32 %v6240_v32, %v3921_v35  ;;  %v377_v10 = vmul.f32 %v6241_v36, %v3921_v35  ;;  %v399_v19 = vmul.f32 %v6242_v43, %v3921_v35  ;;  %v421_v26 = vmul.f32 %v6243_v52, %v3921_v35 }
 0x110   :  { %v273_v63 = vadd.f32 %v3747_v11, %v267_v51  ;;  %v295_v56 = vadd.f32 %v3755_v15, %v289_v0  ;;  %v317_v14 = vadd.f32 %v3769_v23, %v311_v53  ;;  %v339_v32 = vadd.f32 %v3777_v27, %v333_v37 }
 0x111   :  { %v361_v3 = vadd.f32 %v3791_v33, %v355_v9  ;;  %v383_v36 = vadd.f32 %v3802_v38, %v377_v10  ;;  %v405_v43 = vadd.f32 %v3822_v46, %v399_v19  ;;  %v427_v52 = vadd.f32 %v3842_v54, %v421_v26 }
 0x112   :  { %v277_v11 = vadd.f32 %v276_v13, %v273_v63  ;;  %v299_v15 = vadd.f32 %v298_v18, %v295_v56  ;;  %v321_v23 = vadd.f32 %v320_v24, %v317_v14  ;;  %v343_v27 = vadd.f32 %v342_v30, %v339_v32 }
 0x113   :  { %v365_v33 = vadd.f32 %v364_v34, %v361_v3  ;;  %v387_v10 = vadd.f32 %v386_v39, %v383_v36  ;;  %v409_v19 = vadd.f32 %v6254_v50, %v405_v43  ;;  %v431_v26 = vadd.f32 %v6251_v55, %v427_v52 }
 0x114   :  { %v280_v38 = vmax.f32 %v277_v11, 0.0  ;;  %v302_v46 = vmax.f32 %v299_v15, 0.0  ;;  %v324_v51 = vmax.f32 %v321_v23, 0.0  ;;  %v346_v54 = vmax.f32 %v343_v27, 0.0 }
 0x115   :  { %v584_v14 = vstv %s3906_s5  ;;  %v596_v3 = vstv %s3930_s0  ;;  %v601_v36 = vmul.f32 %v6247_v6, %v3735_v7  ;;  %v368_v52 = vmax.f32 %v365_v33, 0.0  ;;  %s6620_s5 = sld [smem:[#allocation32_spill]] }
 0x116   :  { %v283_v43 = vmul.f32 %v282_v21, %v280_v38  ;;  %v390_v9 = vmax.f32 %v387_v10, 0.0  ;;  %v412_v53 = vmax.f32 %v409_v19, 0.0  ;;  %v305_v37 = vmul.f32 %v304_v22, %v302_v46  ;;  %s4288_s0 = sld [smem:[#allocation8 + $0x11]] }
 0x117   :  { %v327_v0 = vmul.f32 %v326_v25, %v324_v51  ;;  %v349_v63 = vmul.f32 %v6255_v31, %v346_v54  ;;  %v434_v56 = vmax.f32 %v431_v26, 0.0  ;;  %v443_v15 = vmul.f32 %v442_v59, %v3921_v35 }
 0x118   :  { %v285_v11 = vadd.f32 %v283_v43, %v264_v17  ;;  %v6597_v23 = vstv %s6572_s27  ;;  %v6598_v33 = vstv %s3728_s17  ;;  %v6599_v19 = vstv %s3743_s15 }
 0x119   :  { %v465_v27 = vmul.f32 %v6597_v23, %v3921_v35  ;;  %v487_v10 = vmul.f32 %v6598_v33, %v3921_v35  ;;  %v509_v38 = vmul.f32 %v6599_v19, %v3921_v35  ;;  %v6600_v26 = vstv %s3772_s30  ;;  %s6605_s30 = sld [smem:[#allocation37_spill]] }
 0x11a   :  { %v531_v46 = vmul.f32 %v6600_v26, %v3921_v35  ;;  %v6601_v51 = vstv %s3805_s8  ;;  %v6602_v43 = vstv %s3854_s10  ;;  %v307_v6 = vadd.f32 %v305_v37, %v285_v11  ;;  %s6604_s8 = sld [smem:[#allocation34_spill]] }
 0x11b   :  { %v553_v54 = vmul.f32 %v6601_v51, %v3921_v35  ;;  %v575_v23 = vmul.f32 %v6602_v43, %v3921_v35  ;;  %v449_v33 = vadd.f32 %v3860_v62, %v443_v15  ;;  %v471_v32 = vadd.f32 %v3871_v4, %v465_v27  ;;  %s6606_s10 = sld [smem:[#allocation41_spill]] }
 0x11c   :  { %v493_v19 = vadd.f32 %v3878_v12, %v487_v10  ;;  %v515_v26 = vadd.f32 %v3891_v2, %v509_v38  ;;  %v537_v55 = vadd.f32 %v3902_v42, %v531_v46  ;;  %v329_v37 = vadd.f32 %v327_v0, %v307_v6  ;;  %6696 = sst [smem:[#allocation22_spill]] %s4288_s0 }
 0x11d   :  { %v559_v51 = vadd.f32 %v3913_v20, %v553_v54  ;;  %v581_v43 = vadd.f32 %v579_v8, %v575_v23  ;;  %v6607_v11 = vstv %s6570_s24  ;;  %v6608_v15 = vstv %s6573_s11  ;;  %s6615_s24 = sld [smem:[#allocation16_spill]] }
 0x11e   :  { %v453_v62 = vadd.f32 %v6607_v11, %v449_v33  ;;  %v475_v50 = vadd.f32 %v6608_v15, %v471_v32  ;;  %v6609_v4 = vstv %s3738_s1  ;;  %v6610_v12 = vstv %s3758_s19  ;;  %s6618_s19 = sld [smem:[#allocation20_spill]] }
 0x11f   :  { %v497_v27 = vadd.f32 %v6609_v4, %v493_v19  ;;  %v519_v10 = vadd.f32 %v6610_v12, %v515_v26  ;;  %v6611_v31 = vstv %s3793_s28  ;;  %v6613_v38 = vstv %s3824_s22  ;;  %s6622_s22 = sld [smem:[#allocation48_spill]] }
 0x120   :  { %v541_v2 = vadd.f32 %v6611_v31, %v537_v55  ;;  %v563_v42 = vadd.f32 %v6613_v38, %v559_v51  ;;  %v4042_v46 = vadd.f32 %v584_v14, %v581_v43  ;;  %v351_v20 = vadd.f32 %v349_v63, %v329_v37  ;;  %s6637_s28 = sld [smem:[#allocation35_spill]] }
 0x121   :  { %v6614_v8 = vstv %s6603_s14  ;;  %v456_v6 = vmax.f32 %v453_v62, 0.0  ;;  %v606_v0 = vstv %s3989_s9  ;;  %v6616_v32 = vstv %s6604_s8  ;;  %s4298_s9 = sld [smem:[#allocation2 + $0x13]] }
 0x122   :  { %v371_v54 = vmul.f32 %v6614_v8, %v368_v52  ;;  %v393_v23 = vmul.f32 %v6616_v32, %v390_v9  ;;  %v6617_v33 = vstv %s6605_s30  ;;  %v6619_v26 = vstv %s6606_s10  ;;  %s6639_s10 = sld [smem:[#allocation38_spill]] }
 0x123   :  { %v415_v19 = vmul.f32 %v6617_v33, %v412_v53  ;;  %v437_v31 = vmul.f32 %v6619_v26, %v434_v56  ;;  %v612_v55 = vstv %s3997_s2  ;;  %v478_v63 = vmax.f32 %v475_v50, 0.0  ;;  %s4300_s2 = sld [smem:[#allocation5 + $0x13]] }
 0x124   :  { %v373_v51 = vadd.f32 %v371_v54, %v351_v20  ;;  %v500_v43 = vmax.f32 %v497_v27, 0.0  ;;  %v522_v52 = vmax.f32 %v519_v10, 0.0  ;;  %v6621_v37 = vstv %s6612_s6  ;;  %6702 = sst [smem:[#allocation34_spill]] %s4304_s7 }
 0x125   :  { %v459_v11 = vmul.f32 %v6621_v37, %v456_v6  ;;  %v544_v62 = vmax.f32 %v541_v2, 0.0  ;;  %v566_v15 = vmax.f32 %v563_v42, 0.0  ;;  %v588_v9 = vmax.f32 %v4042_v46, 0.0 }
 0x126   :  { %v395_v4 = vadd.f32 %v393_v23, %v373_v51  ;;  %v597_v53 = vmul.f32 %v596_v3, %v3921_v35  ;;  %v6623_v56 = vstv %s6615_s24  ;;  %v6625_v38 = vstv %s6578_s13  ;;  %s6631_s24 = sld [smem:[#allocation49_spill]] }
 0x127   :  { %v268_v12 = vmul.f32 %v6623_v56, %v3923_v5  ;;  %v290_v50 = vmul.f32 %v6625_v38, %v3923_v5  ;;  %v6627_v27 = vstv %s6618_s19  ;;  %v6628_v2 = vstv %s6581_s12  ;;  %s6633_s19 = sld [smem:[#allocation51_spill]] }
 0x128   :  { %v312_v10 = vmul.f32 %v6627_v27, %v3923_v5  ;;  %v334_v42 = vmul.f32 %v6628_v2, %v3923_v5  ;;  %v6629_v46 = vstv %s6582_s21  ;;  %v6630_v35 = vstv %s6620_s5  ;;  %s6634_s21 = sld [smem:[#allocation53_spill]] }
 0x129   :  { %v356_v20 = vmul.f32 %v6629_v46, %v3923_v5  ;;  %v378_v8 = vmul.f32 %v6630_v35, %v3923_v5  ;;  %v417_v54 = vadd.f32 %v415_v19, %v395_v4  ;;  %v603_v6 = vadd.f32 %v601_v36, %v597_v53  ;;  %s6635_s13 = sld [smem:[#allocation46_spill]] }
 0x12a   :  { %v274_v32 = vadd.f32 %v3808_v40, %v268_v12  ;;  %v296_v23 = vadd.f32 %v3811_v41, %v290_v50  ;;  %v6632_v33 = vstv %s6622_s22  ;;  %v318_v51 = vadd.f32 %v3819_v45, %v312_v10  ;;  %6700 = sst [smem:[#allocation21_spill]] %s4298_s9 }
 0x12b   :  { %v481_v26 = vmul.f32 %v6632_v33, %v478_v63  ;;  %v340_v37 = vadd.f32 %v3827_v47, %v334_v42  ;;  %v362_v56 = vadd.f32 %v3830_v48, %v356_v20  ;;  %v439_v38 = vadd.f32 %v437_v31, %v417_v54  ;;  %s4302_s5 = sld [smem:[#allocation7 + $0x13]] }
 0x12c   :  { %v278_v19 = vadd.f32 %v276_v13, %v274_v32  ;;  %v300_v36 = vadd.f32 %v298_v18, %v296_v23  ;;  %v384_v40 = vadd.f32 %v3833_v49, %v378_v8  ;;  %v607_v41 = vadd.f32 %v606_v0, %v603_v6  ;;  %s4306_s12 = sld [smem:[#allocation2 + $0x14]] }
 0x12d   :  { %v322_v45 = vadd.f32 %v320_v24, %v318_v51  ;;  %v344_v47 = vadd.f32 %v342_v30, %v340_v37  ;;  %v366_v63 = vadd.f32 %v364_v34, %v362_v56  ;;  %v461_v48 = vadd.f32 %v459_v11, %v439_v38 }
 0x12e   :  { %v6636_v31 = vstv %s6631_s24  ;;  %v281_v13 = vmax.f32 %v278_v19, 0.0  ;;  %v303_v18 = vmax.f32 %v300_v36, 0.0  ;;  %v6638_v53 = vstv %s6633_s19 }
 0x12f   :  { %v503_v4 = vmul.f32 %v6636_v31, %v500_v43  ;;  %v525_v49 = vmul.f32 %v6638_v53, %v522_v52  ;;  %v6640_v12 = vstv %s6634_s21  ;;  %v6641_v27 = vstv %s6635_s13 }
 0x130   :  { %v547_v50 = vmul.f32 %v6640_v12, %v544_v62  ;;  %v569_v24 = vmul.f32 %v6641_v27, %v566_v15  ;;  %v325_v10 = vmax.f32 %v322_v45, 0.0  ;;  %v483_v30 = vadd.f32 %v481_v26, %v461_v48 }
 0x131   :  { %v284_v34 = vmul.f32 %v282_v21, %v281_v13  ;;  %v306_v43 = vmul.f32 %v304_v22, %v303_v18  ;;  %v388_v11 = vadd.f32 %v386_v39, %v384_v40  ;;  %v610_v2 = vmax.f32 %v607_v41, 0.0  ;;  %6701 = sst [smem:[#allocation31_spill]] %s4302_s5 }
 0x132   :  { %v328_v42 = vmul.f32 %v326_v25, %v325_v10  ;;  %v347_v52 = vmax.f32 %v344_v47, 0.0  ;;  %v369_v62 = vmax.f32 %v366_v63, 0.0  ;;  %v505_v46 = vadd.f32 %v503_v4, %v483_v30  ;;  %6703 = sst [smem:[#allocation37_spill]] %s4306_s12 }
 0x133   :  { %v286_v15 = vadd.f32 %v284_v34, %v264_v17  ;;  %v6642_v20 = vstv %s6637_s28  ;;  %v6643_v8 = vstv %s6639_s10  ;;  %v444_v21 = vmul.f32 %v442_v59, %v3923_v5  ;;  %s6690_s10 = sld [smem:[#allocation57_spill]] }
 0x134   :  { %v400_v35 = vmul.f32 %v6642_v20, %v3923_v5  ;;  %v422_v54 = vmul.f32 %v6643_v8, %v3923_v5  ;;  %v6646_v22 = vstv %s6572_s27  ;;  %v6648_v39 = vstv %s3728_s17  ;;  %s6652_s27 = sld [smem:[#allocation42_spill]] }
 0x135   :  { %v466_v25 = vmul.f32 %v6646_v22, %v3923_v5  ;;  %v488_v17 = vmul.f32 %v6648_v39, %v3923_v5  ;;  %v6650_v6 = vstv %s3743_s15  ;;  %v527_v23 = vadd.f32 %v525_v49, %v505_v46  ;;  %s6660_s15 = sld [smem:[#allocation52_spill]] }
 0x136   :  { %v510_v32 = vmul.f32 %v6650_v6, %v3923_v5  ;;  %v308_v33 = vadd.f32 %v306_v43, %v286_v15  ;;  %v406_v26 = vadd.f32 %v3849_v57, %v400_v35  ;;  %v428_v51 = vadd.f32 %v3857_v61, %v422_v54  ;;  %s6661_s17 = sld [smem:[#allocation54_spill]] }
 0x137   :  { %v6651_v37 = vstv %s6595_s4  ;;  %v391_v56 = vmax.f32 %v388_v11, 0.0  ;;  %v450_v38 = vadd.f32 %v3867_v1, %v444_v21  ;;  %v472_v19 = vadd.f32 %v3881_v16, %v466_v25  ;;  %s6658_s4 = sld [smem:[#allocation50_spill]] }
 0x138   :  { %v350_v59 = vmul.f32 %v6651_v37, %v347_v52  ;;  %v549_v36 = vadd.f32 %v547_v50, %v527_v23  ;;  %v330_v40 = vadd.f32 %v328_v42, %v308_v33  ;;  %v6654_v41 = vstv %s6644_s3  ;;  %s4314_s28 = sld [smem:[#allocation2 + $0x15]] }
 0x139   :  { %v410_v45 = vadd.f32 %v6654_v41, %v406_v26  ;;  %v6655_v47 = vstv %s6645_s18  ;;  %v6656_v63 = vstv %s6647_s20  ;;  %v6657_v48 = vstv %s6649_s23  ;;  %s4316_s3 = sld [smem:[#allocation5 + $0x15]] }
 0x13a   :  { %v432_v57 = vadd.f32 %v6655_v47, %v428_v51  ;;  %v591_v61 = vmul.f32 %v6656_v63, %v588_v9  ;;  %v454_v31 = vadd.f32 %v6657_v48, %v450_v38  ;;  %v494_v4 = vadd.f32 %v3887_v44, %v488_v17  ;;  %s4318_s18 = sld [smem:[#allocation7 + $0x15]] }
 0x13b   :  { %v516_v1 = vadd.f32 %v3899_v28, %v510_v32  ;;  %v571_v16 = vadd.f32 %v569_v24, %v549_v36  ;;  %v352_v13 = vadd.f32 %v350_v59, %v330_v40  ;;  %v6659_v18 = vstv %s6603_s14  ;;  %s6687_s14 = sld [smem:[#allocation59_spill]] }
 0x13c   :  { %v372_v53 = vmul.f32 %v6659_v18, %v369_v62  ;;  %v413_v49 = vmax.f32 %v410_v45, 0.0  ;;  %v435_v12 = vmax.f32 %v432_v57, 0.0  ;;  %v6662_v50 = vstv %s6573_s11  ;;  %s6671_s11 = sld [smem:[#allocation39_spill]] }
 0x13d   :  { %v476_v9 = vadd.f32 %v6662_v50, %v472_v19  ;;  %v6664_v27 = vstv %s6652_s27  ;;  %v6665_v44 = vstv %s6653_s29  ;;  %v593_v28 = vadd.f32 %v591_v61, %v571_v16  ;;  %s4322_s23 = sld [smem:[#allocation2 + $0x16]] }
 0x13e   :  { %v580_v10 = vmul.f32 %v6664_v27, %v3785_v29  ;;  %v602_v30 = vmul.f32 %v6665_v44, %v3785_v29  ;;  %v613_v24 = vmul.f32 %v612_v55, %v610_v2  ;;  %v374_v34 = vadd.f32 %v372_v53, %v352_v13  ;;  %6706 = sst [smem:[#allocation20_spill]] %s4314_s28 }
 0x13f   :  { %v6667_v43 = vstv %s6604_s8  ;;  %v6668_v42 = vstv %s6605_s30  ;;  %v457_v62 = vmax.f32 %v454_v31, 0.0  ;;  %v6669_v46 = vstv %s3738_s1  ;;  %s6676_s1 = sld [smem:[#allocation43_spill]] }
 0x140   :  { %v394_v11 = vmul.f32 %v6667_v43, %v391_v56  ;;  %v416_v52 = vmul.f32 %v6668_v42, %v413_v49  ;;  %v498_v15 = vadd.f32 %v6669_v46, %v494_v4  ;;  %v6670_v20 = vstv %s6658_s4  ;;  %s4272_s4 = sld [smem:[#allocation10 + $0x1]] }
 0x141   :  { %v520_v35 = vadd.f32 %v6670_v20, %v516_v1  ;;  %v615_v8 = vadd.f32 %v613_v24, %v593_v28  ;;  %v6672_v21 = vstv %s6660_s15  ;;  %v6673_v25 = vstv %s6661_s17  ;;  %v103_v46 = vld [vmem:[%s6687_s14 + $0x18] sm:$0xff]  ;;  %s4274_s15 = sld [smem:[#allocation2 + $0x10]] }
 0x142   :  { %v396_v54 = vadd.f32 %v394_v11, %v374_v34  ;;  %v532_v22 = vmul.f32 %v6672_v21, %v3923_v5  ;;  %v554_v2 = vmul.f32 %v6673_v25, %v3923_v5  ;;  %v6674_v39 = vstv %s6663_s25  ;;  %3305 = vmatpush3.msra.mxu1 %v103_v46  ;;  %s4276_s17 = sld [smem:[#allocation5 + $0x10]] }
 0x143   :  { %v438_v17 = vmul.f32 %v6674_v39, %v435_v12  ;;  %v479_v6 = vmax.f32 %v476_v9, 0.0  ;;  %v6675_v32 = vstv %s6666_s16  ;;  %v598_v33 = vmul.f32 %v596_v3, %v3923_v5  ;;  %s4278_s25 = sld [smem:[#allocation7 + $0x10]] }
 0x144   :  { %v576_v23 = vmul.f32 %v6675_v32, %v3923_v5  ;;  %v618_v26 = vsel %vm617_vm2, %v615_v8, -inf  ;;  %v418_v51 = vadd.f32 %v416_v52, %v396_v54  ;;  %v538_v37 = vadd.f32 %v3909_v58, %v532_v22  ;;  %s4280_s16 = sld [smem:[#allocation8 + $0x10]] }
 0x145   :  { %v560_v59 = vadd.f32 %v3919_v60, %v554_v2  ;;  %619 = vmax.xlane.f32.xlu0 %v618_v26  ;;  %v501_v56 = vmax.f32 %v498_v15, 0.0  ;;  %v6678_v19 = vstv %s6612_s6  ;;  %v6679_v40 = vstv %s6671_s11  ;;  %s4282_s11 = sld [smem:[#allocation2 + $0x11]] }
 0x146   :  { %v440_v38 = vadd.f32 %v438_v17, %v418_v51  ;;  %v460_v36 = vmul.f32 %v6678_v19, %v457_v62  ;;  %v542_v41 = vadd.f32 %v6679_v40, %v538_v37  ;;  %v582_v5 = vadd.f32 %v580_v10, %v576_v23  ;;  %v100_v62 = vld [vmem:[%s6687_s14] sm:$0xff]  ;;  %v2986_v17 = vld [vmem:[%s6690_s10 + $0x10] sm:$0xff]  ;;  %6691 = sst [smem:[#allocation29_spill]] %s4272_s4 }
 0x147   :  { %v523_v3 = vmax.f32 %v520_v35, 0.0  ;;  %v6680_v47 = vstv %s6622_s22  ;;  %v6681_v58 = vstv %s6676_s1  ;;  %v604_v61 = vadd.f32 %v602_v30, %v598_v33  ;;  %v2987_v33 = vld [vmem:[%s6690_s10 + $0x18] sm:$0xff]  ;;  %s4284_s1 = sld [smem:[#allocation5 + $0x11]] }
 0x148   :  { %v462_v45 = vadd.f32 %v460_v36, %v440_v38  ;;  %v482_v57 = vmul.f32 %v6680_v47, %v479_v6  ;;  %v564_v63 = vadd.f32 %v6681_v58, %v560_v59  ;;  %v6682_v48 = vstv %s6631_s24  ;;  %s6689_s24 = sld [smem:[#allocation58_spill]] }
 0x149   :  { %v504_v31 = vmul.f32 %v6682_v48, %v501_v56  ;;  %v545_v4 = vmax.f32 %v542_v41, 0.0  ;;  %v586_v1 = vadd.f32 %v584_v14, %v582_v5  ;;  %v6683_v13 = vstv %s6633_s19  ;;  %6692 = sst [smem:[#allocation24_spill]] %s4278_s25 }
 0x14a   :  { %v484_v60 = vadd.f32 %v482_v57, %v462_v45  ;;  %v526_v18 = vmul.f32 %v6683_v13, %v523_v3  ;;  %v567_v53 = vmax.f32 %v564_v63, 0.0  ;;  %v608_v49 = vadd.f32 %v606_v0, %v604_v61  ;;  %v101_v0 = vld [vmem:[%s6687_s14 + $0x8] sm:$0xff]  ;;  %6693 = sst [smem:[#allocation27_spill]] %s4280_s16 }
 0x14b   :  { %v6684_v50 = vstv %s6634_s21  ;;  %v589_v27 = vmax.f32 %v586_v1, 0.0  ;;  %v6685_v44 = vstv %s6635_s13  ;;  %v6686_v34 = vstv %s6647_s20  ;;  %3298 = vmatpush3.msra.mxu0 %v101_v0  ;;  %6694 = sst [smem:[#allocation30_spill]] %s4282_s11 }
 0x14c   :  { %v506_v16 = vadd.f32 %v504_v31, %v484_v60  ;;  %v548_v9 = vmul.f32 %v6684_v50, %v545_v4  ;;  %v570_v30 = vmul.f32 %v6685_v44, %v567_v53  ;;  %v611_v28 = vmax.f32 %v608_v49, 0.0  ;;  %s4286_s8 = sld [smem:[#allocation7 + $0x11]] }
 0x14d   :  { %v592_v43 = vmul.f32 %v6686_v34, %v589_v27  ;;  %v6688_v15 = vmov 0.0   ;;  %s4290_s22 = sld [smem:[#allocation2 + $0x12]]  ;;  %v964_v26 = vstv %s4276_s17  ;;  %v986_v51 = vstv %s4284_s1 }
 0x14e   :  { %v528_v12 = vadd.f32 %v526_v18, %v506_v16  ;;  %v614_v14 = vmul.f32 %v612_v55, %v611_v28  ;;  %v102_v55 = vld [vmem:[%s6687_s14 + $0x10] sm:$0xff]  ;;  %3299 = vmatprep.subr.mxu0 %v6688_v15  ;;  %3306 = vmatprep.subr.mxu1 %v6688_v15  ;;  %v2989_v21 = vld [vmem:[%s6689_s24 + $0x28] sm:$0xff]  ;;  %v2991_v6 = vld [vmem:[%s6689_s24 + $0x38] sm:$0xff]  ;;  %s4292_s30 = sld [smem:[#allocation5 + $0x12]]  ;;  %v6321_v59 = vstv %s4274_s15  ;;  %v4372_v38 = vmul.f32 %v964_v26, %v3735_v7 }
 0x14f   :  { %3300 = vmatpush3.msra.mxu0 %v100_v62  ;;  %3307 = vmatpush3.msra.mxu1 %v102_v55  ;;  %v2990_v23 = vld [vmem:[%s6689_s24 + $0x30] sm:$0xff]  ;;  %s4294_s6 = sld [smem:[#allocation7 + $0x12]]  ;;  %v970_v19 = vstv %s4278_s25  ;;  %v976_v36 = vstv %s4280_s16  ;;  %v6322_v40 = vstv %s4282_s11  ;;  %v4380_v41 = vmul.f32 %v986_v51, %v3735_v7 }
 0x150   :  { %v550_v10 = vadd.f32 %v548_v9, %v528_v12  ;;  %3311 = vmatprep.subr.mxu0 %v6688_v15  ;;  %3318 = vmatprep.subr.mxu1 %v6688_v15  ;;  %s4308_s19 = sld [smem:[#allocation5 + $0x14]]  ;;  %v998_v3 = vstv %s4288_s0  ;;  %v1030_v45 = vstv %s4300_s2  ;;  %v6343_v63 = vstv %s4296_s26 }
 0x151   :  { %s4310_s21 = sld [smem:[#allocation7 + $0x14]]  ;;  %v6324_v61 = vstv %s4298_s9  ;;  %v4400_v48 = vmul.f32 %v964_v26, %v3785_v29  ;;  %v4403_v31 = vmul.f32 %v986_v51, %v3785_v29  ;;  %v4406_v4 = vmul.f32 %v1030_v45, %v3735_v7 }
 0x152   :  { %v572_v24 = vadd.f32 %v570_v30, %v550_v10  ;;  %6695 = sst [smem:[#allocation33_spill]] %s4286_s8  ;;  %v992_v5 = vstv %s4286_s8  ;;  %v1036_v1 = vstv %s4302_s5  ;;  %v1074_v16 = vstv %s4316_s3 }
 0x153   :  { %6697 = sst [smem:[#allocation23_spill]] %s4290_s22  ;;  %v6323_v47 = vstv %s4290_s22  ;;  %v6342_v18 = vstv %s4304_s7  ;;  %v6325_v53 = vstv %s4306_s12  ;;  %v4421_v12 = vmul.f32 %v1030_v45, %v3785_v29 }
 0x154   :  { %v594_v11 = vadd.f32 %v592_v43, %v572_v24  ;;  %s4312_s13 = sld [smem:[#allocation8 + $0x14]]  ;;  %v1008_v56 = vstv %s4292_s30  ;;  %v4435_v30 = vmul.f32 %v1074_v16, %v3735_v7 }
 0x155   :  { %6698 = sst [smem:[#allocation25_spill]] %s4294_s6  ;;  %v4389_v57 = vmul.f32 %v1008_v56, %v3735_v7  ;;  %v1014_v58 = vstv %s4294_s6  ;;  %v4413_v13 = vmul.f32 %v1008_v56, %v3785_v29 }
 0x156   :  { %v616_v42 = vadd.f32 %v614_v14, %v594_v11  ;;  %6707 = sst [smem:[#allocation32_spill]] %s4318_s18  ;;  %v1052_v60 = vstv %s4308_s19  ;;  %v4449_v14 = vmul.f32 %v1074_v16, %v3785_v29 }
 0x157   :  { %6704 = sst [smem:[#allocation45_spill]] %s4310_s21  ;;  %v4424_v50 = vmul.f32 %v1052_v60, %v3735_v7  ;;  %v1058_v9 = vstv %s4310_s21  ;;  %v4431_v10 = vmul.f32 %v1052_v60, %v3785_v29 }
 0x158   :  { %v621_v52 = vsel %vm617_vm2, %v616_v42, -inf  ;;  %s4320_s20 = sld [smem:[#allocation8 + $0x15]] }
 0x159   :  { %622 = vmax.xlane.f32.xlu0 %v621_v52  ;;  %6709 = sst [smem:[#allocation18_spill]] %s4322_s23 }
 0x15a   :  { %6705 = sst [smem:[#allocation16_spill]] %s4312_s13 }
 0x15b   :  { %s4324_s27 = sld [smem:[#allocation5 + $0x16]] }
 0x15c   :  { %s4326_s29 = sld [smem:[#allocation7 + $0x16]] }
 0x15d   :  { %s4328_s10 = sld [smem:[#allocation8 + $0x16]] }
 0x15e   :  { %6708 = sst [smem:[#allocation48_spill]] %s4320_s20 }
 0x15f   :  { %s4332_s14 = sld [smem:[#allocation5 + $0x17]] }
 0x160   :  { %s4334_s28 = sld [smem:[#allocation7 + $0x17]] }
 0x161   :  { %s4336_s13 = sld [smem:[#allocation8 + $0x17]]  ;;  %v1096_v49 = vstv %s4324_s27 }
 0x162   :  { %6710 = sst [smem:[#allocation19_spill]] %s4326_s29  ;;  %v4444_v11 = vmul.f32 %v1096_v49, %v3735_v7  ;;  %v4457_v62 = vmul.f32 %v1096_v49, %v3785_v29 }
 0x163   :  { %6711 = sst [smem:[#allocation49_spill]] %s4328_s10 }
 0x164   :  { %s4338_s20 = sld [smem:[#allocation2 + $0x18]] }
 0x165   :  { %6713 = sst [smem:[#allocation53_spill]] %s4332_s14 }
 0x166   :  { %6714 = sst [smem:[#allocation46_spill]] %s4334_s28 }
 0x167   :  { %6715 = sst [smem:[#allocation35_spill]] %s4336_s13 }
 0x168   :  { %s4340_s23 = sld [smem:[#allocation5 + $0x18]] }
 0x169   :  { %s4342_s29 = sld [smem:[#allocation7 + $0x18]] }
 0x16a   :  { %6716 = sst [smem:[#allocation38_spill]] %s4338_s20 }
 0x16b   :  { %s4344_s10 = sld [smem:[#allocation8 + $0x18]] }
 0x16c   :  { %s4346_s18 = sld [smem:[#allocation2 + $0x19]] }
 0x16d   :  { %s4350_s28 = sld [smem:[#allocation7 + $0x19]] }
 0x16e   :  { %6717 = sst [smem:[#allocation36_spill]] %s4340_s23 }
 0x16f   :  { %s4352_s13 = sld [smem:[#allocation8 + $0x19]] }
 0x170   :  { %s4354_s20 = sld [smem:[#allocation2 + $0x1a]] }
 0x171   :  { %6718 = sst [smem:[#allocation40_spill]] %s4344_s10 }
 0x172   :  { %6719 = sst [smem:[#allocation26_spill]] %s4346_s18 }
 0x173   :  { %s4356_s14 = sld [smem:[#allocation5 + $0x1a]] }
 0x174   :  { %s4358_s23 = sld [smem:[#allocation7 + $0x1a]] }
 0x175   :  { %6720 = sst [smem:[#allocation44_spill]] %s4352_s13 }
 0x176   :  { %6721 = sst [smem:[#allocation42_spill]] %s4354_s20 }
 0x177   :  { %s4361_s18 = sld [smem:[#allocation8 + $0x1a]] }
 0x178   :  { %s4364_s10 = sld [smem:[#allocation2 + $0x1b]] }
 0x179   :  { %s4369_s20 = sld [smem:[#allocation5 + $0x1b]] }
 0x17a   :  { %s4377_s17 = sld [smem:[#allocation7 + $0x1b]] }
 0x17b   :  { %s4385_s1 = sld [smem:[#allocation8 + $0x1b]] }
 0x17c   :  { %s4393_s30 = sld [smem:[#allocation2 + $0x1c]] }
 0x17d   :  { %6722 = sst [smem:[#allocation55_spill]] %s4361_s18 }
 0x17e   :  { %s4397_s16 = sld [smem:[#allocation5 + $0x1c]] }
 0x17f   :  { %s6727_s2 = sld [smem:[#allocation20_spill]]  ;;  %v1206_v56 = vstv %s4369_s20 }
 0x180   :  { %6723 = sst [smem:[#allocation50_spill]] %s4377_s17 }
 0x181   :  { %6724 = sst [smem:[#allocation52_spill]] %s4385_s1 }
 0x182   :  { %6725 = sst [smem:[#allocation54_spill]] %s4393_s30 }
 0x183   :  { %s6728_s26 = sld [smem:[#allocation32_spill]] }
 0x184   :  { %s6729_s0 = sld [smem:[#allocation53_spill]] }
 0x185   :  { %s4410_s6 = sld [smem:[#allocation7 + $0x1c]]  ;;  %v6326_v44 = vstv %s6727_s2 }
 0x186   :  { %s6732_s8 = sld [smem:[#allocation18_spill]] }
 0x187   :  { %s4418_s25 = sld [smem:[#allocation8 + $0x1c]] }
 0x188   :  { %s6734_s5 = sld [smem:[#allocation19_spill]] }
 0x189   :  { %s6736_s9 = sld [smem:[#allocation36_spill]]  ;;  %v1080_v28 = vstv %s6728_s26 }
 0x18a   :  { %s4428_s22 = sld [smem:[#allocation2 + $0x1d]]  ;;  %v1118_v24 = vstv %s6729_s0 }
 0x18b   :  { %6730 = sst [smem:[#allocation41_spill]] %s4410_s6  ;;  %v4461_v55 = vmul.f32 %v1118_v24, %v3735_v7 }
 0x18c   :  { %s6739_s27 = sld [smem:[#allocation46_spill]]  ;;  %v6327_v43 = vstv %s6732_s8 }
 0x18d   :  { %6733 = sst [smem:[#allocation47_spill]] %s4418_s25 }
 0x18e   :  { %s4439_s12 = sld [smem:[#allocation5 + $0x1d]] }
 0x18f   :  { %s6741_s21 = sld [smem:[#allocation38_spill]]  ;;  %v1140_v0 = vstv %s6736_s9 }
 0x190   :  { %6737 = sst [smem:[#allocation39_spill]] %s4428_s22 }
 0x191   :  { %s4446_s4 = sld [smem:[#allocation7 + $0x1d]] }
 0x192   :  { %s4454_s26 = sld [smem:[#allocation5 + $0x1e]] }
 0x193   :  { %s6745_s19 = sld [smem:[#allocation26_spill]] }
 0x194   :  { %s4465_s8 = sld [smem:[#allocation8 + $0x1d]]  ;;  %v1250_v27 = vstv %s4439_s12 }
 0x195   :  { %s6747_s9 = sld [smem:[#allocation42_spill]]  ;;  %v4537_v34 = vmul.f32 %v1250_v27, %v3785_v29 }
 0x196   :  { %s4470_s3 = sld [smem:[#allocation2 + $0x1e]] }
 0x197   :  { %6742 = sst [smem:[#allocation43_spill]] %s4446_s4 }
 0x198   :  { %6744 = sst [smem:[#allocation17_spill]] %s4454_s26 }
 0x199   :  { %s6752_s12 = sld [smem:[#allocation23_spill]] }
 0x19a   :  { %6746 = sst [smem:[#allocation53_spill]] %s4465_s8 }
 0x19b   :  { %s6753_s20 = sld [smem:[#allocation21_spill]] }
 0x19c   :  { %6748 = sst [smem:[#allocation36_spill]] %s4470_s3 }
 0x19d   :  { %s6754_s1 = sld [smem:[#allocation37_spill]] }
 0x19e   :  { %s4534_s18 = sld [smem:[#allocation8 + $0x1e]] }
 0x19f   :  { %s6757_s11 = sld [smem:[#allocation60_spill]] }
 0x1a0   :  { %s4553_s4 = sld [smem:[#allocation2 + $0x1f]] }
 0x1a1   :  { %s6766_s2 = sld [smem:[#allocation28_spill]] }
 0x1a2   :  { %s6768_s25 = sld [smem:[#allocation29_spill]] }
 0x1a3   :  { %s6788_s8 = sld [smem:[#allocation40_spill]] }
 0x1a4   :  { %6755 = sst [smem:[#allocation42_spill]] %s4534_s18 }
 0x1a5   :  { %v4546_v60 = vld [vmem:[%s6757_s11] sm:$0xff]  ;;  %s6777_s18 = sld [smem:[#allocation43_spill]] }
 0x1a6   :  { %s6817_s11 = sld [smem:[#allocation34_spill]] }
 0x1a7   :  { %s6825_s13 = sld [smem:[#allocation42_spill]] }
 0x1a8   :  { %s4932_s0 = sld [smem:[#allocation8 + $0x22]] }
 0x1ae   :  { %6877 = sst [smem:[#allocation28_spill]] %s4932_s0 }
 0x1ce   :  { %v620_v20 = vpop.xlane.xlu0 %619 }
 0x1cf   :  { %v624_v35 = vsub.f32 %v615_v8, %v620_v20  ;;  %v2988_v8 = vld [vmem:[%s6689_s24 + $0x20] sm:$0xff]  ;;  %s4330_s24 = sld [smem:[#allocation2 + $0x17]]  ;;  %v6336_v20 = vstv %s6739_s27 }
 0x1d0   :  { %s4614_s27 = sld [smem:[#allocation7 + $0x1f]] }
 0x1d1   :  { %v626_v54 = vmul.f32 1.442695, %v624_v35 }
 0x1d3   :  { %3407 = vpow2.f32 %v626_v54  ;;  %v1228_v54 = vstv %s4397_s16  ;;  %s4524_s16 = sld [smem:[#allocation7 + $0x1e]] }
 0x1d4   :  { %v4527_v51 = vmul.f32 %v1228_v54, %v3785_v29 }
 0x1d5   :  { %6712 = sst [smem:[#allocation51_spill]] %s4330_s24 }
 0x1d6   :  { %s4348_s24 = sld [smem:[#allocation5 + $0x19]] }
 0x1d7   :  { %s6738_s7 = sld [smem:[#allocation51_spill]] }
 0x1d9   :  { %6751 = sst [smem:[#allocation26_spill]] %s4524_s16 }
 0x1dc   :  { %v1162_v35 = vstv %s4348_s24  ;;  %s4482_s24 = sld [smem:[#allocation5 + $0x1f]] }
 0x1dd   :  { %v6328_v46 = vstv %s6738_s7  ;;  %v4489_v26 = vmul.f32 %v1162_v35, %v3735_v7  ;;  %s6823_s7 = sld [smem:[#allocation46_spill]] }
 0x1e0   :  { %v4231_v22 = vpop.eup %3407 }
 0x1e1   :  { %3302 = vmatmul.mubr.msk.f32.vlgmr.msra.gmra.mxu0 %vm617_vm2, %v4231_v22 }
 0x1e2   :  { %v623_v25 = vpop.xlane.xlu0 %622  ;;  %3312 = vmatpush3.xpose.msk.msra.mxu0 %vm104_vm0, %v2989_v21  ;;  %3315 = vmatprep.mubr.msk.f32.mxu0 %vm3537_vm1, %v6688_v15  ;;  %6749 = sst [smem:[#allocation38_spill]] %s4482_s24 }
 0x1e3   :  { %v625_v2 = vsub.f32 %v616_v42, %v623_v25  ;;  %3313 = vmatprep.subr.mxu0 %v6688_v15  ;;  %v6338_v42 = vstv %s6734_s5  ;;  %v1184_v25 = vstv %s4356_s14  ;;  %s6778_s5 = sld [smem:[#allocation16_spill]] }
 0x1e4   :  { %v4496_v49 = vmul.f32 %v1184_v25, %v3735_v7  ;;  %v4505_v52 = vmul.f32 %v1184_v25, %v3785_v29  ;;  %s4910_s14 = sld [smem:[#allocation2 + $0x20]] }
 0x1e5   :  { %v628_v39 = vmul.f32 1.442695, %v625_v2  ;;  %v4473_v2 = vmul.f32 %v1118_v24, %v3785_v29  ;;  %v4499_v24 = vmul.f32 %v1162_v35, %v3785_v29  ;;  %v6319_v35 = vstv %s4454_s26  ;;  %s6821_s26 = sld [smem:[#allocation19_spill]] }
 0x1e6   :  { %3314 = vmatpush3.xpose.msk.msra.mxu0 %vm104_vm0, %v2988_v8 }
 0x1e7   :  { %3409 = vpow2.f32 %v628_v39  ;;  %3325 = vmatprep.subr.mxu0 %v6688_v15  ;;  %v4478_v39 = vmul.f32 %v1140_v0, %v3735_v7 }
 0x1e9   :  { %3316 = vmatmul.mubr.msk.f32.vlgmr.msra.gmra.mxu0 %vm104_vm0, %v2986_v17  ;;  %v4531_v17 = vmul.f32 %v1250_v27, %v3735_v7 }
 0x1ea   :  { %3329 = vmatprep.mubr.msk.f32.mxu0 %vm3537_vm1, %v6688_v15  ;;  %6869 = sst [smem:[#allocation21_spill]] %s4910_s14 }
 0x1f4   :  { %v4253_v32 = vpop.eup %3409 }
 0x1f5   :  { %3309 = vmatmul.mubr.msk.f32.vlgmr.msra.gmra.mxu1 %vm617_vm2, %v4253_v32 }
 0x1f6   :  { %3319 = vmatpush3.xpose.msk.msra.mxu1 %vm104_vm0, %v2991_v6  ;;  %3322 = vmatprep.mubr.msk.f32.mxu1 %vm3537_vm1, %v6688_v15  ;;  %v4517_v6 = vmul.f32 %v1206_v56, %v3785_v29 }
 0x1f7   :  { %3320 = vmatprep.subr.mxu1 %v6688_v15 }
 0x1fa   :  { %3321 = vmatpush3.xpose.msk.msra.mxu1 %vm104_vm0, %v2990_v23  ;;  %v4485_v23 = vmul.f32 %v1140_v0, %v3785_v29  ;;  %v4520_v0 = vmul.f32 %v1228_v54, %v3735_v7 }
 0x1fb   :  { %3332 = vmatprep.subr.mxu1 %v6688_v15 }
 0x1fd   :  { %3323 = vmatmul.mubr.msk.f32.vlgmr.msra.gmra.mxu1 %vm104_vm0, %v2987_v33 }
 0x1fe   :  { %3336 = vmatprep.mubr.msk.f32.mxu1 %vm3537_vm1, %v6688_v15 }
 0x2a1   :  { %v4475_v8 = vpop.f32.mrf.mxu0 }
 0x2a3   :  { %v3303_v45 = vpop.f32.mrf.mxu0 }
 0x2a4   :  { %v4509_v45 = vmul.f32 %v1206_v56, %v3735_v7  ;;  %v4551_v7 = vmul.f32 %v4546_v60, %v6319_v35  ;;  %v6333_v56 = vstv %s4482_s24  ;;  %s4622_s24 = sld [smem:[#allocation8 + $0x1f]] }
 0x2a9   :  { %v4539_v25 = vpop.f32.mrf.mxu0 }
 0x2aa   :  { %v961_v29 = vmul.f32 %v6321_v59, %v4539_v25  ;;  %v983_v27 = vmul.f32 %v6322_v40, %v4539_v25  ;;  %v1005_v16 = vmul.f32 %v6323_v47, %v4539_v25  ;;  %v1027_v54 = vmul.f32 %v6324_v61, %v4539_v25 }
 0x2ab   :  { %v3317_v35 = vpop.f32.mrf.mxu0  ;;  %v1049_v33 = vmul.f32 %v6325_v53, %v4539_v25  ;;  %v1071_v59 = vmul.f32 %v6326_v44, %v4539_v25  ;;  %v1093_v40 = vmul.f32 %v6327_v43, %v4539_v25  ;;  %v1115_v47 = vmul.f32 %v6328_v46, %v4539_v25 }
 0x2ac   :  { %v967_v61 = vadd.f32 %v4372_v38, %v961_v29  ;;  %v989_v35 = vadd.f32 %v4380_v41, %v983_v27  ;;  %v1011_v21 = vadd.f32 %v4389_v57, %v1005_v16  ;;  %v1033_v53 = vadd.f32 %v4406_v4, %v1027_v54 }
 0x2ad   :  { %v1055_v37 = vadd.f32 %v4424_v50, %v1049_v33  ;;  %v1077_v44 = vadd.f32 %v4435_v30, %v1071_v59  ;;  %v1099_v43 = vadd.f32 %v4444_v11, %v1093_v40  ;;  %v1121_v46 = vadd.f32 %v4461_v55, %v1115_v47 }
 0x2ae   :  { %v971_v38 = vadd.f32 %v970_v19, %v967_v61  ;;  %v993_v41 = vadd.f32 %v992_v5, %v989_v35  ;;  %v1015_v57 = vadd.f32 %v1014_v58, %v1011_v21  ;;  %v1037_v4 = vadd.f32 %v1036_v1, %v1033_v53 }
 0x2af   :  { %v1059_v50 = vadd.f32 %v1058_v9, %v1055_v37  ;;  %v1081_v59 = vadd.f32 %v1080_v28, %v1077_v44  ;;  %v1103_v40 = vadd.f32 %v6338_v42, %v1099_v43  ;;  %v1125_v47 = vadd.f32 %v6336_v20, %v1121_v46 }
 0x2b0   :  { %v974_v30 = vmax.f32 %v971_v38, 0.0  ;;  %v996_v61 = vmax.f32 %v993_v41, 0.0  ;;  %v1018_v11 = vmax.f32 %v1015_v57, 0.0  ;;  %v1040_v55 = vmax.f32 %v1037_v4, 0.0 }
 0x2b1   :  { %v1278_v21 = vstv %s4524_s16  ;;  %v1290_v37 = vstv %s4553_s4  ;;  %v4610_v44 = vmul.f32 %v4546_v60, %v6333_v56  ;;  %v1062_v46 = vmax.f32 %v1059_v50, 0.0  ;;  %s6794_s16 = sld [smem:[#allocation20_spill]] }
 0x2b2   :  { %v977_v43 = vmul.f32 %v976_v36, %v974_v30  ;;  %v1084_v33 = vmax.f32 %v1081_v59, 0.0  ;;  %v1106_v16 = vmax.f32 %v1103_v40, 0.0  ;;  %v999_v54 = vmul.f32 %v998_v3, %v996_v61  ;;  %s4922_s4 = sld [smem:[#allocation7 + $0x21]] }
 0x2b3   :  { %v1021_v29 = vmul.f32 %v6343_v63, %v1018_v11  ;;  %v1043_v27 = vmul.f32 %v6342_v18, %v1040_v55  ;;  %v1128_v35 = vmax.f32 %v1125_v47, 0.0  ;;  %v6769_v38 = vstv %s6768_s25 }
 0x2b4   :  { %v979_v41 = vadd.f32 %v977_v43, %v6769_v38  ;;  %v6770_v57 = vstv %s6741_s21  ;;  %v6771_v50 = vstv %s6745_s19  ;;  %v6772_v40 = vstv %s6747_s9 }
 0x2b5   :  { %v1137_v4 = vmul.f32 %v6770_v57, %v4539_v25  ;;  %v1159_v59 = vmul.f32 %v6771_v50, %v4539_v25  ;;  %v1181_v30 = vmul.f32 %v6772_v40, %v4539_v25  ;;  %v4635_v61 = vpop.f32.mrf.mxu1  ;;  %v6773_v11 = vstv %s4364_s10 }
 0x2b6   :  { %v1203_v47 = vmul.f32 %v6773_v11, %v4539_v25  ;;  %v6774_v55 = vstv %s4393_s30  ;;  %v6775_v38 = vstv %s4428_s22  ;;  %v6776_v50 = vstv %s4470_s3  ;;  %s6779_s22 = sld [smem:[#allocation48_spill]] }
 0x2b7   :  { %v1225_v43 = vmul.f32 %v6774_v55, %v4539_v25  ;;  %v1247_v57 = vmul.f32 %v6775_v38, %v4539_v25  ;;  %v1269_v56 = vmul.f32 %v6776_v50, %v4539_v25  ;;  %v1001_v40 = vadd.f32 %v999_v54, %v979_v41  ;;  %v3310_v42 = vpop.f32.mrf.mxu1  ;;  %s6780_s3 = sld [smem:[#allocation49_spill]] }
 0x2b8   :  { %v1143_v53 = vadd.f32 %v4478_v39, %v1137_v4  ;;  %v1165_v20 = vadd.f32 %v4489_v26, %v1159_v59  ;;  %v1187_v11 = vadd.f32 %v4496_v49, %v1181_v30  ;;  %v1209_v55 = vadd.f32 %v4509_v45, %v1203_v47  ;;  %s6781_s30 = sld [smem:[#allocation35_spill]] }
 0x2b9   :  { %v1231_v38 = vadd.f32 %v4520_v0, %v1225_v43  ;;  %v1253_v50 = vadd.f32 %v4531_v17, %v1247_v57  ;;  %v1275_v54 = vadd.f32 %v4551_v7, %v1269_v56  ;;  %v1023_v39 = vadd.f32 %v1021_v29, %v1001_v40  ;;  %6873 = sst [smem:[#allocation45_spill]] %s4922_s4 }
 0x2ba   :  { %v6782_v41 = vstv %s4342_s29  ;;  %v6783_v4 = vstv %s4350_s28  ;;  %v6784_v49 = vstv %s4358_s23  ;;  %v6785_v30 = vstv %s4377_s17  ;;  %s6792_s17 = sld [smem:[#allocation30_spill]] }
 0x2bb   :  { %v1147_v26 = vadd.f32 %v6782_v41, %v1143_v53  ;;  %v1169_v59 = vadd.f32 %v6783_v4, %v1165_v20  ;;  %v1191_v42 = vadd.f32 %v6784_v49, %v1187_v11  ;;  %v1213_v18 = vadd.f32 %v6785_v30, %v1209_v55 }
 0x2bc   :  { %v6786_v45 = vstv %s4410_s6  ;;  %v6787_v63 = vstv %s6777_s18  ;;  %v4670_v17 = vadd.f32 %v1278_v21, %v1275_v54  ;;  %v1045_v43 = vadd.f32 %v1043_v27, %v1023_v39  ;;  %s6811_s18 = sld [smem:[#allocation18_spill]] }
 0x2bd   :  { %v1235_v47 = vadd.f32 %v6786_v45, %v1231_v38  ;;  %v1257_v0 = vadd.f32 %v6787_v63, %v1253_v50  ;;  %v6789_v56 = vstv %s6778_s5  ;;  %v1150_v29 = vmax.f32 %v1147_v26, 0.0  ;;  %v4682_v54 = vpop.f32.mrf.mxu1  ;;  %s6813_s6 = sld [smem:[#allocation51_spill]] }
 0x2be   :  { %v1065_v7 = vmul.f32 %v6789_v56, %v1062_v46  ;;  %v1300_v53 = vstv %s4614_s27  ;;  %v6790_v57 = vstv %s6779_s22  ;;  %v6791_v40 = vstv %s6780_s3  ;;  %s4928_s27 = sld [smem:[#allocation5 + $0x22]] }
 0x2bf   :  { %v1087_v20 = vmul.f32 %v6790_v57, %v1084_v33  ;;  %v1109_v11 = vmul.f32 %v6791_v40, %v1106_v16  ;;  %v6793_v55 = vstv %s6781_s30  ;;  %v1306_v41 = vstv %s4622_s24  ;;  %s4934_s24 = sld [smem:[#allocation2 + $0x23]] }
 0x2c0   :  { %v1131_v38 = vmul.f32 %v6793_v55, %v1128_v35  ;;  %v1067_v63 = vadd.f32 %v1065_v7, %v1045_v43  ;;  %v1172_v50 = vmax.f32 %v1169_v59, 0.0  ;;  %v1194_v27 = vmax.f32 %v1191_v42, 0.0 }
 0x2c1   :  { %v1216_v46 = vmax.f32 %v1213_v18, 0.0  ;;  %v6795_v39 = vstv %s6788_s8  ;;  %v1238_v4 = vmax.f32 %v1235_v47, 0.0  ;;  %v1260_v33 = vmax.f32 %v1257_v0, 0.0  ;;  %v3324_v18 = vpop.f32.mrf.mxu1  ;;  %s6802_s8 = sld [smem:[#allocation44_spill]] }
 0x2c2   :  { %v1153_v26 = vmul.f32 %v6795_v39, %v1150_v29  ;;  %v1282_v49 = vmax.f32 %v4670_v17, 0.0  ;;  %v1089_v16 = vadd.f32 %v1087_v20, %v1067_v63  ;;  %v1291_v35 = vmul.f32 %v1290_v37, %v4539_v25 }
 0x2c3   :  { %v6796_v30 = vstv %s4274_s15  ;;  %v6797_v59 = vstv %s6792_s17  ;;  %v6799_v43 = vstv %s6752_s12  ;;  %v6801_v0 = vstv %s6753_s20  ;;  %s6805_s15 = sld [smem:[#allocation55_spill]] }
 0x2c4   :  { %v962_v45 = vmul.f32 %v6796_v30, %v4682_v54  ;;  %v984_v42 = vmul.f32 %v6797_v59, %v4682_v54  ;;  %v1006_v47 = vmul.f32 %v6799_v43, %v4682_v54  ;;  %v1028_v17 = vmul.f32 %v6801_v0, %v4682_v54  ;;  %s6806_s17 = sld [smem:[#allocation52_spill]] }
 0x2c5   :  { %v6803_v56 = vstv %s6754_s1  ;;  %v6804_v7 = vstv %s6794_s16  ;;  %v1111_v57 = vadd.f32 %v1109_v11, %v1089_v16  ;;  %v1297_v20 = vadd.f32 %v4610_v44, %v1291_v35  ;;  %s6807_s1 = sld [smem:[#allocation47_spill]] }
 0x2c6   :  { %v1050_v25 = vmul.f32 %v6803_v56, %v4682_v54  ;;  %v1072_v29 = vmul.f32 %v6804_v7, %v4682_v54  ;;  %v968_v40 = vadd.f32 %v4400_v48, %v962_v45  ;;  %v990_v55 = vadd.f32 %v4403_v31, %v984_v42  ;;  %s6808_s16 = sld [smem:[#allocation53_spill]] }
 0x2c7   :  { %v1012_v63 = vadd.f32 %v4413_v13, %v1006_v47  ;;  %v1034_v39 = vadd.f32 %v4421_v12, %v1028_v17  ;;  %v1133_v18 = vadd.f32 %v1131_v38, %v1111_v57  ;;  %v1301_v11 = vadd.f32 %v1300_v53, %v1297_v20  ;;  %s6840_s12 = sld [smem:[#allocation60_spill]] }
 0x2c8   :  { %v1056_v30 = vadd.f32 %v4431_v10, %v1050_v25  ;;  %v1078_v59 = vadd.f32 %v4449_v14, %v1072_v29  ;;  %v972_v44 = vadd.f32 %v970_v19, %v968_v40  ;;  %v994_v48 = vadd.f32 %v992_v5, %v990_v55  ;;  %s6843_s20 = sld [smem:[#allocation36_spill]] }
 0x2c9   :  { %v6809_v31 = vstv %s6802_s8  ;;  %v1016_v12 = vadd.f32 %v1014_v58, %v1012_v63  ;;  %v1038_v10 = vadd.f32 %v1036_v1, %v1034_v39  ;;  %v1155_v14 = vadd.f32 %v1153_v26, %v1133_v18  ;;  %6878 = sst [smem:[#allocation29_spill]] %s4934_s24 }
 0x2ca   :  { %v1175_v13 = vmul.f32 %v6809_v31, %v1172_v50  ;;  %v1060_v16 = vadd.f32 %v1058_v9, %v1056_v30  ;;  %v6810_v38 = vstv %s6805_s15  ;;  %v975_v45 = vmax.f32 %v972_v44, 0.0 }
 0x2cb   :  { %v1197_v35 = vmul.f32 %v6810_v38, %v1194_v27  ;;  %v997_v19 = vmax.f32 %v994_v48, 0.0  ;;  %v6812_v42 = vstv %s6806_s17  ;;  %v6814_v43 = vstv %s6807_s1 }
 0x2cc   :  { %v1219_v5 = vmul.f32 %v6812_v42, %v1216_v46  ;;  %v1241_v50 = vmul.f32 %v6814_v43, %v1238_v4  ;;  %v6815_v47 = vstv %s6808_s16  ;;  %v1019_v1 = vmax.f32 %v1016_v12, 0.0 }
 0x2cd   :  { %v1263_v58 = vmul.f32 %v6815_v47, %v1260_v33  ;;  %v1177_v9 = vadd.f32 %v1175_v13, %v1155_v14  ;;  %v1304_v26 = vmax.f32 %v1301_v11, 0.0  ;;  %v978_v27 = vmul.f32 %v976_v36, %v975_v45 }
 0x2ce   :  { %v1082_v0 = vadd.f32 %v1080_v28, %v1078_v59  ;;  %v1000_v17 = vmul.f32 %v998_v3, %v997_v19  ;;  %v6816_v56 = vstv %s6766_s2  ;;  %v1041_v25 = vmax.f32 %v1038_v10, 0.0  ;;  %s6830_s2 = sld [smem:[#allocation38_spill]] }
 0x2cf   :  { %v1022_v46 = vmul.f32 %v6816_v56, %v1019_v1  ;;  %v1063_v7 = vmax.f32 %v1060_v16, 0.0  ;;  %v1199_v4 = vadd.f32 %v1197_v35, %v1177_v9  ;;  %v6818_v29 = vstv %s6768_s25  ;;  %s4930_s25 = sld [smem:[#allocation7 + $0x22]] }
 0x2d0   :  { %v980_v57 = vadd.f32 %v978_v27, %v6818_v29  ;;  %v6819_v33 = vstv %s6811_s18  ;;  %v6820_v40 = vstv %s6813_s6  ;;  %v6822_v36 = vstv %s6741_s21  ;;  %s6829_s21 = sld [smem:[#allocation17_spill]] }
 0x2d1   :  { %v1094_v20 = vmul.f32 %v6819_v33, %v4682_v54  ;;  %v1116_v55 = vmul.f32 %v6820_v40, %v4682_v54  ;;  %v1138_v28 = vmul.f32 %v6822_v36, %v4682_v54  ;;  %v6824_v3 = vstv %s6745_s19  ;;  %s6837_s19 = sld [smem:[#allocation54_spill]] }
 0x2d2   :  { %v1160_v63 = vmul.f32 %v6824_v3, %v4682_v54  ;;  %v6826_v39 = vstv %s6747_s9  ;;  %v6827_v59 = vstv %s4364_s10  ;;  %v1221_v11 = vadd.f32 %v1219_v5, %v1199_v4  ;;  %s6835_s10 = sld [smem:[#allocation50_spill]] }
 0x2d3   :  { %v1182_v30 = vmul.f32 %v6826_v39, %v4682_v54  ;;  %v1204_v18 = vmul.f32 %v6827_v59, %v4682_v54  ;;  %v1002_v44 = vadd.f32 %v1000_v17, %v980_v57  ;;  %v1100_v48 = vadd.f32 %v4457_v62, %v1094_v20  ;;  %s6839_s9 = sld [smem:[#allocation39_spill]] }
 0x2d4   :  { %v1122_v31 = vadd.f32 %v4473_v2, %v1116_v55  ;;  %v6828_v13 = vstv %s6817_s11  ;;  %v1085_v10 = vmax.f32 %v1082_v0, 0.0  ;;  %v1144_v16 = vadd.f32 %v4485_v23, %v1138_v28  ;;  %s4942_s18 = sld [smem:[#allocation2 + $0x24]] }
 0x2d5   :  { %v1044_v12 = vmul.f32 %v6828_v13, %v1041_v25  ;;  %v1166_v14 = vadd.f32 %v4499_v24, %v1160_v63  ;;  %v1243_v38 = vadd.f32 %v1241_v50, %v1221_v11  ;;  %v1024_v35 = vadd.f32 %v1022_v46, %v1002_v44  ;;  %v4788_v46 = vld [vmem:[%s6840_s12 + $0x8] sm:$0xff]  ;;  %6876 = sst [smem:[#allocation22_spill]] %s4930_s25 }
 0x2d6   :  { %v6831_v45 = vstv %s6821_s26  ;;  %v6832_v42 = vstv %s6823_s7  ;;  %v6833_v5 = vstv %s6825_s13  ;;  %v6834_v2 = vstv %s4342_s29  ;;  %s6867_s7 = sld [smem:[#allocation57_spill]] }
 0x2d7   :  { %v1104_v19 = vadd.f32 %v6831_v45, %v1100_v48  ;;  %v1126_v62 = vadd.f32 %v6832_v42, %v1122_v31  ;;  %v1285_v43 = vmul.f32 %v6833_v5, %v1282_v49  ;;  %v1148_v47 = vadd.f32 %v6834_v2, %v1144_v16  ;;  %s4908_s29 = sld [smem:[#allocation10 + $0x2]] }
 0x2d8   :  { %v1188_v1 = vadd.f32 %v4505_v52, %v1182_v30  ;;  %v1210_v23 = vadd.f32 %v4517_v6, %v1204_v18  ;;  %v1265_v24 = vadd.f32 %v1263_v58, %v1243_v38  ;;  %v1046_v50 = vadd.f32 %v1044_v12, %v1024_v35  ;;  %s4944_s6 = sld [smem:[#allocation5 + $0x24]] }
 0x2d9   :  { %v6836_v9 = vstv %s6778_s5  ;;  %v1107_v0 = vmax.f32 %v1104_v19, 0.0  ;;  %v1129_v17 = vmax.f32 %v1126_v62, 0.0  ;;  %v6838_v56 = vstv %s4350_s28  ;;  %s6848_s5 = sld [smem:[#allocation40_spill]] }
 0x2da   :  { %v1066_v27 = vmul.f32 %v6836_v9, %v1063_v7  ;;  %v1170_v49 = vadd.f32 %v6838_v56, %v1166_v14  ;;  %v6841_v52 = vstv %s6829_s21  ;;  %v6842_v58 = vstv %s6830_s2  ;;  %s6849_s28 = sld [smem:[#allocation41_spill]] }
 0x2db   :  { %v1274_v6 = vmul.f32 %v4788_v46, %v6841_v52  ;;  %v1296_v25 = vmul.f32 %v4788_v46, %v6842_v58  ;;  %v1287_v7 = vadd.f32 %v1285_v43, %v1265_v24  ;;  %v1307_v4 = vmul.f32 %v1306_v41, %v1304_v26  ;;  %6881 = sst [smem:[#allocation49_spill]] %s4942_s18 }
 0x2dc   :  { %v1068_v29 = vadd.f32 %v1066_v27, %v1046_v50  ;;  %v6844_v57 = vstv %s6779_s22  ;;  %v6845_v20 = vstv %s6780_s3  ;;  %v1151_v55 = vmax.f32 %v1148_v47, 0.0  ;;  %s6854_s22 = sld [smem:[#allocation43_spill]] }
 0x2dd   :  { %v1088_v33 = vmul.f32 %v6844_v57, %v1085_v10  ;;  %v1110_v40 = vmul.f32 %v6845_v20, %v1107_v0  ;;  %v6846_v36 = vstv %s4358_s23  ;;  %v6847_v3 = vstv %s6835_s10  ;;  %6868 = sst [smem:[#allocation23_spill]] %s4908_s29 }
 0x2de   :  { %v1192_v28 = vadd.f32 %v6846_v36, %v1188_v1  ;;  %v1214_v63 = vadd.f32 %v6847_v3, %v1210_v23  ;;  %v1309_v39 = vadd.f32 %v1307_v4, %v1287_v7  ;;  %v6850_v59 = vstv %s6837_s19  ;;  %s4920_s23 = sld [smem:[#allocation5 + $0x21]] }
 0x2df   :  { %v1090_v30 = vadd.f32 %v1088_v33, %v1068_v29  ;;  %v1226_v18 = vmul.f32 %v6850_v59, %v4682_v54  ;;  %v6851_v11 = vstv %s6839_s9  ;;  %v6852_v44 = vstv %s6781_s30  ;;  %s6865_s30 = sld [smem:[#allocation59_spill]] }
 0x2e0   :  { %v1248_v26 = vmul.f32 %v6851_v11, %v4682_v54  ;;  %v1132_v48 = vmul.f32 %v6852_v44, %v1129_v17  ;;  %v1173_v31 = vmax.f32 %v1170_v49, 0.0  ;;  %v6853_v13 = vstv %s6843_s20  ;;  %s4912_s20 = sld [smem:[#allocation5 + $0x20]] }
 0x2e1   :  { %v1270_v12 = vmul.f32 %v6853_v13, %v4682_v54  ;;  %v1292_v10 = vmul.f32 %v1290_v37, %v4682_v54  ;;  %v1311_v16 = vsel %vm617_vm2, %v1309_v39, -inf  ;;  %v1112_v14 = vadd.f32 %v1110_v40, %v1090_v30  ;;  %s4926_s3 = sld [smem:[#allocation2 + $0x22]] }
 0x2e2   :  { %v1232_v38 = vadd.f32 %v4527_v51, %v1226_v18  ;;  %v1254_v35 = vadd.f32 %v4537_v34, %v1248_v26  ;;  %1312 = vmax.xlane.f32.xlu1 %v1311_v16  ;;  %v1195_v45 = vmax.f32 %v1192_v28, 0.0  ;;  %v6856_v42 = vstv %s6848_s5  ;;  %s4914_s5 = sld [smem:[#allocation7 + $0x20]] }
 0x2e3   :  { %v1134_v19 = vadd.f32 %v1132_v48, %v1112_v14  ;;  %v1154_v62 = vmul.f32 %v6856_v42, %v1151_v55  ;;  %v6857_v5 = vstv %s6849_s28  ;;  %v1276_v37 = vadd.f32 %v1274_v6, %v1270_v12  ;;  %s4916_s28 = sld [smem:[#allocation8 + $0x20]] }
 0x2e4   :  { %v1236_v43 = vadd.f32 %v6857_v5, %v1232_v38  ;;  %v1217_v54 = vmax.f32 %v1214_v63, 0.0  ;;  %v6858_v47 = vstv %s6802_s8  ;;  %v6859_v51 = vstv %s6854_s22  ;;  %s4918_s22 = sld [smem:[#allocation2 + $0x21]] }
 0x2e5   :  { %v1156_v2 = vadd.f32 %v1154_v62, %v1134_v19  ;;  %v1176_v1 = vmul.f32 %v6858_v47, %v1173_v31  ;;  %v1258_v23 = vadd.f32 %v6859_v51, %v1254_v35  ;;  %v1298_v24 = vadd.f32 %v1296_v25, %v1292_v10  ;;  %v2992_v30 = vld [vmem:[%s6865_s30 + $0x20] sm:$0xff]  ;;  %v2995_v59 = vld [vmem:[%s6865_s30 + $0x38] sm:$0xff]  ;;  %v3070_v35 = vld [vmem:[%s6867_s7 + $0x28] sm:$0xff]  ;;  %s4924_s8 = sld [smem:[#allocation8 + $0x21]] }
 0x2e6   :  { %v6860_v50 = vstv %s6805_s15  ;;  %v1239_v27 = vmax.f32 %v1236_v43, 0.0  ;;  %v1280_v0 = vadd.f32 %v1278_v21, %v1276_v37  ;;  %v6861_v56 = vstv %s6806_s17  ;;  %3333 = vmatpush3.msra.mxu1 %v2995_v59  ;;  %v3069_v10 = vld [vmem:[%s6867_s7 + $0x20] sm:$0xff]  ;;  %s4936_s15 = sld [smem:[#allocation5 + $0x23]] }
 0x2e7   :  { %v1178_v34 = vadd.f32 %v1176_v1, %v1156_v2  ;;  %v1198_v9 = vmul.f32 %v6860_v50, %v1195_v45  ;;  %v1220_v49 = vmul.f32 %v6861_v56, %v1217_v54  ;;  %v1261_v52 = vmax.f32 %v1258_v23, 0.0  ;;  %3334 = vmatprep.subr.mxu1 %v6688_v15  ;;  %6875 = sst [smem:[#allocation27_spill]] %s4926_s3 }
 0x2e8   :  { %v1302_v6 = vadd.f32 %v1300_v53, %v1298_v24  ;;  %v6862_v7 = vstv %s6807_s1  ;;  %v1283_v29 = vmax.f32 %v1280_v0, 0.0  ;;  %v6863_v25 = vstv %s6808_s16  ;;  %v2993_v53 = vld [vmem:[%s6865_s30 + $0x28] sm:$0xff]  ;;  %s6866_s16 = sld [smem:[#allocation58_spill]] }
 0x2e9   :  { %v1200_v17 = vadd.f32 %v1198_v9, %v1178_v34  ;;  %v1242_v4 = vmul.f32 %v6862_v7, %v1239_v27  ;;  %v1264_v33 = vmul.f32 %v6863_v25, %v1261_v52  ;;  %v6864_v55 = vstv %s6825_s13  ;;  %3326 = vmatpush3.msra.mxu0 %v2993_v53  ;;  %6870 = sst [smem:[#allocation37_spill]] %s4914_s5 }
 0x2ea   :  { %v1305_v20 = vmax.f32 %v1302_v6, 0.0  ;;  %v1286_v36 = vmul.f32 %v6864_v55, %v1283_v29  ;;  %3327 = vmatprep.subr.mxu0 %v6688_v15  ;;  %6871 = sst [smem:[#allocation25_spill]] %s4916_s28  ;;  %v1657_v45 = vstv %s4912_s20  ;;  %v1679_v19 = vstv %s4920_s23 }
 0x2eb   :  { %v1222_v58 = vadd.f32 %v1220_v49, %v1200_v17  ;;  %3328 = vmatpush3.msra.mxu0 %v2992_v30  ;;  %6872 = sst [smem:[#allocation31_spill]] %s4918_s22  ;;  %v6405_v62 = vstv %s4910_s14  ;;  %v1701_v5 = vstv %s4928_s27  ;;  %v5008_v43 = vmul.f32 %v4546_v60, %v1657_v45 }
 0x2ec   :  { %v1308_v21 = vmul.f32 %v1306_v41, %v1305_v20  ;;  %v2994_v41 = vld [vmem:[%s6865_s30 + $0x30] sm:$0xff]  ;;  %3339 = vmatprep.subr.mxu0 %v6688_v15  ;;  %6874 = sst [smem:[#allocation32_spill]] %s4924_s8  ;;  %v1663_v37 = vstv %s4914_s5  ;;  %v6406_v2 = vstv %s4918_s22  ;;  %v5016_v47 = vmul.f32 %v4546_v60, %v1679_v19 }
 0x2ed   :  { %v1244_v57 = vadd.f32 %v1242_v4, %v1222_v58  ;;  %3335 = vmatpush3.msra.mxu1 %v2994_v41  ;;  %s4938_s17 = sld [smem:[#allocation7 + $0x23]]  ;;  %v1685_v1 = vstv %s4922_s4  ;;  %v1723_v23 = vstv %s4936_s15  ;;  %v6407_v24 = vstv %s4926_s3 }
 0x2ee   :  { %3346 = vmatprep.subr.mxu1 %v6688_v15  ;;  %v3072_v44 = vld [vmem:[%s6866_s16 + $0x48] sm:$0xff]  ;;  %v3074_v16 = vld [vmem:[%s6866_s16 + $0x58] sm:$0xff]  ;;  %v3073_v38 = vld [vmem:[%s6866_s16 + $0x50] sm:$0xff]  ;;  %s4940_s1 = sld [smem:[#allocation8 + $0x23]]  ;;  %v5025_v34 = vmul.f32 %v4546_v60, %v1701_v5  ;;  %v1707_v50 = vstv %s4930_s25  ;;  %v5036_v17 = vmul.f32 %v4788_v46, %v1657_v45  ;;  %v5039_v56 = vmul.f32 %v4788_v46, %v1679_v19 }
 0x2ef   :  { %v1266_v40 = vadd.f32 %v1264_v33, %v1244_v57  ;;  %s4946_s11 = sld [smem:[#allocation7 + $0x24]]  ;;  %v6408_v27 = vstv %s4934_s24  ;;  %v1745_v0 = vstv %s4944_s6  ;;  %v5042_v49 = vmul.f32 %v4546_v60, %v1723_v23 }
 0x2f0   :  { %s4948_s26 = sld [smem:[#allocation8 + $0x24]]  ;;  %v5049_v58 = vmul.f32 %v4788_v46, %v1701_v5  ;;  %v6409_v4 = vstv %s4942_s18  ;;  %v5057_v57 = vmul.f32 %v4788_v46, %v1723_v23  ;;  %v5060_v25 = vmul.f32 %v4546_v60, %v1745_v0 }
 0x2f1   :  { %v1288_v28 = vadd.f32 %v1286_v36, %v1266_v40  ;;  %s4950_s13 = sld [smem:[#allocation2 + $0x25]]  ;;  %v5067_v40 = vmul.f32 %v4788_v46, %v1745_v0 }
 0x2f2   :  { %s4952_s21 = sld [smem:[#allocation5 + $0x25]] }
 0x2f3   :  { %v1310_v3 = vadd.f32 %v1308_v21, %v1288_v28  ;;  %6879 = sst [smem:[#allocation16_spill]] %s4938_s17  ;;  %v1729_v52 = vstv %s4938_s17 }
 0x2f4   :  { %6880 = sst [smem:[#allocation48_spill]] %s4940_s1 }
 0x2f5   :  { %v1314_v63 = vsel %vm617_vm2, %v1310_v3, -inf  ;;  %6882 = sst [smem:[#allocation35_spill]] %s4946_s11  ;;  %v6425_v33 = vstv %s4946_s11 }
 0x2f6   :  { %1315 = vmax.xlane.f32.xlu1 %v1314_v63  ;;  %6883 = sst [smem:[#allocation30_spill]] %s4948_s26 }
 0x2f7   :  { %6884 = sst [smem:[#allocation20_spill]] %s4950_s13 }
 0x2f8   :  { %s4954_s2 = sld [smem:[#allocation7 + $0x25]]  ;;  %v1767_v6 = vstv %s4952_s21 }
 0x2f9   :  { %s4956_s10 = sld [smem:[#allocation8 + $0x25]]  ;;  %v5071_v36 = vmul.f32 %v4546_v60, %v1767_v6  ;;  %v5085_v30 = vmul.f32 %v4788_v46, %v1767_v6 }
 0x2fa   :  { %s4958_s19 = sld [smem:[#allocation2 + $0x26]] }
 0x2fb   :  { %s4960_s9 = sld [smem:[#allocation5 + $0x26]] }
 0x2fc   :  { %s4962_s12 = sld [smem:[#allocation7 + $0x26]] }
 0x2fd   :  { %s4964_s7 = sld [smem:[#allocation8 + $0x26]] }
 0x2fe   :  { %6885 = sst [smem:[#allocation24_spill]] %s4954_s2 }
 0x2ff   :  { %6886 = sst [smem:[#allocation33_spill]] %s4956_s10 }
 0x300   :  { %6887 = sst [smem:[#allocation44_spill]] %s4958_s19 }
 0x301   :  { %s4968_s30 = sld [smem:[#allocation5 + $0x27]]  ;;  %v1789_v29 = vstv %s4960_s9 }
 0x302   :  { %6888 = sst [smem:[#allocation55_spill]] %s4962_s12  ;;  %v5080_v53 = vmul.f32 %v4546_v60, %v1789_v29 }
 0x303   :  { %6889 = sst [smem:[#allocation52_spill]] %s4964_s7 }
 0x304   :  { %s4970_s13 = sld [smem:[#allocation7 + $0x27]] }
 0x305   :  { %s4972_s26 = sld [smem:[#allocation8 + $0x27]] }
 0x306   :  { %s4974_s10 = sld [smem:[#allocation2 + $0x28]] }
 0x307   :  { %6891 = sst [smem:[#allocation53_spill]] %s4968_s30 }
 0x308   :  { %s4976_s19 = sld [smem:[#allocation5 + $0x28]] }
 0x309   :  { %s4978_s12 = sld [smem:[#allocation7 + $0x28]] }
 0x30a   :  { %6892 = sst [smem:[#allocation18_spill]] %s4970_s13 }
 0x30b   :  { %6893 = sst [smem:[#allocation51_spill]] %s4972_s26 }
 0x30c   :  { %6894 = sst [smem:[#allocation34_spill]] %s4974_s10 }
 0x30d   :  { %s4980_s7 = sld [smem:[#allocation8 + $0x28]] }
 0x30e   :  { %6895 = sst [smem:[#allocation19_spill]] %s4976_s19 }
 0x30f   :  { %s4982_s2 = sld [smem:[#allocation2 + $0x29]] }
 0x310   :  { %s4986_s13 = sld [smem:[#allocation7 + $0x29]] }
 0x311   :  { %s4988_s26 = sld [smem:[#allocation8 + $0x29]] }
 0x312   :  { %s4990_s10 = sld [smem:[#allocation2 + $0x2a]] }
 0x313   :  { %6896 = sst [smem:[#allocation46_spill]] %s4980_s7 }
 0x314   :  { %s4992_s30 = sld [smem:[#allocation5 + $0x2a]] }
 0x315   :  { %6897 = sst [smem:[#allocation42_spill]] %s4982_s2 }
 0x316   :  { %6898 = sst [smem:[#allocation17_spill]] %s4986_s13 }
 0x317   :  { %6899 = sst [smem:[#allocation38_spill]] %s4988_s26 }
 0x318   :  { %6900 = sst [smem:[#allocation50_spill]] %s4990_s10 }
 0x319   :  { %s4994_s19 = sld [smem:[#allocation7 + $0x2a]] }
 0x31a   :  { %s4997_s2 = sld [smem:[#allocation8 + $0x2a]] }
 0x31b   :  { %s5000_s7 = sld [smem:[#allocation2 + $0x2b]] }
 0x31c   :  { %s5005_s10 = sld [smem:[#allocation5 + $0x2b]] }
 0x31d   :  { %s5013_s20 = sld [smem:[#allocation7 + $0x2b]] }
 0x31e   :  { %s5021_s23 = sld [smem:[#allocation8 + $0x2b]] }
 0x31f   :  { %s5029_s27 = sld [smem:[#allocation2 + $0x2c]] }
 0x320   :  { %6901 = sst [smem:[#allocation54_spill]] %s4997_s2 }
 0x321   :  { %s5033_s28 = sld [smem:[#allocation5 + $0x2c]] }
 0x322   :  { %s6906_s15 = sld [smem:[#allocation20_spill]] }
 0x323   :  { %6902 = sst [smem:[#allocation39_spill]] %s5013_s20 }
 0x324   :  { %6903 = sst [smem:[#allocation36_spill]] %s5021_s23 }
 0x325   :  { %6904 = sst [smem:[#allocation40_spill]] %s5029_s27 }
 0x326   :  { %s6907_s0 = sld [smem:[#allocation24_spill]] }
 0x327   :  { %s6908_s8 = sld [smem:[#allocation53_spill]]  ;;  %v1921_v45 = vstv %s5033_s28 }
 0x328   :  { %s5046_s25 = sld [smem:[#allocation7 + $0x2c]]  ;;  %v6410_v55 = vstv %s6906_s15 }
 0x329   :  { %s6911_s4 = sld [smem:[#allocation44_spill]] }
 0x32a   :  { %s5054_s5 = sld [smem:[#allocation8 + $0x2c]] }
 0x32b   :  { %s6913_s17 = sld [smem:[#allocation55_spill]] }
 0x32c   :  { %s6915_s24 = sld [smem:[#allocation19_spill]]  ;;  %v6424_v28 = vstv %s6907_s0 }
 0x32d   :  { %s5064_s3 = sld [smem:[#allocation2 + $0x2d]]  ;;  %v1811_v21 = vstv %s6908_s8 }
 0x32e   :  { %6909 = sst [smem:[#allocation41_spill]] %s5046_s25 }
 0x32f   :  { %s6918_s9 = sld [smem:[#allocation18_spill]]  ;;  %v6411_v63 = vstv %s6911_s4 }
 0x330   :  { %6912 = sst [smem:[#allocation43_spill]] %s5054_s5 }
 0x331   :  { %s5075_s18 = sld [smem:[#allocation5 + $0x2d]]  ;;  %v6420_v59 = vstv %s6913_s17 }
 0x332   :  { %s6920_s11 = sld [smem:[#allocation34_spill]] }
 0x333   :  { %6916 = sst [smem:[#allocation26_spill]] %s5064_s3 }
 0x334   :  { %s5082_s29 = sld [smem:[#allocation7 + $0x2d]] }
 0x335   :  { %s5090_s0 = sld [smem:[#allocation5 + $0x2e]] }
 0x336   :  { %s6924_s6 = sld [smem:[#allocation42_spill]] }
 0x337   :  { %s5101_s4 = sld [smem:[#allocation8 + $0x2d]]  ;;  %v1943_v19 = vstv %s5075_s18 }
 0x338   :  { %s5106_s21 = sld [smem:[#allocation2 + $0x2e]]  ;;  %v5173_v23 = vmul.f32 %v4788_v46, %v1943_v19 }
 0x339   :  { %s6930_s28 = sld [smem:[#allocation27_spill]] }
 0x33a   :  { %6921 = sst [smem:[#allocation53_spill]] %s5082_s29 }
 0x33b   :  { %6923 = sst [smem:[#allocation19_spill]] %s5090_s0 }
 0x33c   :  { %s6932_s18 = sld [smem:[#allocation29_spill]] }
 0x33d   :  { %6925 = sst [smem:[#allocation34_spill]] %s5101_s4 }
 0x33e   :  { %6927 = sst [smem:[#allocation42_spill]] %s5106_s21 }
 0x33f   :  { %s5170_s26 = sld [smem:[#allocation8 + $0x2e]] }
 0x340   :  { %s5184_s5 = sld [smem:[#allocation2 + $0x2f]] }
 0x341   :  { %s6940_s14 = sld [smem:[#allocation35_spill]] }
 0x342   :  { %s6943_s2 = sld [smem:[#allocation32_spill]] }
 0x343   :  { %s6944_s15 = sld [smem:[#allocation28_spill]] }
 0x344   :  { %s6945_s23 = sld [smem:[#allocation48_spill]] }
 0x345   :  { %6935 = sst [smem:[#allocation29_spill]] %s5170_s26 }
 0x346   :  { %s6946_s4 = sld [smem:[#allocation23_spill]] }
 0x347   :  { %s6960_s26 = sld [smem:[#allocation30_spill]] }
 0x348   :  { %s6970_s17 = sld [smem:[#allocation46_spill]] }
 0x349   :  { %s6995_s8 = sld [smem:[#allocation44_spill]] }
 0x34a   :  { %s7009_s22 = sld [smem:[#allocation18_spill]] }
 0x36b   :  { %v1313_v18 = vpop.xlane.xlu1 %1312 }
 0x36c   :  { %v1317_v11 = vsub.f32 %v1309_v39, %v1313_v18  ;;  %v3071_v39 = vld [vmem:[%s6866_s16 + $0x40] sm:$0xff]  ;;  %s4966_s16 = sld [smem:[#allocation2 + $0x27]]  ;;  %v1833_v18 = vstv %s6915_s24 }
 0x36d   :  { %s6926_s24 = sld [smem:[#allocation50_spill]]  ;;  %v5121_v5 = vmul.f32 %v4788_v46, %v1833_v18 }
 0x36e   :  { %v1319_v26 = vmul.f32 1.442695, %v1317_v11  ;;  %v5093_v11 = vmul.f32 %v4788_v46, %v1789_v29  ;;  %v1899_v29 = vstv %s5005_s10  ;;  %s5160_s10 = sld [smem:[#allocation7 + $0x2e]] }
 0x36f   :  { %v5153_v20 = vmul.f32 %v4788_v46, %v1899_v29 }
 0x370   :  { %3411 = vpow2.f32 %v1319_v26 }
 0x372   :  { %6890 = sst [smem:[#allocation47_spill]] %s4966_s16 }
 0x373   :  { %s4984_s16 = sld [smem:[#allocation5 + $0x29]] }
 0x374   :  { %s6917_s1 = sld [smem:[#allocation47_spill]] }
 0x375   :  { %6931 = sst [smem:[#allocation27_spill]] %s5160_s10 }
 0x37a   :  { %v6412_v26 = vstv %s6917_s1  ;;  %s6942_s1 = sld [smem:[#allocation25_spill]] }
 0x37d   :  { %v4867_v48 = vpop.eup %3411 }
 0x37e   :  { %3330 = vmatmul.mubr.msk.f32.vlgmr.msra.gmra.mxu0 %vm617_vm2, %v4867_v48 }
 0x37f   :  { %v1316_v31 = vpop.xlane.xlu1 %1315  ;;  %3340 = vmatpush3.xpose.msk.msra.mxu0 %vm104_vm0, %v3072_v44  ;;  %3343 = vmatprep.mubr.msk.f32.mxu0 %vm3537_vm1, %v6688_v15  ;;  %v5097_v44 = vmul.f32 %v4546_v60, %v1811_v21 }
 0x380   :  { %v1318_v13 = vsub.f32 %v1310_v3, %v1316_v31  ;;  %3341 = vmatprep.subr.mxu0 %v6688_v15  ;;  %v6417_v31 = vstv %s6918_s9  ;;  %s5247_s9 = sld [smem:[#allocation7 + $0x2f]] }
 0x382   :  { %v1321_v12 = vmul.f32 1.442695, %v1318_v13  ;;  %v1855_v13 = vstv %s4984_s16  ;;  %s5118_s16 = sld [smem:[#allocation5 + $0x2f]] }
 0x383   :  { %3342 = vmatpush3.xpose.msk.msra.mxu0 %vm104_vm0, %v3071_v39  ;;  %v5125_v0 = vmul.f32 %v4546_v60, %v1855_v13 }
 0x384   :  { %3413 = vpow2.f32 %v1321_v12  ;;  %3353 = vmatprep.subr.mxu0 %v6688_v15  ;;  %v5163_v12 = vmul.f32 %v4788_v46, %v1921_v45 }
 0x386   :  { %3344 = vmatmul.mubr.msk.f32.vlgmr.msra.gmra.mxu0 %vm104_vm0, %v3069_v10  ;;  %v1877_v10 = vstv %s4992_s30  ;;  %s6941_s30 = sld [smem:[#allocation24_spill]] }
 0x387   :  { %3357 = vmatprep.mubr.msk.f32.mxu0 %vm3537_vm1, %v6688_v15  ;;  %v5132_v41 = vmul.f32 %v4546_v60, %v1877_v10  ;;  %v5141_v6 = vmul.f32 %v4788_v46, %v1877_v10  ;;  %v5156_v10 = vmul.f32 %v4546_v60, %v1921_v45 }
 0x388   :  { %6928 = sst [smem:[#allocation50_spill]] %s5118_s16 }
 0x391   :  { %v4889_v14 = vpop.eup %3413 }
 0x392   :  { %3337 = vmatmul.mubr.msk.f32.vlgmr.msra.gmra.mxu1 %vm617_vm2, %v4889_v14 }
 0x393   :  { %3347 = vmatpush3.xpose.msk.msra.mxu1 %vm104_vm0, %v3074_v16  ;;  %3350 = vmatprep.mubr.msk.f32.mxu1 %vm3537_vm1, %v6688_v15  ;;  %v5109_v16 = vmul.f32 %v4788_v46, %v1811_v21 }
 0x394   :  { %3348 = vmatprep.subr.mxu1 %v6688_v15 }
 0x397   :  { %3349 = vmatpush3.xpose.msk.msra.mxu1 %vm104_vm0, %v3073_v38 }
 0x398   :  { %3360 = vmatprep.subr.mxu1 %v6688_v15 }
 0x39a   :  { %3351 = vmatmul.mubr.msk.f32.vlgmr.msra.gmra.mxu1 %vm104_vm0, %v3070_v35  ;;  %v5114_v35 = vmul.f32 %v4546_v60, %v1833_v18  ;;  %v5135_v18 = vmul.f32 %v4788_v46, %v1855_v13  ;;  %v6403_v13 = vstv %s5090_s0  ;;  %s7011_s0 = sld [smem:[#allocation29_spill]] }
 0x39b   :  { %3364 = vmatprep.mubr.msk.f32.mxu1 %vm3537_vm1, %v6688_v15  ;;  %v5182_v45 = vmul.f32 %v4546_v60, %v6403_v13 }
 0x43e   :  { %v5111_v38 = vpop.f32.mrf.mxu0 }
 0x440   :  { %v3331_v21 = vpop.f32.mrf.mxu0 }
 0x441   :  { %v5145_v21 = vmul.f32 %v4546_v60, %v1899_v29  ;;  %v5167_v29 = vmul.f32 %v4546_v60, %v1943_v19 }
 0x446   :  { %v5175_v3 = vpop.f32.mrf.mxu0 }
 0x447   :  { %v1654_v42 = vmul.f32 %v6405_v62, %v5175_v3  ;;  %v1676_v51 = vmul.f32 %v6406_v2, %v5175_v3  ;;  %v1698_v19 = vmul.f32 %v6407_v24, %v5175_v3  ;;  %v1720_v7 = vmul.f32 %v6408_v27, %v5175_v3 }
 0x448   :  { %v3345_v13 = vpop.f32.mrf.mxu0  ;;  %v1742_v9 = vmul.f32 %v6409_v4, %v5175_v3  ;;  %v1764_v62 = vmul.f32 %v6410_v55, %v5175_v3  ;;  %v1786_v2 = vmul.f32 %v6411_v63, %v5175_v3  ;;  %v1808_v24 = vmul.f32 %v6412_v26, %v5175_v3 }
 0x449   :  { %v1660_v27 = vadd.f32 %v5008_v43, %v1654_v42  ;;  %v1682_v13 = vadd.f32 %v5016_v47, %v1676_v51  ;;  %v1704_v54 = vadd.f32 %v5025_v34, %v1698_v19  ;;  %v1726_v4 = vadd.f32 %v5042_v49, %v1720_v7 }
 0x44a   :  { %v1748_v39 = vadd.f32 %v5060_v25, %v1742_v9  ;;  %v1770_v55 = vadd.f32 %v5071_v36, %v1764_v62  ;;  %v1792_v63 = vadd.f32 %v5080_v53, %v1786_v2  ;;  %v1814_v26 = vadd.f32 %v5097_v44, %v1808_v24 }
 0x44b   :  { %v1664_v42 = vadd.f32 %v1663_v37, %v1660_v27  ;;  %v1686_v43 = vadd.f32 %v1685_v1, %v1682_v13  ;;  %v1708_v47 = vadd.f32 %v1707_v50, %v1704_v54  ;;  %v1730_v51 = vadd.f32 %v1729_v52, %v1726_v4 }
 0x44c   :  { %v1752_v34 = vadd.f32 %v6425_v33, %v1748_v39  ;;  %v1774_v62 = vadd.f32 %v6424_v28, %v1770_v55  ;;  %v1796_v2 = vadd.f32 %v6420_v59, %v1792_v63  ;;  %v1818_v24 = vadd.f32 %v6417_v31, %v1814_v26 }
 0x44d   :  { %v1667_v9 = vmax.f32 %v1664_v42, 0.0  ;;  %v1689_v27 = vmax.f32 %v1686_v43, 0.0  ;;  %v1711_v49 = vmax.f32 %v1708_v47, 0.0  ;;  %v1733_v7 = vmax.f32 %v1730_v51, 0.0 }
 0x44e   :  { %v1971_v25 = vstv %s5160_s10  ;;  %v1983_v4 = vstv %s5184_s5  ;;  %v6947_v36 = vstv %s5118_s16  ;;  %v6948_v53 = vstv %s6942_s1  ;;  %s5253_s16 = sld [smem:[#allocation8 + $0x2f]] }
 0x44f   :  { %v5241_v55 = vmul.f32 %v4546_v60, %v6947_v36  ;;  %v1670_v63 = vmul.f32 %v6948_v53, %v1667_v9  ;;  %v6949_v44 = vstv %s6943_s2  ;;  %v1755_v39 = vmax.f32 %v1752_v34, 0.0  ;;  %s6977_s10 = sld [smem:[#allocation49_spill]] }
 0x450   :  { %v1692_v26 = vmul.f32 %v6949_v44, %v1689_v27  ;;  %v1777_v19 = vmax.f32 %v1774_v62, 0.0  ;;  %v6950_v13 = vstv %s6944_s15  ;;  %v6951_v43 = vstv %s6945_s23  ;;  %s5550_s5 = sld [smem:[#allocation8 + $0x31]] }
 0x451   :  { %v1714_v42 = vmul.f32 %v6950_v13, %v1711_v49  ;;  %v1736_v47 = vmul.f32 %v6951_v43, %v1733_v7  ;;  %v1799_v51 = vmax.f32 %v1796_v2, 0.0  ;;  %v1821_v54 = vmax.f32 %v1818_v24, 0.0 }
 0x452   :  { %v6952_v60 = vstv %s6946_s4  ;;  %v6953_v9 = vstv %s6920_s11  ;;  %v6954_v27 = vstv %s6924_s6  ;;  %v6955_v62 = vstv %s6926_s24  ;;  %v5266_v31 = vpop.f32.mrf.mxu1 }
 0x453   :  { %v1672_v36 = vadd.f32 %v1670_v63, %v6952_v60  ;;  %v1830_v53 = vmul.f32 %v6953_v9, %v5175_v3  ;;  %v1852_v34 = vmul.f32 %v6954_v27, %v5175_v3  ;;  %v1874_v44 = vmul.f32 %v6955_v62, %v5175_v3 }
 0x454   :  { %v6956_v49 = vstv %s5000_s7  ;;  %v6957_v24 = vstv %s5029_s27  ;;  %v6958_v63 = vstv %s5064_s3  ;;  %v6959_v43 = vstv %s5106_s21  ;;  %v3338_v59 = vpop.f32.mrf.mxu1  ;;  %s6961_s3 = sld [smem:[#allocation33_spill]] }
 0x455   :  { %v1896_v2 = vmul.f32 %v6956_v49, %v5175_v3  ;;  %v1918_v7 = vmul.f32 %v6957_v24, %v5175_v3  ;;  %v1940_v13 = vmul.f32 %v6958_v63, %v5175_v3  ;;  %v1962_v60 = vmul.f32 %v6959_v43, %v5175_v3  ;;  %s6962_s21 = sld [smem:[#allocation52_spill]] }
 0x456   :  { %v1694_v9 = vadd.f32 %v1692_v26, %v1672_v36  ;;  %v1836_v27 = vadd.f32 %v5114_v35, %v1830_v53  ;;  %v1858_v62 = vadd.f32 %v5125_v0, %v1852_v34  ;;  %v1880_v49 = vadd.f32 %v5132_v41, %v1874_v44  ;;  %s6963_s27 = sld [smem:[#allocation51_spill]] }
 0x457   :  { %v1902_v24 = vadd.f32 %v5145_v21, %v1896_v2  ;;  %v1924_v63 = vadd.f32 %v5156_v10, %v1918_v7  ;;  %v1946_v43 = vadd.f32 %v5167_v29, %v1940_v13  ;;  %v1968_v26 = vadd.f32 %v5182_v45, %v1962_v60  ;;  %7060 = sst [smem:[#allocation32_spill]] %s5550_s5 }
 0x458   :  { %v1716_v35 = vadd.f32 %v1714_v42, %v1694_v9  ;;  %v6964_v36 = vstv %s4978_s12  ;;  %v6965_v53 = vstv %s4986_s13  ;;  %v6966_v41 = vstv %s4994_s19  ;;  %s6973_s13 = sld [smem:[#allocation21_spill]] }
 0x459   :  { %v1840_v0 = vadd.f32 %v6964_v36, %v1836_v27  ;;  %v1862_v34 = vadd.f32 %v6965_v53, %v1858_v62  ;;  %v1884_v59 = vadd.f32 %v6966_v41, %v1880_v49  ;;  %v6967_v44 = vstv %s5013_s20  ;;  %s6975_s20 = sld [smem:[#allocation31_spill]] }
 0x45a   :  { %v1906_v28 = vadd.f32 %v6967_v44, %v1902_v24  ;;  %v6968_v21 = vstv %s5046_s25  ;;  %v6969_v33 = vstv %s5082_s29  ;;  %v5301_v29 = vadd.f32 %v1971_v25, %v1968_v26  ;;  %s6978_s29 = sld [smem:[#allocation20_spill]]  ;;  %v5313_v26 = vpop.f32.mrf.mxu1 }
 0x45b   :  { %v1928_v2 = vadd.f32 %v6968_v21, %v1924_v63  ;;  %v1950_v10 = vadd.f32 %v6969_v33, %v1946_v43  ;;  %v1738_v7 = vadd.f32 %v1736_v47, %v1716_v35  ;;  %v6971_v45 = vstv %s6960_s26  ;;  %s6997_s25 = sld [smem:[#allocation47_spill]] }
 0x45c   :  { %v1758_v13 = vmul.f32 %v6971_v45, %v1755_v39  ;;  %v1843_v42 = vmax.f32 %v1840_v0, 0.0  ;;  %v1993_v60 = vstv %s5247_s9  ;;  %v6972_v9 = vstv %s6961_s3  ;;  %s5558_s9 = sld [smem:[#allocation8 + $0x32]] }
 0x45d   :  { %v1780_v27 = vmul.f32 %v6972_v9, %v1777_v19  ;;  %v6974_v62 = vstv %s6962_s21  ;;  %v6976_v24 = vstv %s6963_s27  ;;  %v1999_v36 = vstv %s5253_s16  ;;  %s5562_s16 = sld [smem:[#allocation5 + $0x33]] }
 0x45e   :  { %v1802_v49 = vmul.f32 %v6974_v62, %v1799_v51  ;;  %v1824_v63 = vmul.f32 %v6976_v24, %v1821_v54  ;;  %v1760_v33 = vadd.f32 %v1758_v13, %v1738_v7  ;;  %v1865_v43 = vmax.f32 %v1862_v34, 0.0 }
 0x45f   :  { %v1887_v47 = vmax.f32 %v1884_v59, 0.0  ;;  %v1909_v39 = vmax.f32 %v1906_v28, 0.0  ;;  %v6979_v35 = vstv %s6970_s17  ;;  %v1931_v53 = vmax.f32 %v1928_v2, 0.0  ;;  %v3352_v28 = vpop.f32.mrf.mxu1  ;;  %s6985_s17 = sld [smem:[#allocation38_spill]] }
 0x460   :  { %v1846_v0 = vmul.f32 %v6979_v35, %v1843_v42  ;;  %v1953_v19 = vmax.f32 %v1950_v10, 0.0  ;;  %v1975_v41 = vmax.f32 %v5301_v29, 0.0  ;;  %v1782_v51 = vadd.f32 %v1780_v27, %v1760_v33 }
 0x461   :  { %v1984_v54 = vmul.f32 %v1983_v4, %v5175_v3  ;;  %v6980_v44 = vstv %s6973_s13  ;;  %v6981_v34 = vstv %s6975_s20  ;;  %v6982_v7 = vstv %s6930_s28  ;;  %s6988_s13 = sld [smem:[#allocation54_spill]] }
 0x462   :  { %v1655_v21 = vmul.f32 %v6980_v44, %v5313_v26  ;;  %v1677_v59 = vmul.f32 %v6981_v34, %v5313_v26  ;;  %v1699_v2 = vmul.f32 %v6982_v7, %v5313_v26  ;;  %v6984_v10 = vstv %s6932_s18  ;;  %s6989_s20 = sld [smem:[#allocation36_spill]] }
 0x463   :  { %v1721_v29 = vmul.f32 %v6984_v10, %v5313_v26  ;;  %v6986_v45 = vstv %s6977_s10  ;;  %v6987_v13 = vstv %s6978_s29  ;;  %v1804_v9 = vadd.f32 %v1802_v49, %v1782_v51  ;;  %s6990_s28 = sld [smem:[#allocation43_spill]] }
 0x464   :  { %v1743_v3 = vmul.f32 %v6986_v45, %v5313_v26  ;;  %v1765_v42 = vmul.f32 %v6987_v13, %v5313_v26  ;;  %v1990_v27 = vadd.f32 %v5241_v55, %v1984_v54  ;;  %v1661_v62 = vadd.f32 %v5036_v17, %v1655_v21  ;;  %s6991_s29 = sld [smem:[#allocation34_spill]] }
 0x465   :  { %v1683_v24 = vadd.f32 %v5039_v56, %v1677_v59  ;;  %v1705_v33 = vadd.f32 %v5049_v58, %v1699_v2  ;;  %v1727_v35 = vadd.f32 %v5057_v57, %v1721_v29  ;;  %v1826_v28 = vadd.f32 %v1824_v63, %v1804_v9  ;;  %7063 = sst [smem:[#allocation23_spill]] %s5558_s9 }
 0x466   :  { %v1749_v44 = vadd.f32 %v5067_v40, %v1743_v3  ;;  %v1771_v34 = vadd.f32 %v5085_v30, %v1765_v42  ;;  %v1994_v49 = vadd.f32 %v1993_v60, %v1990_v27  ;;  %v1665_v55 = vadd.f32 %v1663_v37, %v1661_v62  ;;  %s5566_s10 = sld [smem:[#allocation8 + $0x33]] }
 0x467   :  { %v1687_v17 = vadd.f32 %v1685_v1, %v1683_v24  ;;  %v6992_v56 = vstv %s6985_s17  ;;  %v1709_v57 = vadd.f32 %v1707_v50, %v1705_v33  ;;  %v1731_v40 = vadd.f32 %v1729_v52, %v1727_v35  ;;  %s5568_s18 = sld [smem:[#allocation2 + $0x34]] }
 0x468   :  { %v1868_v58 = vmul.f32 %v6992_v56, %v1865_v43  ;;  %v6993_v51 = vstv %s6940_s14  ;;  %v1848_v30 = vadd.f32 %v1846_v0, %v1826_v28  ;;  %v6994_v63 = vstv %s6988_s13  ;;  %s7007_s14 = sld [smem:[#allocation55_spill]] }
 0x469   :  { %v1753_v54 = vadd.f32 %v6993_v51, %v1749_v44  ;;  %v1890_v21 = vmul.f32 %v6994_v63, %v1887_v47  ;;  %v1668_v59 = vmax.f32 %v1665_v55, 0.0  ;;  %v1690_v37 = vmax.f32 %v1687_v17, 0.0 }
 0x46a   :  { %v6996_v7 = vstv %s6989_s20  ;;  %v6998_v2 = vstv %s6990_s28  ;;  %v6999_v10 = vstv %s6991_s29  ;;  %v1712_v52 = vmax.f32 %v1709_v57, 0.0 }
 0x46b   :  { %v1912_v1 = vmul.f32 %v6996_v7, %v1909_v39  ;;  %v1934_v43 = vmul.f32 %v6998_v2, %v1931_v53  ;;  %v1956_v50 = vmul.f32 %v6999_v10, %v1953_v19  ;;  %v1870_v29 = vadd.f32 %v1868_v58, %v1848_v30 }
 0x46c   :  { %v1997_v0 = vmax.f32 %v1994_v49, 0.0  ;;  %v7000_v45 = vstv %s6942_s1  ;;  %v7001_v3 = vstv %s6941_s30  ;;  %v7002_v42 = vstv %s6943_s2  ;;  %s7016_s1 = sld [smem:[#allocation19_spill]] }
 0x46d   :  { %v1671_v47 = vmul.f32 %v7000_v45, %v1668_v59  ;;  %v1775_v13 = vadd.f32 %v7001_v3, %v1771_v34  ;;  %v1693_v9 = vmul.f32 %v7002_v42, %v1690_v37  ;;  %v7003_v27 = vstv %s6944_s15  ;;  %s7024_s2 = sld [smem:[#allocation40_spill]] }
 0x46e   :  { %v1715_v39 = vmul.f32 %v7003_v27, %v1712_v52  ;;  %v1734_v62 = vmax.f32 %v1731_v40, 0.0  ;;  %v1756_v24 = vmax.f32 %v1753_v54, 0.0  ;;  %v1892_v53 = vadd.f32 %v1890_v21, %v1870_v29  ;;  %s7035_s15 = sld [smem:[#allocation41_spill]] }
 0x46f   :  { %v7004_v33 = vstv %s6946_s4  ;;  %v7005_v19 = vstv %s6995_s8  ;;  %v7006_v28 = vstv %s6997_s25  ;;  %v7008_v55 = vstv %s6920_s11  ;;  %s7015_s4 = sld [smem:[#allocation17_spill]] }
 0x470   :  { %v1673_v35 = vadd.f32 %v1671_v47, %v7004_v33  ;;  %v1787_v44 = vmul.f32 %v7005_v19, %v5313_v26  ;;  %v1809_v49 = vmul.f32 %v7006_v28, %v5313_v26  ;;  %v1831_v34 = vmul.f32 %v7008_v55, %v5313_v26  ;;  %s7017_s11 = sld [smem:[#allocation50_spill]] }
 0x471   :  { %v7010_v17 = vstv %s6924_s6  ;;  %v7012_v58 = vstv %s6926_s24  ;;  %v7013_v40 = vstv %s5000_s7  ;;  %v1914_v54 = vadd.f32 %v1912_v1, %v1892_v53  ;;  %s7022_s7 = sld [smem:[#allocation39_spill]] }
 0x472   :  { %v1853_v56 = vmul.f32 %v7010_v17, %v5313_v26  ;;  %v1875_v57 = vmul.f32 %v7012_v58, %v5313_v26  ;;  %v1897_v51 = vmul.f32 %v7013_v40, %v5313_v26  ;;  %v1695_v30 = vadd.f32 %v1693_v9, %v1673_v35  ;;  %s7053_s25 = sld [smem:[#allocation57_spill]] }
 0x473   :  { %v1793_v63 = vadd.f32 %v5093_v11, %v1787_v44  ;;  %v1815_v21 = vadd.f32 %v5109_v16, %v1809_v49  ;;  %v7014_v59 = vstv %s6945_s23  ;;  %v1778_v7 = vmax.f32 %v1775_v13, 0.0  ;;  %s7025_s23 = sld [smem:[#allocation26_spill]] }
 0x474   :  { %v1737_v37 = vmul.f32 %v7014_v59, %v1734_v62  ;;  %v1837_v2 = vadd.f32 %v5121_v5, %v1831_v34  ;;  %v1859_v10 = vadd.f32 %v5135_v18, %v1853_v56  ;;  %v1936_v52 = vadd.f32 %v1934_v43, %v1914_v54  ;;  %s5554_s6 = sld [smem:[#allocation5 + $0x32]] }
 0x475   :  { %v1717_v29 = vadd.f32 %v1715_v39, %v1695_v30  ;;  %v7018_v45 = vstv %s7007_s14  ;;  %v7019_v47 = vstv %s7009_s22  ;;  %v7020_v3 = vstv %s7011_s0  ;;  %s5560_s24 = sld [smem:[#allocation2 + $0x33]] }
 0x476   :  { %v1797_v1 = vadd.f32 %v7018_v45, %v1793_v63  ;;  %v1819_v11 = vadd.f32 %v7019_v47, %v1815_v21  ;;  %v1978_v16 = vmul.f32 %v7020_v3, %v1975_v41  ;;  %v7021_v42 = vstv %s4978_s12  ;;  %s7029_s12 = sld [smem:[#allocation42_spill]] }
 0x477   :  { %v1841_v13 = vadd.f32 %v7021_v42, %v1837_v2  ;;  %v1881_v9 = vadd.f32 %v5141_v6, %v1875_v57  ;;  %v1903_v5 = vadd.f32 %v5153_v20, %v1897_v51  ;;  %v1958_v18 = vadd.f32 %v1956_v50, %v1936_v52  ;;  %s5564_s30 = sld [smem:[#allocation7 + $0x33]] }
 0x478   :  { %v1739_v43 = vadd.f32 %v1737_v37, %v1717_v29  ;;  %v7023_v27 = vstv %s6960_s26  ;;  %v1800_v62 = vmax.f32 %v1797_v1, 0.0  ;;  %v1822_v53 = vmax.f32 %v1819_v11, 0.0  ;;  %s7034_s26 = sld [smem:[#allocation46_spill]] }
 0x479   :  { %v1759_v39 = vmul.f32 %v7023_v27, %v1756_v24  ;;  %v7026_v33 = vstv %s7015_s4  ;;  %v7027_v35 = vstv %s7016_s1  ;;  %v7028_v44 = vstv %s7017_s11  ;;  %7065 = sst [smem:[#allocation33_spill]] %s5566_s10 }
 0x47a   :  { %v1863_v41 = vadd.f32 %v7026_v33, %v1859_v10  ;;  %v1967_v19 = vmul.f32 %v4788_v46, %v7027_v35  ;;  %v1989_v6 = vmul.f32 %v4788_v46, %v7028_v44  ;;  %v1980_v20 = vadd.f32 %v1978_v16, %v1958_v18  ;;  %7066 = sst [smem:[#allocation52_spill]] %s5568_s18 }
 0x47b   :  { %v2000_v50 = vmul.f32 %v1999_v36, %v1997_v0  ;;  %v1761_v28 = vadd.f32 %v1759_v39, %v1739_v43  ;;  %v7030_v24 = vstv %s6961_s3  ;;  %v7031_v55 = vstv %s6962_s21  ;;  %s7040_s3 = sld [smem:[#allocation53_spill]] }
 0x47c   :  { %v1781_v49 = vmul.f32 %v7030_v24, %v1778_v7  ;;  %v1803_v34 = vmul.f32 %v7031_v55, %v1800_v62  ;;  %v1844_v17 = vmax.f32 %v1841_v13, 0.0  ;;  %v7032_v56 = vstv %s4994_s19  ;;  %s5548_s19 = sld [smem:[#allocation7 + $0x31]] }
 0x47d   :  { %v1885_v58 = vadd.f32 %v7032_v56, %v1881_v9  ;;  %v7033_v57 = vstv %s7022_s7  ;;  %v2002_v51 = vadd.f32 %v2000_v50, %v1980_v20  ;;  %v7036_v46 = vstv %s7024_s2  ;;  %s5534_s7 = sld [smem:[#allocation10 + $0x3]] }
 0x47e   :  { %v1907_v40 = vadd.f32 %v7033_v57, %v1903_v5  ;;  %v1783_v54 = vadd.f32 %v1781_v49, %v1761_v28  ;;  %v1919_v30 = vmul.f32 %v7036_v46, %v5313_v26  ;;  %v7037_v63 = vstv %s7025_s23  ;;  %s5536_s2 = sld [smem:[#allocation2 + $0x30]] }
 0x47f   :  { %v1941_v0 = vmul.f32 %v7037_v63, %v5313_v26  ;;  %v7038_v21 = vstv %s6963_s27  ;;  %v1866_v37 = vmax.f32 %v1863_v41, 0.0  ;;  %v7039_v7 = vstv %s7029_s12  ;;  %s7051_s27 = sld [smem:[#allocation59_spill]] }
 0x480   :  { %v1825_v59 = vmul.f32 %v7038_v21, %v1822_v53  ;;  %v1963_v2 = vmul.f32 %v7039_v7, %v5313_v26  ;;  %v1985_v10 = vmul.f32 %v1983_v4, %v5313_v26  ;;  %v2004_v52 = vsel %vm617_vm2, %v2002_v51, -inf  ;;  %s5538_s23 = sld [smem:[#allocation5 + $0x30]] }
 0x481   :  { %v1805_v29 = vadd.f32 %v1803_v34, %v1783_v54  ;;  %v1925_v45 = vadd.f32 %v5163_v12, %v1919_v30  ;;  %v1947_v1 = vadd.f32 %v5173_v23, %v1941_v0  ;;  %2005 = vmax.xlane.f32.xlu0 %v2004_v52  ;;  %v1888_v47 = vmax.f32 %v1885_v58, 0.0  ;;  %s5540_s12 = sld [smem:[#allocation7 + $0x30]] }
 0x482   :  { %v7042_v3 = vstv %s7034_s26  ;;  %v7043_v42 = vstv %s7035_s15  ;;  %v1969_v4 = vadd.f32 %v1967_v19, %v1963_v2  ;;  %v1910_v26 = vmax.f32 %v1907_v40, 0.0  ;;  %s5542_s26 = sld [smem:[#allocation8 + $0x30]] }
 0x483   :  { %v1827_v11 = vadd.f32 %v1825_v59, %v1805_v29  ;;  %v1847_v16 = vmul.f32 %v7042_v3, %v1844_v17  ;;  %v1929_v13 = vadd.f32 %v7043_v42, %v1925_v45  ;;  %v7044_v5 = vstv %s6985_s17  ;;  %v3152_v29 = vld [vmem:[%s7053_s25 + $0x30] sm:$0xff]  ;;  %7054 = sst [smem:[#allocation37_spill]] %s5534_s7 }
 0x484   :  { %v1869_v18 = vmul.f32 %v7044_v5, %v1866_v37  ;;  %v7045_v12 = vstv %s7040_s3  ;;  %v1991_v27 = vadd.f32 %v1989_v6, %v1985_v10  ;;  %v7046_v39 = vstv %s6988_s13  ;;  %s7052_s13 = sld [smem:[#allocation58_spill]] }
 0x485   :  { %v1849_v9 = vadd.f32 %v1847_v16, %v1827_v11  ;;  %v1951_v43 = vadd.f32 %v7045_v12, %v1947_v1  ;;  %v1891_v62 = vmul.f32 %v7046_v39, %v1888_v47  ;;  %v1932_v53 = vmax.f32 %v1929_v13, 0.0  ;;  %v3075_v30 = vld [vmem:[%s7051_s27 + $0x40] sm:$0xff]  ;;  %v3078_v63 = vld [vmem:[%s7051_s27 + $0x58] sm:$0xff]  ;;  %7055 = sst [smem:[#allocation22_spill]] %s5536_s2 }
 0x486   :  { %v1973_v33 = vadd.f32 %v1971_v25, %v1969_v4  ;;  %v7047_v35 = vstv %s6989_s20  ;;  %v1995_v20 = vadd.f32 %v1993_v60, %v1991_v27  ;;  %v7048_v28 = vstv %s6990_s28  ;;  %v3076_v60 = vld [vmem:[%s7051_s27 + $0x48] sm:$0xff]  ;;  %3361 = vmatpush3.msra.mxu1 %v3078_v63  ;;  %v3153_v11 = vld [vmem:[%s7053_s25 + $0x38] sm:$0xff]  ;;  %s5544_s15 = sld [smem:[#allocation2 + $0x31]] }
 0x487   :  { %v1871_v23 = vadd.f32 %v1869_v18, %v1849_v9  ;;  %v1913_v44 = vmul.f32 %v7047_v35, %v1910_v26  ;;  %v1954_v19 = vmax.f32 %v1951_v43, 0.0  ;;  %v1935_v24 = vmul.f32 %v7048_v28, %v1932_v53  ;;  %3354 = vmatpush3.msra.mxu0 %v3076_v60  ;;  %3362 = vmatprep.subr.mxu1 %v6688_v15  ;;  %7056 = sst [smem:[#allocation16_spill]] %s5540_s12 }
 0x488   :  { %v1976_v49 = vmax.f32 %v1973_v33, 0.0  ;;  %v7049_v6 = vstv %s6991_s29  ;;  %v1998_v17 = vmax.f32 %v1995_v20, 0.0  ;;  %v7050_v58 = vstv %s7011_s0  ;;  %3355 = vmatprep.subr.mxu0 %v6688_v15  ;;  %7057 = sst [smem:[#allocation35_spill]] %s5542_s26 }
 0x489   :  { %v1893_v41 = vadd.f32 %v1891_v62, %v1871_v23  ;;  %v1957_v34 = vmul.f32 %v7049_v6, %v1954_v19  ;;  %3356 = vmatpush3.msra.mxu0 %v3075_v30  ;;  %s5546_s3 = sld [smem:[#allocation5 + $0x31]]  ;;  %v2350_v3 = vstv %s5538_s23  ;;  %v6483_v13 = vstv %s5536_s2 }
 0x48a   :  { %v1979_v57 = vmul.f32 %v7050_v58, %v1976_v49  ;;  %v2001_v25 = vmul.f32 %v1999_v36, %v1998_v17  ;;  %v3077_v36 = vld [vmem:[%s7051_s27 + $0x50] sm:$0xff]  ;;  %3367 = vmatprep.subr.mxu0 %v6688_v15  ;;  %v3155_v37 = vld [vmem:[%s7052_s13 + $0x68] sm:$0xff]  ;;  %v3157_v45 = vld [vmem:[%s7052_s13 + $0x78] sm:$0xff]  ;;  %7059 = sst [smem:[#allocation25_spill]] %s5548_s19  ;;  %v2394_v4 = vstv %s5554_s6 }
 0x48b   :  { %v1915_v50 = vadd.f32 %v1913_v44, %v1893_v41  ;;  %3363 = vmatpush3.msra.mxu1 %v3077_v36  ;;  %v3156_v47 = vld [vmem:[%s7052_s13 + $0x70] sm:$0xff]  ;;  %s5552_s17 = sld [smem:[#allocation2 + $0x32]]  ;;  %v6502_v5 = vstv %s5540_s12  ;;  %v6501_v27 = vstv %s5548_s19  ;;  %v2416_v39 = vstv %s5562_s16 }
 0x48c   :  { %3374 = vmatprep.subr.mxu1 %v6688_v15  ;;  %7058 = sst [smem:[#allocation24_spill]] %s5544_s15  ;;  %v6485_v12 = vstv %s5544_s15  ;;  %v6488_v35 = vstv %s5560_s24 }
 0x48d   :  { %v1937_v55 = vadd.f32 %v1935_v24, %v1915_v50  ;;  %s5556_s21 = sld [smem:[#allocation7 + $0x32]]  ;;  %v6495_v24 = vstv %s5564_s30 }
 0x48e   :  { %7064 = sst [smem:[#allocation30_spill]] %s5564_s30 }
 0x48f   :  { %v1959_v56 = vadd.f32 %v1957_v34, %v1937_v55  ;;  %s5572_s20 = sld [smem:[#allocation7 + $0x34]]  ;;  %v2372_v16 = vstv %s5546_s3  ;;  %v6489_v34 = vstv %s5568_s18 }
 0x490   :  { %s5574_s28 = sld [smem:[#allocation8 + $0x34]] }
 0x491   :  { %v1981_v40 = vadd.f32 %v1979_v57, %v1959_v56  ;;  %7061 = sst [smem:[#allocation28_spill]] %s5552_s17  ;;  %v6487_v62 = vstv %s5552_s17 }
 0x492   :  { %s5576_s29 = sld [smem:[#allocation2 + $0x35]] }
 0x493   :  { %v2003_v54 = vadd.f32 %v2001_v25, %v1981_v40  ;;  %7062 = sst [smem:[#allocation48_spill]] %s5556_s21  ;;  %v6498_v33 = vstv %s5556_s21 }
 0x494   :  { %s5578_s8 = sld [smem:[#allocation5 + $0x35]] }
 0x495   :  { %v2007_v46 = vsel %vm617_vm2, %v2003_v54, -inf  ;;  %7067 = sst [smem:[#allocation51_spill]] %s5572_s20 }
 0x496   :  { %2008 = vmax.xlane.f32.xlu1 %v2007_v46  ;;  %7068 = sst [smem:[#allocation21_spill]] %s5574_s28 }
 0x497   :  { %s5580_s25 = sld [smem:[#allocation7 + $0x35]] }
 0x498   :  { %7069 = sst [smem:[#allocation31_spill]] %s5576_s29 }
 0x499   :  { %s5582_s14 = sld [smem:[#allocation8 + $0x35]] }
 0x49a   :  { %s5584_s22 = sld [smem:[#allocation2 + $0x36]]  ;;  %v2460_v49 = vstv %s5578_s8 }
 0x49b   :  { %s5586_s0 = sld [smem:[#allocation5 + $0x36]] }
 0x49c   :  { %s5588_s4 = sld [smem:[#allocation7 + $0x36]] }
 0x49d   :  { %7070 = sst [smem:[#allocation49_spill]] %s5580_s25 }
 0x49e   :  { %s5590_s1 = sld [smem:[#allocation8 + $0x36]] }
 0x49f   :  { %7071 = sst [smem:[#allocation20_spill]] %s5582_s14 }
 0x4a0   :  { %7072 = sst [smem:[#allocation45_spill]] %s5584_s22 }
 0x4a1   :  { %s5592_s11 = sld [smem:[#allocation2 + $0x37]]  ;;  %v2482_v17 = vstv %s5586_s0 }
 0x4a2   :  { %7073 = sst [smem:[#allocation38_spill]] %s5588_s4 }
 0x4a3   :  { %s5594_s27 = sld [smem:[#allocation5 + $0x37]] }
 0x4a4   :  { %7074 = sst [smem:[#allocation54_spill]] %s5590_s1 }
 0x4a5   :  { %s5596_s29 = sld [smem:[#allocation7 + $0x37]] }
 0x4a6   :  { %s5598_s28 = sld [smem:[#allocation8 + $0x37]] }
 0x4a7   :  { %7075 = sst [smem:[#allocation36_spill]] %s5592_s11 }
 0x4a8   :  { %s5600_s14 = sld [smem:[#allocation2 + $0x38]] }
 0x4a9   :  { %7076 = sst [smem:[#allocation43_spill]] %s5594_s27 }
 0x4aa   :  { %s5602_s22 = sld [smem:[#allocation5 + $0x38]] }
 0x4ab   :  { %7077 = sst [smem:[#allocation34_spill]] %s5596_s29 }
 0x4ac   :  { %7078 = sst [smem:[#allocation44_spill]] %s5598_s28 }
 0x4ad   :  { %s5604_s4 = sld [smem:[#allocation7 + $0x38]] }
 0x4ae   :  { %7079 = sst [smem:[#allocation47_spill]] %s5600_s14 }
 0x4af   :  { %s5606_s1 = sld [smem:[#allocation8 + $0x38]] }
 0x4b0   :  { %7080 = sst [smem:[#allocation55_spill]] %s5602_s22 }
 0x4b1   :  { %s5608_s25 = sld [smem:[#allocation2 + $0x39]] }
 0x4b2   :  { %s5610_s11 = sld [smem:[#allocation5 + $0x39]] }
 0x4b3   :  { %s5612_s27 = sld [smem:[#allocation7 + $0x39]] }
 0x4b4   :  { %s5614_s28 = sld [smem:[#allocation8 + $0x39]] }
 0x4b5   :  { %7081 = sst [smem:[#allocation18_spill]] %s5606_s1 }
 0x4b6   :  { %s5616_s14 = sld [smem:[#allocation2 + $0x3a]] }
 0x4b7   :  { %7082 = sst [smem:[#allocation29_spill]] %s5608_s25 }
 0x4b8   :  { %s5618_s29 = sld [smem:[#allocation5 + $0x3a]] }
 0x4b9   :  { %7083 = sst [smem:[#allocation17_spill]] %s5612_s27 }
 0x4ba   :  { %7084 = sst [smem:[#allocation19_spill]] %s5614_s28 }
 0x4bb   :  { %s5620_s22 = sld [smem:[#allocation7 + $0x3a]] }
 0x4bc   :  { %7085 = sst [smem:[#allocation50_spill]] %s5616_s14 }
 0x4bd   :  { %s5623_s1 = sld [smem:[#allocation8 + $0x3a]] }
 0x4be   :  { %s5626_s25 = sld [smem:[#allocation2 + $0x3b]] }
 0x4bf   :  { %s5631_s14 = sld [smem:[#allocation5 + $0x3b]] }
 0x4c0   :  { %s5644_s23 = sld [smem:[#allocation7 + $0x3b]] }
 0x4c1   :  { %7086 = sst [smem:[#allocation39_spill]] %s5620_s22 }
 0x4c2   :  { %s7088_s22 = sld [smem:[#allocation60_spill]] }
 0x4c3   :  { %7087 = sst [smem:[#allocation40_spill]] %s5623_s1 }
 0x4c4   :  { %s5652_s27 = sld [smem:[#allocation8 + $0x3b]] }
 0x4c5   :  { %s5660_s3 = sld [smem:[#allocation2 + $0x3c]]  ;;  %v2592_v63 = vstv %s5631_s14 }
 0x4c6   :  { %7089 = sst [smem:[#allocation26_spill]] %s5644_s23 }
 0x4c7   :  { %s5664_s6 = sld [smem:[#allocation5 + $0x3c]] }
 0x4c8   :  { %v5636_v26 = vld [vmem:[%s7088_s22] sm:$0xff]  ;;  %v5669_v19 = vld [vmem:[%s7088_s22 + $0x8] sm:$0xff]  ;;  %s7093_s9 = sld [smem:[#allocation31_spill]] }
 0x4c9   :  { %v5639_v9 = vmul.f32 %v5636_v26, %v2350_v3  ;;  %v5647_v43 = vmul.f32 %v5636_v26, %v2372_v16  ;;  %v5656_v53 = vmul.f32 %v5636_v26, %v2394_v4  ;;  %v5672_v20 = vmul.f32 %v5669_v19, %v2350_v3  ;;  %s7095_s5 = sld [smem:[#allocation43_spill]] }
 0x4ca   :  { %7090 = sst [smem:[#allocation42_spill]] %s5652_s27  ;;  %v5675_v50 = vmul.f32 %v5669_v19, %v2372_v16  ;;  %v5678_v28 = vmul.f32 %v5636_v26, %v2416_v39  ;;  %v5685_v55 = vmul.f32 %v5669_v19, %v2394_v4  ;;  %v5693_v56 = vmul.f32 %v5669_v19, %v2416_v39 }
 0x4cb   :  { %7091 = sst [smem:[#allocation46_spill]] %s5660_s3  ;;  %v5707_v46 = vmul.f32 %v5636_v26, %v2460_v49  ;;  %v2570_v3 = vstv %s5618_s29  ;;  %v5789_v42 = vmul.f32 %v5669_v19, %v2592_v63 }
 0x4cc   :  { %s5682_s26 = sld [smem:[#allocation7 + $0x3c]] }
 0x4cd   :  { %s7098_s28 = sld [smem:[#allocation45_spill]]  ;;  %v2614_v6 = vstv %s5664_s6 }
 0x4ce   :  { %s5690_s16 = sld [smem:[#allocation8 + $0x3c]]  ;;  %v5799_v23 = vmul.f32 %v5669_v19, %v2614_v6 }
 0x4cf   :  { %s7102_s21 = sld [smem:[#allocation55_spill]]  ;;  %v2504_v30 = vstv %s7095_s5 }
 0x4d0   :  { %s5700_s19 = sld [smem:[#allocation2 + $0x3d]]  ;;  %v5745_v16 = vmul.f32 %v5669_v19, %v2504_v30 }
 0x4d1   :  { %s7104_s10 = sld [smem:[#allocation36_spill]] }
 0x4d2   :  { %7096 = sst [smem:[#allocation41_spill]] %s5682_s26 }
 0x4d3   :  { %s7105_s0 = sld [smem:[#allocation34_spill]]  ;;  %v6491_v36 = vstv %s7098_s28 }
 0x4d4   :  { %7099 = sst [smem:[#allocation53_spill]] %s5690_s16 }
 0x4d5   :  { %s5711_s12 = sld [smem:[#allocation5 + $0x3d]] }
 0x4d6   :  { %7103 = sst [smem:[#allocation27_spill]] %s5700_s19 }
 0x4d7   :  { %s7106_s18 = sld [smem:[#allocation44_spill]] }
 0x4d8   :  { %s7107_s20 = sld [smem:[#allocation47_spill]] }
 0x4d9   :  { %s5718_s7 = sld [smem:[#allocation7 + $0x3d]] }
 0x4da   :  { %s7111_s22 = sld [smem:[#allocation29_spill]] }
 0x4db   :  { %s7112_s28 = sld [smem:[#allocation17_spill]] }
 0x4dc   :  { %s5742_s30 = sld [smem:[#allocation2 + $0x3e]] }
 0x4dd   :  { %s5796_s29 = sld [smem:[#allocation7 + $0x3e]] }
 0x4de   :  { %s5806_s27 = sld [smem:[#allocation8 + $0x3e]] }
 0x4df   :  { %7108 = sst [smem:[#allocation43_spill]] %s5718_s7 }
 0x4e0   :  { %s5820_s16 = sld [smem:[#allocation2 + $0x3f]] }
 0x4e1   :  { %s7125_s8 = sld [smem:[#allocation16_spill]] }
 0x4e2   :  { %7116 = sst [smem:[#allocation29_spill]] %s5742_s30 }
 0x4e3   :  { %s7128_s5 = sld [smem:[#allocation30_spill]] }
 0x4e4   :  { %7123 = sst [smem:[#allocation56_spill]] %s5806_s27 }
 0x4e5   :  { %s7129_s2 = sld [smem:[#allocation51_spill]] }
 0x4e6   :  { %s7130_s15 = sld [smem:[#allocation49_spill]] }
 0x4e7   :  { %s7131_s17 = sld [smem:[#allocation38_spill]] }
 0x4e8   :  { %s7132_s1 = sld [smem:[#allocation35_spill]] }
 0x4e9   :  { %s7133_s6 = sld [smem:[#allocation32_spill]] }
 0x4ea   :  { %s7137_s14 = sld [smem:[#allocation23_spill]] }
 0x4eb   :  { %s7154_s27 = sld [smem:[#allocation21_spill]] }
 0x50a   :  { %v2006_v0 = vpop.xlane.xlu0 %2005 }
 0x50b   :  { %v2010_v21 = vsub.f32 %v2002_v51, %v2006_v0  ;;  %v3154_v51 = vld [vmem:[%s7052_s13 + $0x60] sm:$0xff]  ;;  %s5570_s13 = sld [smem:[#allocation5 + $0x34]]  ;;  %v5716_v0 = vmul.f32 %v5636_v26, %v2482_v17 }
 0x50d   :  { %v2012_v59 = vmul.f32 1.442695, %v2010_v21  ;;  %v5721_v21 = vmul.f32 %v5669_v19, %v2460_v49  ;;  %v2636_v49 = vstv %s5711_s12  ;;  %s7139_s12 = sld [smem:[#allocation33_spill]] }
 0x50e   :  { %v5809_v41 = vmul.f32 %v5669_v19, %v2636_v49 }
 0x50f   :  { %3415 = vpow2.f32 %v2012_v59 }
 0x511   :  { %v2438_v44 = vstv %s5570_s13  ;;  %s5726_s13 = sld [smem:[#allocation5 + $0x3e]] }
 0x512   :  { %v5696_v58 = vmul.f32 %v5636_v26, %v2438_v44  ;;  %v5703_v25 = vmul.f32 %v5669_v19, %v2438_v44 }
 0x517   :  { %7110 = sst [smem:[#allocation55_spill]] %s5726_s13 }
 0x51c   :  { %v5493_v7 = vpop.eup %3415 }
 0x51d   :  { %3358 = vmatmul.mubr.msk.f32.vlgmr.msra.gmra.mxu0 %vm617_vm2, %v5493_v7 }
 0x51e   :  { %3368 = vmatpush3.xpose.msk.msra.mxu0 %vm104_vm0, %v3155_v37  ;;  %3371 = vmatprep.mubr.msk.f32.mxu0 %vm3537_vm1, %v6688_v15  ;;  %v5777_v37 = vmul.f32 %v5669_v19, %v2570_v3 }
 0x51f   :  { %v2009_v2 = vpop.xlane.xlu1 %2008  ;;  %3369 = vmatprep.subr.mxu0 %v6688_v15 }
 0x520   :  { %v2011_v10 = vsub.f32 %v2003_v54, %v2009_v2  ;;  %v6490_v54 = vstv %s7093_s9  ;;  %v2526_v2 = vstv %s7102_s21  ;;  %s5737_s9 = sld [smem:[#allocation8 + $0x3d]] }
 0x521   :  { %s7115_s21 = sld [smem:[#allocation50_spill]]  ;;  %v5750_v39 = vmul.f32 %v5636_v26, %v2526_v2 }
 0x522   :  { %v2014_v52 = vmul.f32 1.442695, %v2011_v10  ;;  %3370 = vmatpush3.xpose.msk.msra.mxu0 %vm104_vm0, %v3154_v51  ;;  %v5729_v10 = vmul.f32 %v5669_v19, %v2482_v17  ;;  %v6492_v51 = vstv %s7104_s10  ;;  %s7117_s10 = sld [smem:[#allocation39_spill]]  ;;  %v5757_v17 = vmul.f32 %v5669_v19, %v2526_v2 }
 0x523   :  { %3381 = vmatprep.subr.mxu0 %v6688_v15  ;;  %7119 = sst [smem:[#allocation39_spill]] %s5796_s29 }
 0x524   :  { %3417 = vpow2.f32 %v2014_v52  ;;  %v5733_v52 = vmul.f32 %v5636_v26, %v2504_v30 }
 0x525   :  { %3372 = vmatmul.mubr.msk.f32.vlgmr.msra.gmra.mxu0 %vm104_vm0, %v3152_v29 }
 0x526   :  { %3385 = vmatprep.mubr.msk.f32.mxu0 %vm3537_vm1, %v6688_v15  ;;  %7113 = sst [smem:[#allocation47_spill]] %s5737_s9 }
 0x527   :  { %s7140_s9 = sld [smem:[#allocation37_spill]] }
 0x531   :  { %v5515_v1 = vpop.eup %3417 }
 0x532   :  { %3365 = vmatmul.mubr.msk.f32.vlgmr.msra.gmra.mxu1 %vm617_vm2, %v5515_v1 }
 0x533   :  { %3375 = vmatpush3.xpose.msk.msra.mxu1 %vm104_vm0, %v3157_v45  ;;  %3378 = vmatprep.mubr.msk.f32.mxu1 %vm3537_vm1, %v6688_v15  ;;  %v2548_v45 = vstv %s5610_s11  ;;  %s5754_s11 = sld [smem:[#allocation5 + $0x3f]] }
 0x534   :  { %3376 = vmatprep.subr.mxu1 %v6688_v15  ;;  %v5761_v30 = vmul.f32 %v5636_v26, %v2548_v45  ;;  %v5771_v2 = vmul.f32 %v5669_v19, %v2548_v45  ;;  %v6481_v45 = vstv %s5726_s13  ;;  %s7127_s13 = sld [smem:[#allocation48_spill]] }
 0x537   :  { %3377 = vmatpush3.xpose.msk.msra.mxu1 %vm104_vm0, %v3156_v47 }
 0x538   :  { %3388 = vmatprep.subr.mxu1 %v6688_v15 }
 0x539   :  { %7118 = sst [smem:[#allocation50_spill]] %s5754_s11 }
 0x53a   :  { %3379 = vmatmul.mubr.msk.f32.vlgmr.msra.gmra.mxu1 %vm104_vm0, %v3153_v11  ;;  %v5768_v11 = vmul.f32 %v5636_v26, %v2570_v3  ;;  %v5792_v3 = vmul.f32 %v5636_v26, %v2614_v6  ;;  %v5818_v6 = vmul.f32 %v5636_v26, %v6481_v45 }
 0x53b   :  { %3392 = vmatprep.mubr.msk.f32.mxu1 %vm3537_vm1, %v6688_v15 }
 0x5dd   :  { %v5747_v4 = vpop.f32.mrf.mxu0 }
 0x5df   :  { %v3359_v40 = vpop.f32.mrf.mxu0 }
 0x5e0   :  { %v5781_v40 = vmul.f32 %v5636_v26, %v2592_v63  ;;  %v5803_v63 = vmul.f32 %v5636_v26, %v2636_v49 }
 0x5e5   :  { %v5811_v47 = vpop.f32.mrf.mxu0 }
 0x5e6   :  { %v2347_v18 = vmul.f32 %v6483_v13, %v5811_v47  ;;  %v2369_v60 = vmul.f32 %v6485_v12, %v5811_v47  ;;  %v2391_v49 = vmul.f32 %v6487_v62, %v5811_v47  ;;  %v2413_v29 = vmul.f32 %v6488_v35, %v5811_v47 }
 0x5e7   :  { %v3373_v45 = vpop.f32.mrf.mxu0  ;;  %v2435_v59 = vmul.f32 %v6489_v34, %v5811_v47  ;;  %v2457_v13 = vmul.f32 %v6490_v54, %v5811_v47  ;;  %v2479_v12 = vmul.f32 %v6491_v36, %v5811_v47  ;;  %v2501_v62 = vmul.f32 %v6492_v51, %v5811_v47 }
 0x5e8   :  { %v2353_v35 = vadd.f32 %v5639_v9, %v2347_v18  ;;  %v2375_v45 = vadd.f32 %v5647_v43, %v2369_v60  ;;  %v2397_v44 = vadd.f32 %v5656_v53, %v2391_v49  ;;  %v2419_v34 = vadd.f32 %v5678_v28, %v2413_v29 }
 0x5e9   :  { %v2441_v57 = vadd.f32 %v5696_v58, %v2435_v59  ;;  %v2463_v54 = vadd.f32 %v5707_v46, %v2457_v13  ;;  %v2485_v36 = vadd.f32 %v5716_v0, %v2479_v12  ;;  %v2507_v51 = vadd.f32 %v5733_v52, %v2501_v62 }
 0x5ea   :  { %v2357_v9 = vadd.f32 %v6502_v5, %v2353_v35  ;;  %v2379_v18 = vadd.f32 %v6501_v27, %v2375_v45  ;;  %v2401_v43 = vadd.f32 %v6498_v33, %v2397_v44  ;;  %v2423_v53 = vadd.f32 %v6495_v24, %v2419_v34 }
 0x5eb   :  { %v7134_v28 = vstv %s7129_s2  ;;  %v7135_v13 = vstv %s7130_s15  ;;  %v7136_v60 = vstv %s7131_s17  ;;  %v7138_v0 = vstv %s7105_s0  ;;  %s5883_s0 = sld [smem:[#allocation7 + $0x3f]] }
 0x5ec   :  { %v2445_v58 = vadd.f32 %v7134_v28, %v2441_v57  ;;  %v2467_v46 = vadd.f32 %v7135_v13, %v2463_v54  ;;  %v2489_v12 = vadd.f32 %v7136_v60, %v2485_v36  ;;  %v2511_v62 = vadd.f32 %v7138_v0, %v2507_v51 }
 0x5ed   :  { %v2360_v59 = vmax.f32 %v2357_v9, 0.0  ;;  %v2382_v35 = vmax.f32 %v2379_v18, 0.0  ;;  %v2404_v52 = vmax.f32 %v2401_v43, 0.0  ;;  %v2426_v29 = vmax.f32 %v2423_v53, 0.0 }
 0x5ee   :  { %v2664_v49 = vstv %s5796_s29  ;;  %v2676_v34 = vstv %s5820_s16  ;;  %v7141_v57 = vstv %s5754_s11  ;;  %v7142_v45 = vstv %s7132_s1  ;;  %s5889_s11 = sld [smem:[#allocation8 + $0x3f]] }
 0x5ef   :  { %v5877_v54 = vmul.f32 %v5636_v26, %v7141_v57  ;;  %v2363_v36 = vmul.f32 %v7142_v45, %v2360_v59  ;;  %v7143_v28 = vstv %s7133_s6  ;;  %v2448_v9 = vmax.f32 %v2445_v58, 0.0  ;;  %s7171_s29 = sld [smem:[#allocation52_spill]] }
 0x5f0   :  { %v2385_v51 = vmul.f32 %v7143_v28, %v2382_v35  ;;  %v2470_v18 = vmax.f32 %v2467_v46, 0.0  ;;  %v7144_v43 = vstv %s7137_s14  ;;  %v7145_v13 = vstv %s7139_s12  ;;  %s7249_s16 = sld [smem:[#allocation59_spill]] }
 0x5f1   :  { %v2407_v53 = vmul.f32 %v7144_v43, %v2404_v52  ;;  %v2429_v60 = vmul.f32 %v7145_v13, %v2426_v29  ;;  %v2492_v0 = vmax.f32 %v2489_v12, 0.0  ;;  %v2514_v44 = vmax.f32 %v2511_v62, 0.0 }
 0x5f2   :  { %v7146_v26 = vstv %s7140_s9  ;;  %v7147_v59 = vstv %s7107_s20  ;;  %v7148_v35 = vstv %s7111_s22  ;;  %v7149_v46 = vstv %s7115_s21  ;;  %v5902_v24 = vpop.f32.mrf.mxu1 }
 0x5f3   :  { %v2365_v57 = vadd.f32 %v2363_v36, %v7146_v26  ;;  %v2523_v45 = vmul.f32 %v7147_v59, %v5811_v47  ;;  %v2545_v58 = vmul.f32 %v7148_v35, %v5811_v47  ;;  %v2567_v28 = vmul.f32 %v7149_v46, %v5811_v47 }
 0x5f4   :  { %v7150_v52 = vstv %s5626_s25  ;;  %v7151_v62 = vstv %s5660_s3  ;;  %v7152_v36 = vstv %s5700_s19  ;;  %v7153_v13 = vstv %s5742_s30  ;;  %v3366_v33 = vpop.f32.mrf.mxu1  ;;  %s7155_s19 = sld [smem:[#allocation20_spill]] }
 0x5f5   :  { %v2589_v12 = vmul.f32 %v7150_v52, %v5811_v47  ;;  %v2611_v29 = vmul.f32 %v7151_v62, %v5811_v47  ;;  %v2633_v43 = vmul.f32 %v7152_v36, %v5811_v47  ;;  %v2655_v26 = vmul.f32 %v7153_v13, %v5811_v47  ;;  %s7156_s30 = sld [smem:[#allocation54_spill]] }
 0x5f6   :  { %v2387_v59 = vadd.f32 %v2385_v51, %v2365_v57  ;;  %v2529_v35 = vadd.f32 %v5750_v39, %v2523_v45  ;;  %v2551_v46 = vadd.f32 %v5761_v30, %v2545_v58  ;;  %v2573_v52 = vadd.f32 %v5768_v11, %v2567_v28  ;;  %s7163_s3 = sld [smem:[#allocation18_spill]] }
 0x5f7   :  { %v2595_v62 = vadd.f32 %v5781_v40, %v2589_v12  ;;  %v2617_v36 = vadd.f32 %v5792_v3, %v2611_v29  ;;  %v2639_v13 = vadd.f32 %v5803_v63, %v2633_v43  ;;  %v2661_v51 = vadd.f32 %v5818_v6, %v2655_v26 }
 0x5f8   :  { %v2409_v39 = vadd.f32 %v2407_v53, %v2387_v59  ;;  %v7157_v57 = vstv %s5604_s4  ;;  %v7158_v45 = vstv %s7112_s28  ;;  %v7159_v11 = vstv %s7117_s10  ;;  %s7166_s28 = sld [smem:[#allocation22_spill]] }
 0x5f9   :  { %v2533_v30 = vadd.f32 %v7157_v57, %v2529_v35  ;;  %v2555_v58 = vadd.f32 %v7158_v45, %v2551_v46  ;;  %v2577_v33 = vadd.f32 %v7159_v11, %v2573_v52  ;;  %v7160_v28 = vstv %s5644_s23  ;;  %s7168_s23 = sld [smem:[#allocation24_spill]] }
 0x5fa   :  { %v2599_v27 = vadd.f32 %v7160_v28, %v2595_v62  ;;  %v7161_v40 = vstv %s5682_s26  ;;  %v7162_v5 = vstv %s5718_s7  ;;  %v5937_v63 = vadd.f32 %v2664_v49, %v2661_v51  ;;  %s7170_s7 = sld [smem:[#allocation28_spill]]  ;;  %v5949_v51 = vpop.f32.mrf.mxu1 }
 0x5fb   :  { %v2621_v12 = vadd.f32 %v7161_v40, %v2617_v36  ;;  %v2643_v3 = vadd.f32 %v7162_v5, %v2639_v13  ;;  %v2431_v29 = vadd.f32 %v2429_v60, %v2409_v39  ;;  %v7164_v6 = vstv %s7154_s27  ;;  %s7172_s26 = sld [smem:[#allocation31_spill]] }
 0x5fc   :  { %v2451_v43 = vmul.f32 %v7164_v6, %v2448_v9  ;;  %v2536_v53 = vmax.f32 %v2533_v30, 0.0  ;;  %v2686_v26 = vstv %s5883_s0  ;;  %v7165_v59 = vstv %s7155_s19 }
 0x5fd   :  { %v2473_v35 = vmul.f32 %v7165_v59, %v2470_v18  ;;  %v7167_v46 = vstv %s7156_s30  ;;  %v7169_v62 = vstv %s7106_s18  ;;  %v2692_v57 = vstv %s5889_s11  ;;  %s7179_s18 = sld [smem:[#allocation19_spill]] }
 0x5fe   :  { %v2495_v52 = vmul.f32 %v7167_v46, %v2492_v0  ;;  %v2517_v36 = vmul.f32 %v7169_v62, %v2514_v44  ;;  %v2453_v5 = vadd.f32 %v2451_v43, %v2431_v29  ;;  %v2558_v13 = vmax.f32 %v2555_v58, 0.0 }
 0x5ff   :  { %v2580_v60 = vmax.f32 %v2577_v33, 0.0  ;;  %v2602_v9 = vmax.f32 %v2599_v27, 0.0  ;;  %v7173_v39 = vstv %s7163_s3  ;;  %v2624_v45 = vmax.f32 %v2621_v12, 0.0  ;;  %v3380_v27 = vpop.f32.mrf.mxu1  ;;  %s7177_s3 = sld [smem:[#allocation25_spill]] }
 0x600   :  { %v2539_v30 = vmul.f32 %v7173_v39, %v2536_v53  ;;  %v2646_v18 = vmax.f32 %v2643_v3, 0.0  ;;  %v2668_v11 = vmax.f32 %v5937_v63, 0.0  ;;  %v2475_v0 = vadd.f32 %v2473_v35, %v2453_v5 }
 0x601   :  { %v2677_v44 = vmul.f32 %v2676_v34, %v5811_v47  ;;  %v7174_v28 = vstv %s7166_s28  ;;  %v7175_v58 = vstv %s7168_s23  ;;  %v7176_v29 = vstv %s7170_s7  ;;  %s7182_s7 = sld [smem:[#allocation40_spill]] }
 0x602   :  { %v2348_v40 = vmul.f32 %v7174_v28, %v5949_v51  ;;  %v2370_v33 = vmul.f32 %v7175_v58, %v5949_v51  ;;  %v2392_v12 = vmul.f32 %v7176_v29, %v5949_v51  ;;  %v7178_v3 = vstv %s5560_s24  ;;  %s7183_s24 = sld [smem:[#allocation42_spill]] }
 0x603   :  { %v2414_v63 = vmul.f32 %v7178_v3, %v5949_v51  ;;  %v7180_v6 = vstv %s7171_s29  ;;  %v7181_v43 = vstv %s7172_s26  ;;  %v2497_v59 = vadd.f32 %v2495_v52, %v2475_v0  ;;  %s7184_s23 = sld [smem:[#allocation53_spill]] }
 0x604   :  { %v2436_v47 = vmul.f32 %v7180_v6, %v5949_v51  ;;  %v2458_v53 = vmul.f32 %v7181_v43, %v5949_v51  ;;  %v2683_v35 = vadd.f32 %v5877_v54, %v2677_v44  ;;  %v2354_v46 = vadd.f32 %v5672_v20, %v2348_v40  ;;  %s7185_s26 = sld [smem:[#allocation47_spill]] }
 0x605   :  { %v2376_v62 = vadd.f32 %v5675_v50, %v2370_v33  ;;  %v2398_v5 = vadd.f32 %v5685_v55, %v2392_v12  ;;  %v2420_v39 = vadd.f32 %v5693_v56, %v2414_v63  ;;  %v2519_v27 = vadd.f32 %v2517_v36, %v2497_v59  ;;  %s7193_s28 = sld [smem:[#allocation45_spill]] }
 0x606   :  { %v2442_v28 = vadd.f32 %v5703_v25, %v2436_v47  ;;  %v2464_v58 = vadd.f32 %v5721_v21, %v2458_v53  ;;  %v2687_v52 = vadd.f32 %v2686_v26, %v2683_v35  ;;  %v7186_v54 = vstv %s7125_s8  ;;  %s7233_s8 = sld [smem:[#allocation41_spill]] }
 0x607   :  { %v2358_v0 = vadd.f32 %v7186_v54, %v2354_v46  ;;  %v7187_v44 = vstv %s7177_s3  ;;  %v7188_v50 = vstv %s7179_s18  ;;  %v7189_v40 = vstv %s7127_s13  ;;  %s7195_s3 = sld [smem:[#allocation36_spill]] }
 0x608   :  { %v2380_v20 = vadd.f32 %v7187_v44, %v2376_v62  ;;  %v2561_v55 = vmul.f32 %v7188_v50, %v2558_v13  ;;  %v2402_v56 = vadd.f32 %v7189_v40, %v2398_v5  ;;  %v7190_v33 = vstv %s7128_s5  ;;  %s7222_s13 = sld [smem:[#allocation27_spill]] }
 0x609   :  { %v2424_v25 = vadd.f32 %v7190_v33, %v2420_v39  ;;  %v7191_v29 = vstv %s7129_s2  ;;  %v2541_v21 = vadd.f32 %v2539_v30, %v2519_v27  ;;  %v7192_v36 = vstv %s7182_s7  ;;  %s7206_s2 = sld [smem:[#allocation34_spill]] }
 0x60a   :  { %v2446_v12 = vadd.f32 %v7191_v29, %v2442_v28  ;;  %v2583_v3 = vmul.f32 %v7192_v36, %v2580_v60  ;;  %v2361_v63 = vmax.f32 %v2358_v0, 0.0  ;;  %v2383_v6 = vmax.f32 %v2380_v20, 0.0 }
 0x60b   :  { %v7194_v47 = vstv %s7183_s24  ;;  %v7196_v53 = vstv %s7184_s23  ;;  %v7197_v59 = vstv %s7185_s26  ;;  %v2405_v46 = vmax.f32 %v2402_v56, 0.0 }
 0x60c   :  { %v2605_v43 = vmul.f32 %v7194_v47, %v2602_v9  ;;  %v2627_v13 = vmul.f32 %v7196_v53, %v2624_v45  ;;  %v2649_v35 = vmul.f32 %v7197_v59, %v2646_v18  ;;  %v2563_v62 = vadd.f32 %v2561_v55, %v2541_v21 }
 0x60d   :  { %v2690_v30 = vmax.f32 %v2687_v52, 0.0  ;;  %v7198_v5 = vstv %s7132_s1  ;;  %v7199_v39 = vstv %s7130_s15  ;;  %v7200_v27 = vstv %s7133_s6  ;;  %s7208_s15 = sld [smem:[#allocation56_spill]]  ;;  %s3539_s6 = smov 16  }
 0x60e   :  { %v2364_v60 = vmul.f32 %v7198_v5, %v2361_v63  ;;  %v2468_v28 = vadd.f32 %v7199_v39, %v2464_v58  ;;  %v2386_v54 = vmul.f32 %v7200_v27, %v2383_v6  ;;  %v7201_v0 = vstv %s7137_s14  ;;  %s7214_s1 = sld [smem:[#allocation50_spill]]  ;;  %s3538_s14 = smov 8  }
 0x60f   :  { %v2408_v9 = vmul.f32 %v7201_v0, %v2405_v46  ;;  %v2427_v44 = vmax.f32 %v2424_v25, 0.0  ;;  %v2449_v20 = vmax.f32 %v2446_v12, 0.0  ;;  %v2585_v45 = vadd.f32 %v2583_v3, %v2563_v62 }
 0x610   :  { %v7202_v50 = vstv %s7140_s9  ;;  %v7203_v18 = vstv %s7193_s28  ;;  %v7204_v55 = vstv %s7195_s3  ;;  %v7205_v33 = vstv %s7107_s20  ;;  %s7212_s9 = sld [smem:[#allocation17_spill]] }
 0x611   :  { %v2366_v40 = vadd.f32 %v2364_v60, %v7202_v50  ;;  %v2480_v56 = vmul.f32 %v7203_v18, %v5949_v51  ;;  %v2502_v52 = vmul.f32 %v7204_v55, %v5949_v51  ;;  %v2524_v58 = vmul.f32 %v7205_v33, %v5949_v51  ;;  %s7213_s20 = sld [smem:[#allocation55_spill]] }
 0x612   :  { %v7207_v29 = vstv %s7111_s22  ;;  %v7209_v25 = vstv %s7115_s21  ;;  %v7210_v36 = vstv %s5626_s25  ;;  %v2607_v63 = vadd.f32 %v2605_v43, %v2585_v45  ;;  %s7219_s25 = sld [smem:[#allocation26_spill]] }
 0x613   :  { %v2546_v21 = vmul.f32 %v7207_v29, %v5949_v51  ;;  %v2568_v12 = vmul.f32 %v7209_v25, %v5949_v51  ;;  %v2590_v3 = vmul.f32 %v7210_v36, %v5949_v51  ;;  %v2388_v6 = vadd.f32 %v2386_v54, %v2366_v40  ;;  %s7224_s22 = sld [smem:[#allocation44_spill]] }
 0x614   :  { %v2486_v47 = vadd.f32 %v5729_v10, %v2480_v56  ;;  %v2508_v53 = vadd.f32 %v5745_v16, %v2502_v52  ;;  %v7211_v59 = vstv %s7139_s12  ;;  %v2471_v62 = vmax.f32 %v2468_v28, 0.0 }
 0x615   :  { %v2430_v46 = vmul.f32 %v7211_v59, %v2427_v44  ;;  %v2530_v5 = vadd.f32 %v5757_v17, %v2524_v58  ;;  %v2552_v60 = vadd.f32 %v5771_v2, %v2546_v21  ;;  %v2629_v39 = vadd.f32 %v2627_v13, %v2607_v63 }
 0x616   :  { %v2410_v27 = vadd.f32 %v2408_v9, %v2388_v6  ;;  %v7215_v0 = vstv %s7131_s17  ;;  %v7216_v54 = vstv %s7206_s2  ;;  %v7217_v45 = vstv %s7208_s15  ;;  %s7221_s17 = sld [smem:[#allocation46_spill]] }
 0x617   :  { %v2490_v43 = vadd.f32 %v7215_v0, %v2486_v47  ;;  %v2512_v10 = vadd.f32 %v7216_v54, %v2508_v53  ;;  %v2671_v16 = vmul.f32 %v7217_v45, %v2668_v11  ;;  %v7218_v50 = vstv %s5604_s4  ;;  %s7227_s4 = sld [smem:[#allocation29_spill]] }
 0x618   :  { %v2534_v28 = vadd.f32 %v7218_v50, %v2530_v5  ;;  %v2574_v44 = vadd.f32 %v5777_v37, %v2568_v12  ;;  %v2596_v17 = vadd.f32 %v5789_v42, %v2590_v3  ;;  %v2651_v2 = vadd.f32 %v2649_v35, %v2629_v39 }
 0x619   :  { %v2432_v13 = vadd.f32 %v2430_v46, %v2410_v27  ;;  %v7220_v9 = vstv %s7154_s27  ;;  %v2493_v18 = vmax.f32 %v2490_v43, 0.0  ;;  %v2515_v56 = vmax.f32 %v2512_v10, 0.0  ;;  %s7232_s27 = sld [smem:[#allocation18_spill]] }
 0x61a   :  { %v2452_v40 = vmul.f32 %v7220_v9, %v2449_v20  ;;  %v7223_v55 = vstv %s7212_s9  ;;  %v7225_v52 = vstv %s7213_s20  ;;  %v7226_v58 = vstv %s7214_s1 }
 0x61b   :  { %v2556_v11 = vadd.f32 %v7223_v55, %v2552_v60  ;;  %v2660_v33 = vmul.f32 %v5669_v19, %v7225_v52  ;;  %v2682_v37 = vmul.f32 %v5669_v19, %v7226_v58  ;;  %v2673_v42 = vadd.f32 %v2671_v16, %v2651_v2 }
 0x61c   :  { %v2693_v35 = vmul.f32 %v2692_v57, %v2690_v30  ;;  %v2454_v29 = vadd.f32 %v2452_v40, %v2432_v13  ;;  %v7228_v20 = vstv %s7155_s19  ;;  %v7229_v25 = vstv %s7156_s30  ;;  %s7238_s19 = sld [smem:[#allocation43_spill]] }
 0x61d   :  { %v2474_v21 = vmul.f32 %v7228_v20, %v2471_v62  ;;  %v2496_v12 = vmul.f32 %v7229_v25, %v2493_v18  ;;  %v2537_v36 = vmax.f32 %v2534_v28, 0.0  ;;  %v7230_v3 = vstv %s7117_s10 }
 0x61e   :  { %v2578_v63 = vadd.f32 %v7230_v3, %v2574_v44  ;;  %v7231_v6 = vstv %s7219_s25  ;;  %v6068_v53 = vadd.f32 %v2693_v35, %v2673_v42  ;;  %v7234_v19 = vstv %s7221_s17 }
 0x61f   :  { %v2600_v47 = vadd.f32 %v7231_v6, %v2596_v17  ;;  %v2476_v59 = vadd.f32 %v2474_v21, %v2454_v29  ;;  %v2612_v46 = vmul.f32 %v7234_v19, %v5949_v51  ;;  %v7235_v30 = vstv %s7222_s13 }
 0x620   :  { %v2634_v5 = vmul.f32 %v7235_v30, %v5949_v51  ;;  %v7236_v60 = vstv %s7224_s22  ;;  %v2559_v39 = vmax.f32 %v2556_v11, 0.0  ;;  %v7237_v27 = vstv %s7227_s4 }
 0x621   :  { %v2518_v62 = vmul.f32 %v7236_v60, %v2515_v56  ;;  %v2656_v0 = vmul.f32 %v7237_v27, %v5949_v51  ;;  %v2678_v43 = vmul.f32 %v2676_v34, %v5949_v51  ;;  %v2697_v54 = vsel %vm617_vm2, %v6068_v53, -inf  ;;  %v3161_v27 = vld [vmem:[%s7249_s16 + $0x78] sm:$0xff] }
 0x622   :  { %v2498_v10 = vadd.f32 %v2496_v12, %v2476_v59  ;;  %v2618_v45 = vadd.f32 %v5799_v23, %v2612_v46  ;;  %v2640_v16 = vadd.f32 %v5809_v41, %v2634_v5  ;;  %2698 = vmax.xlane.f32.xlu0 %v2697_v54  ;;  %v2581_v50 = vmax.f32 %v2578_v63, 0.0  ;;  %3389 = vmatpush3.msra.mxu1 %v3161_v27 }
 0x623   :  { %v7240_v44 = vstv %s7232_s27  ;;  %v7241_v2 = vstv %s7233_s8  ;;  %v2662_v9 = vadd.f32 %v2660_v33, %v2656_v0  ;;  %v2603_v34 = vmax.f32 %v2600_v47, 0.0  ;;  %3390 = vmatprep.subr.mxu1 %v6688_v15 }
 0x624   :  { %v2520_v28 = vadd.f32 %v2518_v62, %v2498_v10  ;;  %v2540_v17 = vmul.f32 %v7240_v44, %v2537_v36  ;;  %v2622_v13 = vadd.f32 %v7241_v2, %v2618_v45  ;;  %v1323_v51 = vsel %vm617_vm2, %v4867_v48, 0.0 }
 0x625   :  { %v7242_v23 = vstv %s7179_s18  ;;  %v7243_v41 = vstv %s7238_s19  ;;  %v2684_v55 = vadd.f32 %v2682_v37, %v2678_v43  ;;  %v7244_v52 = vstv %s7182_s7  ;;  %s3540_s7 = smov 24  }
 0x626   :  { %v2542_v40 = vadd.f32 %v2540_v17, %v2520_v28  ;;  %v2562_v18 = vmul.f32 %v7242_v23, %v2559_v39  ;;  %v2644_v56 = vadd.f32 %v7243_v41, %v2640_v16  ;;  %1324 = vadd.xlane.f32.xlu0 %v1323_v51  ;;  %v2584_v58 = vmul.f32 %v7244_v52, %v2581_v50  ;;  %v3159_v39 = vld [vmem:[%s7249_s16 + $0x68] sm:$0xff] }
 0x627   :  { %v2625_v42 = vmax.f32 %v2622_v13, 0.0  ;;  %v2666_v33 = vadd.f32 %v2664_v49, %v2662_v9  ;;  %v2016_v48 = vsel %vm617_vm2, %v5493_v7, 0.0  ;;  %v7245_v29 = vstv %s7183_s24  ;;  %3382 = vmatpush3.msra.mxu0 %v3159_v39  ;;  %s3541_s24 = smov [#allocation11]  }
 0x628   :  { %v2564_v11 = vadd.f32 %v2562_v18, %v2542_v40  ;;  %v2606_v20 = vmul.f32 %v7245_v29, %v2603_v34  ;;  %v2647_v21 = vmax.f32 %v2644_v56, 0.0  ;;  %v2688_v25 = vadd.f32 %v2686_v26, %v2684_v55  ;;  %3383 = vmatprep.subr.mxu0 %v6688_v15 }
 0x629   :  { %v7246_v12 = vstv %s7184_s23  ;;  %v2669_v3 = vmax.f32 %v2666_v33, 0.0  ;;  %v7247_v6 = vstv %s7185_s26  ;;  %v7248_v19 = vstv %s7208_s15  ;;  %s2904_s23 = sshll.u32 %s3541_s24, 4  ;;  %s2905_s23 = int_to_ptr.vmem [resolvable:$true] %s2904_s23 }
 0x62a   :  { %v2586_v35 = vadd.f32 %v2584_v58, %v2564_v11  ;;  %2017 = vadd.xlane.f32.xlu0 %v2016_v48  ;;  %v2628_v36 = vmul.f32 %v7246_v12, %v2625_v42  ;;  %v2650_v47 = vmul.f32 %v7247_v6, %v2647_v21  ;;  %v2691_v59 = vmax.f32 %v2688_v25, 0.0  ;;  %s3503_s26 = scalar_lea.vmem %s2905_s23, 256  ;;  %p3508_p12 = scmp.lt.s32.totalorder %s2905_s23, %s2905_s23 }
 0x62b   :  { %v2672_v46 = vmul.f32 %v7248_v19, %v2669_v3  ;;  %v1326_v26 = vsel %vm617_vm2, %v4889_v14, 0.0  ;;  %v2019_v62 = vsel %vm617_vm2, %v5515_v1, 0.0  ;;  %v3160_v14 = vld [vmem:[%s7249_s16 + $0x70] sm:$0xff]  ;;  %v630_v28 = vsel %vm617_vm2, %v4231_v22, 0.0  ;;  %p3504_p11 = scmp.ne.s32.totalorder %s2905_s23, %s3503_s26  ;;  %p3509_p13 = scmp.lt.s32.totalorder %s3503_s26, %s3503_s26 }
 0x62c   :  { %v2608_v37 = vadd.f32 %v2606_v20, %v2586_v35  ;;  %v2694_v7 = vmul.f32 %v2692_v57, %v2691_v59  ;;  %v3158_v57 = vld [vmem:[%s7249_s16 + $0x60] sm:$0xff]  ;;  %3391 = vmatpush3.msra.mxu1 %v3160_v14  ;;  %v633_v13 = vsel %vm617_vm2, %v4253_v32, 0.0 }
 0x62d   :  { %3384 = vmatpush3.msra.mxu0 %v3158_v57  ;;  %p3510_p0 = por %p3509_p13, %p3508_p12 }
 0x62e   :  { %v2630_v63 = vadd.f32 %v2628_v36, %v2608_v37 }
 0x62f   :  { %p3511_p1 = pnand %p3510_p0, %p3504_p11 }
 0x630   :  { %v2652_v49 = vadd.f32 %v2650_v47, %v2630_v63 }
 0x632   :  { %v2674_v30 = vadd.f32 %v2672_v46, %v2652_v49 }
 0x634   :  { %v2696_v5 = vadd.f32 %v2694_v7, %v2674_v30 }
 0x636   :  { %v2700_v60 = vsel %vm617_vm2, %v2696_v5, -inf }
 0x637   :  { %2701 = vmax.xlane.f32.xlu1 %v2700_v60 }
 0x63b   :  { %1327 = vadd.xlane.f32.xlu1 %v1326_v26 }
 0x63f   :  { %2020 = vadd.xlane.f32.xlu1 %v2019_v62 }
 0x6ab   :  { %v2699_v1 = vpop.xlane.xlu0 %2698 }
 0x6ac   :  { %v2703_v0 = vsub.f32 %v6068_v53, %v2699_v1 }
 0x6ae   :  { %v2705_v43 = vmul.f32 1.442695, %v2703_v0 }
 0x6af   :  { %v1325_v15 = vpop.xlane.xlu0 %1324 }
 0x6b0   :  { %3419 = vpow2.f32 %v2705_v43 }
 0x6b3   :  { %v2018_v9 = vpop.xlane.xlu0 %2017 }
 0x6bd   :  { %v3420_v54 = vpop.eup %3419 }
 0x6be   :  { %3386 = vmatmul.mubr.msk.f32.vlgmr.msra.gmra.mxu0 %vm617_vm2, %v3420_v54  ;;  %v2709_v10 = vsel %vm617_vm2, %v3420_v54, 0.0 }
 0x6bf   :  { %2710 = vadd.xlane.f32.xlu0 %v2709_v10 }
 0x6c0   :  { %v2702_v45 = vpop.xlane.xlu1 %2701 }
 0x6c1   :  { %v2704_v16 = vsub.f32 %v2696_v5, %v2702_v45 }
 0x6c3   :  { %v2707_v50 = vmul.f32 1.442695, %v2704_v16  ;;  %631 = vadd.xlane.f32.xlu0 %v630_v28 }
 0x6c4   :  { %v1328_v17 = vpop.xlane.xlu1 %1327 }
 0x6c5   :  { %3421 = vpow2.f32 %v2707_v50 }
 0x6c6   :  { %3423 = vrcp.f32 %v1325_v15 }
 0x6c7   :  { %3425 = vrcp.f32 %v1328_v17 }
 0x6c8   :  { %3427 = vrcp.f32 %v2018_v9  ;;  %v2021_v34 = vpop.xlane.xlu1 %2020 }
 0x6c9   :  { %3429 = vrcp.f32 %v2021_v34 }
 0x6d2   :  { %v3422_v44 = vpop.eup %3421 }
 0x6d3   :  { %3393 = vmatmul.mubr.msk.f32.vlgmr.msra.gmra.mxu1 %vm617_vm2, %v3422_v44  ;;  %v2712_v53 = vsel %vm617_vm2, %v3422_v44, 0.0  ;;  %v3424_v2 = vpop.eup %3423 }
 0x6d4   :  { %2713 = vadd.xlane.f32.xlu1 %v2712_v53  ;;  %v1477_v22 = vmul.f32 %v3424_v2, %v5111_v38  ;;  %v3426_v51 = vpop.eup %3425 }
 0x6d5   :  { %v1478_v40 = vmul.f32 %v3426_v51, %v5266_v31  ;;  %v3428_v23 = vpop.eup %3427 }
 0x6d6   :  { %v2170_v18 = vmul.f32 %v3428_v23, %v5747_v4  ;;  %v3430_v41 = vpop.eup %3429 }
 0x6d7   :  { %v2171_v32 = vmul.f32 %v3430_v41, %v5902_v24 }
 0x6d8   :  { %634 = vadd.xlane.f32.xlu1 %v633_v13 }
 0x6d9   :  { %2867 = vrot.lane.b32.xlu0 %v1477_v22, %s3538_s14 }
 0x6e9   :  { %2869 = vrot.lane.b32.xlu1 %v1478_v40, %s3538_s14 }
 0x6ed   :  { %2875 = vrot.lane.b32.xlu1 %v2170_v18, %s3539_s6 }
 0x6f1   :  { %2877 = vrot.lane.b32.xlu1 %v2171_v32, %s3539_s6 }
 0x748   :  { %v2711_v38 = vpop.xlane.xlu0 %2710 }
 0x749   :  { %3431 = vrcp.f32 %v2711_v38 }
 0x74c   :  { %v632_v48 = vpop.xlane.xlu0 %631 }
 0x750   :  { %v2868_v21 = vpop.permute.xlu0 %2867 }
 0x756   :  { %v3432_v56 = vpop.eup %3431 }
 0x75d   :  { %v2714_v31 = vpop.xlane.xlu1 %2713 }
 0x75e   :  { %3433 = vrcp.f32 %v2714_v31 }
 0x75f   :  { %3435 = vrcp.f32 %v632_v48 }
 0x761   :  { %v635_v35 = vpop.xlane.xlu1 %634 }
 0x762   :  { %3437 = vrcp.f32 %v635_v35 }
 0x765   :  { %v2870_v20 = vpop.permute.xlu1 %2869 }
 0x769   :  { %v2876_v37 = vpop.permute.xlu1 %2875 }
 0x76b   :  { %v3434_v58 = vpop.eup %3433 }
 0x76c   :  { %v3436_v24 = vpop.eup %3435 }
 0x76d   :  { %v784_v29 = vmul.f32 %v3436_v24, %v4475_v8  ;;  %v2878_v47 = vpop.permute.xlu1 %2877 }
 0x76f   :  { %v2889_v25 = vsel %vm104_vm0, %v784_v29, %v2868_v21  ;;  %v3438_v63 = vpop.eup %3437 }
 0x770   :  { %v2891_v12 = vsel %vm617_vm2, %v2889_v25, %v2876_v37  ;;  %v785_v6 = vmul.f32 %v3438_v63, %v4635_v61 }
 0x772   :  { %v2890_v8 = vsel %vm104_vm0, %v785_v6, %v2870_v20 }
 0x773   :  { %v2892_v59 = vsel %vm617_vm2, %v2890_v8, %v2878_v47 }
 0x77e   :  { %v2784_v55 = vpop.f32.mrf.mxu0 }
 0x77f   :  { %v2863_v11 = vmul.f32 %v3432_v56, %v2784_v55 }
 0x780   :  { %v3387_v52 = vpop.f32.mrf.mxu0 }
 0x781   :  { %2883 = vrot.lane.b32.xlu0 %v2863_v11, %s3540_s7 }
 0x793   :  { %v2857_v42 = vpop.f32.mrf.mxu1 }
 0x794   :  { %v2864_v33 = vmul.f32 %v3434_v58, %v2857_v42 }
 0x795   :  { %v3394_v4 = vpop.f32.mrf.mxu1 }
 0x796   :  { %2885 = vrot.lane.b32.xlu1 %v2864_v33, %s3540_s7 }
 0x7f3   :  { %v2884_v36 = vpop.permute.xlu0 %2883 }
 0x7f4   :  { %v2894_v3 = vsel %vm2893_vm3, %v2891_v12, %v2884_v36 }
 0x7f5   :  { %2897 = vst.msk [vmem:[#allocation11] sm:$0xff] %vm2896_vm4, %v2894_v3 }
 0x808   :  { %v2886_v49 = vpop.permute.xlu1 %2885 }
 0x809   :  { %v2895_v19 = vsel %vm2893_vm3, %v2892_v59, %v2886_v49 }
 0x80a   :  { %2898 = vst.msk [vmem:[#allocation11 + $0x8] sm:$0xff] %vm2896_vm4, %v2895_v19 }
 0x80b   :  { %3514 = shalt.err (!%p3511_p1)
}
 0x80c   :  { %s3542_s28 = smov 128   ;;  %s7250_s15 = sld [smem:[#allocation61_spill]] }
 0x812   :  { %2910 = dma.vmem_to_hbm [thread:$0]  %s2905_s23, 256, %s7250_s15, [#allocation3], %s3542_s28, %s3542_s28, %s3538_s14  }
 0x813   :  { %3529 = dma.done.wait [#allocation3], 256  }
 0x814   :  { %3530 = vsyncadd [#allocation3], 4294967040 }
 0x815   :  { %2914 = vsyncpa [#allocation3], 1 }
 0x816   :  { %2915 = vsyncpa [#allocation4], 1 }
 0x817   :  { %2916 = vsyncpa [#allocation6], 1 }
 0x818   :  { %2917 = vsyncpa [#allocation9], 1 }

</bundles_post_ra>
